<compile_context>
chip_gen: v7x
topology: tpu7x:2x2x1
jax: 0.10.0
libtpu: 0.0.40
codegen_flags: <defaults>
</compile_context>

<pallas_src>
import functools
from typing import NamedTuple

import jax
import jax.numpy as jnp
from jax.experimental import pallas as pl
from jax.experimental.pallas import tpu as pltpu

NEG_SLOPE = 0.01  # F.leaky_relu default negative_slope


# ----------------------------------------------------------------------------
# packed-layout geometry helpers
# ----------------------------------------------------------------------------
def _align_up(v, m):
    return ((v + m - 1) // m) * m


class Geom(NamedTuple):
    H: int
    W: int
    pad: int
    Hp: int
    Wp: int
    M: int      # Hp * Wp
    Mp: int     # M rounded up to a multiple of 128 (lane-dense stores)
    base: int   # VMEM-only halo margin (128-aligned), >= pad*Wp + pad
    Stot: int   # Mp + 2*base  (VMEM scratch width)


def make_geom(H, W, pad):
    Hp, Wp = H + 2 * pad, W + 2 * pad
    M = Hp * Wp
    Mp = _align_up(M, 128)
    margin = pad * Wp + pad
    base = _align_up(margin, 128) if margin else 0
    return Geom(H, W, pad, Hp, Wp, M, Mp, base, Mp + 2 * base)


def pack(x, g):
    """(N,C,H,W) -> packed (N,C,Mp): zero ring of width pad, flattened, zero tail."""
    N, C, _, _ = x.shape
    xp = jnp.pad(x, ((0, 0), (0, 0), (g.pad, g.pad), (g.pad, g.pad))).reshape(N, C, g.M)
    return jnp.pad(xp, ((0, 0), (0, 0), (0, g.Mp - g.M)))


def unpack(y, g):
    """packed (N,C,Mp) -> (N,C,H,W)."""
    N, C, _ = y.shape
    y = y[:, :, :g.M].reshape(N, C, g.Hp, g.Wp)
    return y[:, :, g.pad:g.pad + g.H, g.pad:g.pad + g.W]


def interior_mask(g):
    """(1, Mp) float mask: 1 on the real image, 0 on the pad ring and the tail lanes."""
    hp = jnp.arange(g.Hp)
    wp = jnp.arange(g.Wp)
    inner = (((hp >= g.pad) & (hp < g.pad + g.H))[:, None] &
             ((wp >= g.pad) & (wp < g.pad + g.W))[None, :])
    m = inner.astype(jnp.float32).reshape(1, g.M)
    return jnp.pad(m, ((0, 0), (0, g.Mp - g.M)))


def _tap_offsets(K, conv_pad, Wp):
    return tuple((kh - conv_pad) * Wp + (kw - conv_pad)
                 for kh in range(K) for kw in range(K))


# ----------------------------------------------------------------------------
# Pallas kernels
# ----------------------------------------------------------------------------
def _res_stack_kernel(x_ref, w_ref, b_ref, mask_ref, o_ref, buf, act, slab,
                      *, depth, offs, base, Mp):
    """Fused BlockWidth stack: repeat `depth` times  x <- x + conv_K(leaky_relu(x)).

    Channels on sublanes, flattened padded spatial grid (Mp lanes) on lanes.  Each
    layer stacks the K*K shifted views of the activation into `slab` and performs a
    single (K*K*C)-deep MXU contraction.  Halo margins exist only in VMEM (`buf`).
    """
    C = buf.shape[0]
    if base:
        buf[:, :base] = jnp.zeros((C, base), jnp.float32)
        buf[:, base + Mp:] = jnp.zeros((C, base), jnp.float32)
    buf[:, base:base + Mp] = x_ref[0].astype(jnp.float32)
    mask = mask_ref[...].astype(jnp.float32)                 # (1, Mp)

    def layer(l, carry):
        a = buf[...]
        act[...] = jnp.where(a > 0, a, NEG_SLOPE * a)        # leaky_relu once per element
        for t, off in enumerate(offs):                       # build the (K*K*C, Mp) slab
            slab[t * C:(t + 1) * C, :] = act[:, base + off:base + off + Mp]
        conv = jnp.dot(w_ref[l].astype(jnp.float32), slab[...],
                       preferred_element_type=jnp.float32)   # one MXU pass per layer
        conv = conv + b_ref[l].astype(jnp.float32)           # (C, 1) broadcast
        # residual add; mask keeps the pad ring / tail at exactly 0 for the next layer
        buf[:, base:base + Mp] = (buf[:, base:base + Mp] + conv) * mask
        return carry

    jax.lax.fori_loop(0, depth, layer, 0)
    o_ref[0] = buf[:, base:base + Mp].astype(o_ref.dtype)    # full-width lane-dense store


def _conv_kernel(x_ref, w_ref, b_ref, mask_ref, o_ref, buf, slab, *, offs, base, Mp):
    """'same' Conv2d (+bias) in the packed layout, single fused K*K*Cin contraction."""
    Cin = buf.shape[0]
    if base:
        buf[:, :base] = jnp.zeros((Cin, base), jnp.float32)
        buf[:, base + Mp:] = jnp.zeros((Cin, base), jnp.float32)
    buf[:, base:base + Mp] = x_ref[0].astype(jnp.float32)
    for t, off in enumerate(offs):
        slab[t * Cin:(t + 1) * Cin, :] = buf[:, base + off:base + off + Mp]
    out = jnp.dot(w_ref[...].astype(jnp.float32), slab[...],
                  preferred_element_type=jnp.float32)
    out = (out + b_ref[...].astype(jnp.float32)) * mask_ref[...].astype(jnp.float32)
    o_ref[0] = out.astype(o_ref.dtype)


def _conv1x1_kernel(x_ref, w_ref, b_ref, mask_ref, o_ref):
    """1x1 conv on the packed layout (no halo / slab needed)."""
    out = jnp.dot(w_ref[...].astype(jnp.float32), x_ref[0].astype(jnp.float32),
                  preferred_element_type=jnp.float32)
    out = (out + b_ref[...].astype(jnp.float32)) * mask_ref[...].astype(jnp.float32)
    o_ref[0] = out.astype(o_ref.dtype)


def _conv1x1_cat2_kernel(x_ref, s_ref, wx_ref, ws_ref, b_ref, mask_ref, o_ref):
    """1x1 conv on concat([x, skip], dim=1) without materialising the concat in HBM."""
    out = jnp.dot(wx_ref[...].astype(jnp.float32), x_ref[0].astype(jnp.float32),
                  preferred_element_type=jnp.float32)
    out = out + jnp.dot(ws_ref[...].astype(jnp.float32), s_ref[0].astype(jnp.float32),
                        preferred_element_type=jnp.float32)
    out = (out + b_ref[...].astype(jnp.float32)) * mask_ref[...].astype(jnp.float32)
    o_ref[0] = out.astype(o_ref.dtype)


# ----------------------------------------------------------------------------
# Pallas wrappers (operate on the packed (N, C, Mp) layout)
# ----------------------------------------------------------------------------
def conv_packed(xp, w, b, g):
    """'same' Conv2d: packed (N,Cin,Mp) -> packed (N,Cout,Mp); torch OIHW weights."""
    N, Cin, _ = xp.shape
    Cout, _, K, _ = w.shape
    conv_pad = (K - 1) // 2                                  # 'same' conv (matches module)
    w_packed = jnp.transpose(w, (0, 2, 3, 1)).reshape(Cout, K * K * Cin)
    b_col = b.reshape(Cout, 1)
    mask = interior_mask(g)
    common = dict(
        grid=(N,),                                           # batch-parallel grid
        out_specs=pl.BlockSpec((1, Cout, g.Mp), lambda n: (n, 0, 0)),
        out_shape=jax.ShapeDtypeStruct((N, Cout, g.Mp), xp.dtype),
        compiler_params=pltpu.CompilerParams(dimension_semantics=("parallel",)),
    )
    if K == 1:
        return pl.pallas_call(
            _conv1x1_kernel,
            in_specs=[
                pl.BlockSpec((1, Cin, g.Mp), lambda n: (n, 0, 0)),
                pl.BlockSpec((Cout, Cin), lambda n: (0, 0)),
                pl.BlockSpec((Cout, 1), lambda n: (0, 0)),
                pl.BlockSpec((1, g.Mp), lambda n: (0, 0)),
            ],
            **common,
        )(xp, w_packed, b_col, mask)

    offs = _tap_offsets(K, conv_pad, g.Wp)
    kern = functools.partial(_conv_kernel, offs=offs, base=g.base, Mp=g.Mp)
    return pl.pallas_call(
        kern,
        in_specs=[
            pl.BlockSpec((1, Cin, g.Mp), lambda n: (n, 0, 0)),
            pl.BlockSpec((Cout, K * K * Cin), lambda n: (0, 0)),
            pl.BlockSpec((Cout, 1), lambda n: (0, 0)),
            pl.BlockSpec((1, g.Mp), lambda n: (0, 0)),
        ],
        scratch_shapes=[
            pltpu.VMEM((Cin, g.Stot), jnp.float32),          # haloed input
            pltpu.VMEM((K * K * Cin, g.Mp), jnp.float32),    # stacked shifted views
        ],
        **common,
    )(xp, w_packed, b_col, mask)


def res_stack_packed(xp, blocks, g):
    """Fused BlockWidth stack: one pallas_call for the whole depth."""
    N, C, _ = xp.shape
    depth = len(blocks)
    K = blocks[0][0].shape[-1]
    conv_pad = (K - 1) // 2
    w_stack = jnp.stack(
        [jnp.transpose(w, (0, 2, 3, 1)).reshape(C, K * K * C) for w, _ in blocks])
    b_stack = jnp.stack([b.reshape(C, 1) for _, b in blocks])
    mask = interior_mask(g)
    offs = _tap_offsets(K, conv_pad, g.Wp)
    kern = functools.partial(_res_stack_kernel, depth=depth, offs=offs,
                             base=g.base, Mp=g.Mp)
    return pl.pallas_call(
        kern,
        grid=(N,),
        in_specs=[
            pl.BlockSpec((1, C, g.Mp), lambda n: (n, 0, 0)),
            pl.BlockSpec((depth, C, K * K * C), lambda n: (0, 0, 0)),
            pl.BlockSpec((depth, C, 1), lambda n: (0, 0, 0)),
            pl.BlockSpec((1, g.Mp), lambda n: (0, 0)),
        ],
        out_specs=pl.BlockSpec((1, C, g.Mp), lambda n: (n, 0, 0)),
        out_shape=jax.ShapeDtypeStruct((N, C, g.Mp), xp.dtype),
        scratch_shapes=[
            pltpu.VMEM((C, g.Stot), jnp.float32),            # running activation + halo
            pltpu.VMEM((C, g.Stot), jnp.float32),            # leaky_relu(activation)
            pltpu.VMEM((K * K * C, g.Mp), jnp.float32),      # stacked shifted views
        ],
        compiler_params=pltpu.CompilerParams(dimension_semantics=("parallel",)),
    )(xp, w_stack, b_stack, mask)


def conv1x1_cat_packed(xp, skipp, w, b, g):
    """UpsampleBlock epilog: Conv2d(2w->w, 1x1) on cat([x, skip]) without the concat."""
    N, Cx, _ = xp.shape
    _, Cs, _ = skipp.shape
    Cout = w.shape[0]
    wx = w[:, :Cx, 0, 0]
    ws = w[:, Cx:, 0, 0]
    b_col = b.reshape(Cout, 1)
    mask = interior_mask(g)
    return pl.pallas_call(
        _conv1x1_cat2_kernel,
        grid=(N,),
        in_specs=[
            pl.BlockSpec((1, Cx, g.Mp), lambda n: (n, 0, 0)),
            pl.BlockSpec((1, Cs, g.Mp), lambda n: (n, 0, 0)),
            pl.BlockSpec((Cout, Cx), lambda n: (0, 0)),
            pl.BlockSpec((Cout, Cs), lambda n: (0, 0)),
            pl.BlockSpec((Cout, 1), lambda n: (0, 0)),
            pl.BlockSpec((1, g.Mp), lambda n: (0, 0)),
        ],
        out_specs=pl.BlockSpec((1, Cout, g.Mp), lambda n: (n, 0, 0)),
        out_shape=jax.ShapeDtypeStruct((N, Cout, g.Mp), xp.dtype),
        compiler_params=pltpu.CompilerParams(dimension_semantics=("parallel",)),
    )(xp, skipp, wx, ws, b_col, mask)


def downsample_packed(xp, w, b, g_in, scale):
    """Conv2d(C->2C, kernel=stride=scale, pad=0) == space-to-depth + packed 1x1 conv."""
    # TODO(synk): do the strided space-to-depth gather in-kernel (halo DMA) instead of
    # this wrapper reshuffle; it is one of the two remaining per-level HBM round trips.
    x = unpack(xp, g_in)
    N, C, H, W = x.shape
    Ho, Wo = H // scale, W // scale
    xr = x[:, :, :Ho * scale, :Wo * scale].reshape(N, C, Ho, scale, Wo, scale)
    xr = jnp.transpose(xr, (0, 3, 5, 1, 2, 4)).reshape(N, scale * scale * C, Ho, Wo)
    g_out = make_geom(Ho, Wo, g_in.pad)
    w1 = jnp.transpose(w, (0, 2, 3, 1)).reshape(w.shape[0], scale * scale * C, 1, 1)
    return conv_packed(pack(xr, g_out), w1, b, g_out), g_out


def upsample_packed(xp, g_lo, scale):
    """nn.Upsample(scale, nearest) on the packed layout."""
    # TODO(synk): fold the nearest replication into the consumer kernel (repeated reads).
    x = unpack(xp, g_lo)
    x = jnp.repeat(jnp.repeat(x, scale, axis=2), scale, axis=3)
    g_hi = make_geom(g_lo.H * scale, g_lo.W * scale, g_lo.pad)
    return pack(x, g_hi), g_hi


# ----------------------------------------------------------------------------
# SpectralUNet forward (packed layout end-to-end, NCHW only at entry/exit)
# ----------------------------------------------------------------------------
def spectral_unet_forward(x, params):
    pad, s = params["pad"], params["scale"]
    N, _, H, W = x.shape
    g = make_geom(H, W, pad)
    out = conv_packed(pack(x, g), *params["prolog"], g)
    skips = []
    for d in params["down"]:
        skips.append((out, g))                     # DownsampleBlock returns its input as skip
        out = res_stack_packed(out, d["blocks"], g)
        out, g = downsample_packed(out, *d["epilog"], g, s)
    out = res_stack_packed(out, params["bottleneck"], g)
    for u, (skip, g_skip) in zip(params["up"], skips[::-1]):
        # prolog = Upsample(nearest) + 1x1 conv; a 1x1 conv commutes exactly with nearest
        # upsampling, so run the (scale^2-cheaper) conv at low resolution and replicate after.
        out = conv_packed(out, *u["prolog"], g)
        out, g = upsample_packed(out, g, s)
        out = res_stack_packed(out, u["blocks"], g)
        if (g.H, g.W) != (g_skip.H, g_skip.W):
            # TODO(synk): fix_shapes_2d source not provided; assuming right/bottom zero-pad.
            o4 = unpack(out, g)
            o4 = jnp.pad(o4, ((0, 0), (0, 0),
                              (0, g_skip.H - g.H), (0, g_skip.W - g.W)))
            out, g = pack(o4, g_skip), g_skip
        out = conv1x1_cat_packed(out, skip, *u["epilog"], g)
    out = conv_packed(out, *params["epilog"], g)
    return unpack(out, g)


# ----------------------------------------------------------------------------
# Pure-JAX reference (mirrors the PyTorch forward exactly)
# ----------------------------------------------------------------------------
def _ref_conv(x, w, b, stride=1, pad=0):
    dn = ("NCHW", "OIHW", "NCHW")
    y = jax.lax.conv_general_dilated(
        x, w, (stride, stride), ((pad, pad), (pad, pad)),
        dimension_numbers=dn, precision=jax.lax.Precision.HIGHEST)
    return y + b[None, :, None, None]


def _ref_blocks(x, blocks, pad):
    for w, b in blocks:
        a = jnp.where(x > 0, x, NEG_SLOPE * x)
        x = x + _ref_conv(a, w, b, 1, pad)
    return x


def reference_forward(x, p):
    pad, s = p["pad"], p["scale"]
    out = _ref_conv(x, *p["prolog"], 1, pad)
    skips = []
    for d in p["down"]:
        skips.append(out)
        out = _ref_blocks(out, d["blocks"], pad)
        out = _ref_conv(out, *d["epilog"], s, 0)
    out = _ref_blocks(out, p["bottleneck"], pad)
    for u, skip in zip(p["up"], skips[::-1]):
        out = jnp.repeat(jnp.repeat(out, s, axis=2), s, axis=3)   # nn.Upsample(nearest)
        out = _ref_conv(out, *u["prolog"], 1, 0)
        out = _ref_blocks(out, u["blocks"], pad)
        dh = skip.shape[2] - out.shape[2]
        dw = skip.shape[3] - out.shape[3]
        out = jnp.pad(out, ((0, 0), (0, 0), (0, dh), (0, dw)))
        out = _ref_conv(jnp.concatenate([out, skip], axis=1), *u["epilog"], 1, 0)
    return _ref_conv(out, *p["epilog"], 1, pad)


# ----------------------------------------------------------------------------
# Deterministic parameter construction (torch OIHW layout)
# ----------------------------------------------------------------------------
def make_params(key, in_ch, out_ch, width, scale, bottleneck_width, depth, K, pad):
    cnt = [0]

    def nxt():
        cnt[0] += 1
        return jax.random.fold_in(key, cnt[0])

    def conv_init(cin, cout, k):
        kw, kb = jax.random.split(nxt())
        w = 0.1 * jax.random.normal(kw, (cout, cin, k, k), jnp.float32)
        b = 0.1 * jax.random.normal(kb, (cout,), jnp.float32)
        return w, b

    def blocks_init(w_ch):
        return [conv_init(w_ch, w_ch, K) for _ in range(depth)]

    return {
        "prolog": conv_init(in_ch, width[0], K),
        "down": [{"blocks": blocks_init(w), "epilog": conv_init(w, 2 * w, scale)}
                 for w in width],
        "bottleneck": blocks_init(bottleneck_width),
        "up": [{"prolog": conv_init(2 * w, w, 1),
                "blocks": blocks_init(w),
                "epilog": conv_init(2 * w, w, 1)} for w in width[::-1]],
        "epilog": conv_init(width[0], out_ch, K),
        "scale": scale, "pad": pad, "K": K,
    }


# ----------------------------------------------------------------------------
# Main
# ----------------------------------------------------------------------------
if __name__ == "__main__":
    in_channels, out_channels = 3, 2
    width = [4, 8]                     # requires 2*width[i] == width[i+1]
    scale = 2
    bottleneck_width = 2 * width[-1]   # == channels leaving the last DownsampleBlock
    block_depth = 2
    kernel_size, padding = 3, 1
    N, H, W = 2, 16, 16

    key = jax.random.PRNGKey(0)
    kx, kp = jax.random.split(key)
    x = jax.random.normal(kx, (N, in_channels, H, W), jnp.float32)     # NCHW
    params = make_params(kp, in_channels, out_channels, width, scale,
                         bottleneck_width, block_depth, kernel_size, padding)

    fwd = jax.jit(functools.partial(spectral_unet_forward, params=params))
    out = fwd(x)
    jax.block_until_ready(out)

    ref = reference_forward(x, params)
    assert out.shape == (N, out_channels, H, W), out.shape
    max_err = float(jnp.max(jnp.abs(out - ref)))
    # small headroom over f32 for the MXU contraction order / multi-pass f32 matmul
    assert jnp.allclose(out, ref, atol=5e-4, rtol=5e-4), f"max_err={max_err}"

    print("KERNEL_OK")
</pallas_src>

<mosaic_0001>
module attributes {stable_mosaic.version = 11 : i64} {
  func.func @_res_stack_kernel(%arg0: i32, %arg1: memref<1x4x384xf32, #tpu.memory_space<vmem>>, %arg2: memref<2x4x36xf32, #tpu.memory_space<vmem>>, %arg3: memref<2x4x1xf32, #tpu.memory_space<vmem>>, %arg4: memref<1x384xf32, #tpu.memory_space<vmem>>, %arg5: memref<1x4x384xf32, #tpu.memory_space<vmem>>, %arg6: memref<4x640xf32, #tpu.memory_space<vmem>>, %arg7: memref<4x640xf32, #tpu.memory_space<vmem>>, %arg8: memref<36x384xf32, #tpu.memory_space<vmem>>) attributes {dimension_semantics = [#tpu.dimension_semantics<parallel>], iteration_bounds = array<i64: 2>, scalar_prefetch = 0 : i64, scratch_operands = 3 : i64, tpu.core_type = #tpu.core_type<tc>, window_params = [{transform_indices = @transform_0, window_bounds = array<i64: 1, 4, 384>}, {pipeline_mode = #tpu.pipeline_mode<synchronous>, transform_indices = @transform_1, window_bounds = array<i64: 2, 4, 36>}, {pipeline_mode = #tpu.pipeline_mode<synchronous>, transform_indices = @transform_2, window_bounds = array<i64: 2, 4, 1>}, {pipeline_mode = #tpu.pipeline_mode<synchronous>, transform_indices = @transform_3, window_bounds = array<i64: 1, 384>}, {transform_indices = @transform_4, window_bounds = array<i64: 1, 4, 384>}]} {
    %cst = arith.constant 0.000000e+00 : f32
    %0 = vector.broadcast %cst : f32 to vector<4x128xf32>
    %c0 = arith.constant 0 : index
    %c0_0 = arith.constant 0 : index
    %1 = vector.load %arg6[%c0, %c0_0] : memref<4x640xf32, #tpu.memory_space<vmem>>, vector<4x128xf32>
    tpu.vector_store %arg6[%c0, %c0_0], %0 {strides = array<i32>} : memref<4x640xf32, #tpu.memory_space<vmem>>, vector<4x128xf32>,
    %cst_1 = arith.constant 0.000000e+00 : f32
    %2 = vector.broadcast %cst_1 : f32 to vector<4x128xf32>
    %c0_2 = arith.constant 0 : index
    %c512 = arith.constant 512 : index
    %3 = vector.load %arg6[%c0_2, %c512] : memref<4x640xf32, #tpu.memory_space<vmem>>, vector<4x128xf32>
    tpu.vector_store %arg6[%c0_2, %c512], %2 {strides = array<i32>} : memref<4x640xf32, #tpu.memory_space<vmem>>, vector<4x128xf32>,
    %c0_3 = arith.constant 0 : index
    %c0_4 = arith.constant 0 : index
    %c0_5 = arith.constant 0 : index
    %4 = vector.load %arg1[%c0_3, %c0_4, %c0_5] : memref<1x4x384xf32, #tpu.memory_space<vmem>>, vector<1x4x384xf32>
    %5 = vector.shape_cast %4 : vector<1x4x384xf32> to vector<4x384xf32>
    %c0_6 = arith.constant 0 : index
    %c128 = arith.constant 128 : index
    %6 = vector.load %arg6[%c0_6, %c128] : memref<4x640xf32, #tpu.memory_space<vmem>>, vector<4x384xf32>
    tpu.vector_store %arg6[%c0_6, %c128], %5 {strides = array<i32>} : memref<4x640xf32, #tpu.memory_space<vmem>>, vector<4x384xf32>,
    %c0_7 = arith.constant 0 : index
    %c0_8 = arith.constant 0 : index
    %7 = vector.load %arg4[%c0_7, %c0_8] : memref<1x384xf32, #tpu.memory_space<vmem>>, vector<1x384xf32>
    %c0_i32 = arith.constant 0 : i32
    %c2_i32 = arith.constant 2 : i32
    %8 = arith.addi %c0_i32, %c2_i32 : i32
    %c1_i32 = arith.constant 1 : i32
    scf.for %arg9 = %c0_i32 to %8 step %c1_i32  : i32 {
      %c0_15 = arith.constant 0 : index
      %c0_16 = arith.constant 0 : index
      %13 = vector.load %arg6[%c0_15, %c0_16] : memref<4x640xf32, #tpu.memory_space<vmem>>, vector<4x640xf32>
      %cst_17 = arith.constant 0.000000e+00 : f32
      %14 = vector.broadcast %cst_17 : f32 to vector<4x640xf32>
      %15 = arith.cmpf ogt, %13, %14 : vector<4x640xf32>
      %cst_18 = arith.constant 0.00999999977 : f32
      %16 = vector.broadcast %cst_18 : f32 to vector<4x640xf32>
      %17 = arith.mulf %16, %13 : vector<4x640xf32>
      %18 = arith.select %15, %13, %17 : vector<4x640xi1>, vector<4x640xf32>
      %c0_19 = arith.constant 0 : index
      %c0_20 = arith.constant 0 : index
      %19 = vector.load %arg7[%c0_19, %c0_20] : memref<4x640xf32, #tpu.memory_space<vmem>>, vector<4x640xf32>
      tpu.vector_store %arg7[%c0_19, %c0_20], %18 {strides = array<i32>} : memref<4x640xf32, #tpu.memory_space<vmem>>, vector<4x640xf32>,
      %c0_21 = arith.constant 0 : index
      %c109 = arith.constant 109 : index
      %20 = vector.load %arg7[%c0_21, %c109] : memref<4x640xf32, #tpu.memory_space<vmem>>, vector<4x384xf32>
      %c0_22 = arith.constant 0 : index
      %c0_23 = arith.constant 0 : index
      %21 = vector.load %arg8[%c0_22, %c0_23] : memref<36x384xf32, #tpu.memory_space<vmem>>, vector<4x384xf32>
      tpu.vector_store %arg8[%c0_22, %c0_23], %20 {strides = array<i32>} : memref<36x384xf32, #tpu.memory_space<vmem>>, vector<4x384xf32>,
      %c0_24 = arith.constant 0 : index
      %c110 = arith.constant 110 : index
      %22 = vector.load %arg7[%c0_24, %c110] : memref<4x640xf32, #tpu.memory_space<vmem>>, vector<4x384xf32>
      %c4 = arith.constant 4 : index
      %c0_25 = arith.constant 0 : index
      %23 = vector.load %arg8[%c4, %c0_25] : memref<36x384xf32, #tpu.memory_space<vmem>>, vector<4x384xf32>
      tpu.vector_store %arg8[%c4, %c0_25], %22 {strides = array<i32>} : memref<36x384xf32, #tpu.memory_space<vmem>>, vector<4x384xf32>,
      %c0_26 = arith.constant 0 : index
      %c111 = arith.constant 111 : index
      %24 = vector.load %arg7[%c0_26, %c111] : memref<4x640xf32, #tpu.memory_space<vmem>>, vector<4x384xf32>
      %c8 = arith.constant 8 : index
      %c0_27 = arith.constant 0 : index
      %25 = vector.load %arg8[%c8, %c0_27] : memref<36x384xf32, #tpu.memory_space<vmem>>, vector<4x384xf32>
      tpu.vector_store %arg8[%c8, %c0_27], %24 {strides = array<i32>} : memref<36x384xf32, #tpu.memory_space<vmem>>, vector<4x384xf32>,
      %c0_28 = arith.constant 0 : index
      %c127 = arith.constant 127 : index
      %26 = vector.load %arg7[%c0_28, %c127] : memref<4x640xf32, #tpu.memory_space<vmem>>, vector<4x384xf32>
      %c12 = arith.constant 12 : index
      %c0_29 = arith.constant 0 : index
      %27 = vector.load %arg8[%c12, %c0_29] : memref<36x384xf32, #tpu.memory_space<vmem>>, vector<4x384xf32>
      tpu.vector_store %arg8[%c12, %c0_29], %26 {strides = array<i32>} : memref<36x384xf32, #tpu.memory_space<vmem>>, vector<4x384xf32>,
      %c0_30 = arith.constant 0 : index
      %c128_31 = arith.constant 128 : index
      %28 = vector.load %arg7[%c0_30, %c128_31] : memref<4x640xf32, #tpu.memory_space<vmem>>, vector<4x384xf32>
      %c16 = arith.constant 16 : index
      %c0_32 = arith.constant 0 : index
      %29 = vector.load %arg8[%c16, %c0_32] : memref<36x384xf32, #tpu.memory_space<vmem>>, vector<4x384xf32>
      tpu.vector_store %arg8[%c16, %c0_32], %28 {strides = array<i32>} : memref<36x384xf32, #tpu.memory_space<vmem>>, vector<4x384xf32>,
      %c0_33 = arith.constant 0 : index
      %c129 = arith.constant 129 : index
      %30 = vector.load %arg7[%c0_33, %c129] : memref<4x640xf32, #tpu.memory_space<vmem>>, vector<4x384xf32>
      %c20 = arith.constant 20 : index
      %c0_34 = arith.constant 0 : index
      %31 = vector.load %arg8[%c20, %c0_34] : memref<36x384xf32, #tpu.memory_space<vmem>>, vector<4x384xf32>
      tpu.vector_store %arg8[%c20, %c0_34], %30 {strides = array<i32>} : memref<36x384xf32, #tpu.memory_space<vmem>>, vector<4x384xf32>,
      %c0_35 = arith.constant 0 : index
      %c145 = arith.constant 145 : index
      %32 = vector.load %arg7[%c0_35, %c145] : memref<4x640xf32, #tpu.memory_space<vmem>>, vector<4x384xf32>
      %c24 = arith.constant 24 : index
      %c0_36 = arith.constant 0 : index
      %33 = vector.load %arg8[%c24, %c0_36] : memref<36x384xf32, #tpu.memory_space<vmem>>, vector<4x384xf32>
      tpu.vector_store %arg8[%c24, %c0_36], %32 {strides = array<i32>} : memref<36x384xf32, #tpu.memory_space<vmem>>, vector<4x384xf32>,
      %c0_37 = arith.constant 0 : index
      %c146 = arith.constant 146 : index
      %34 = vector.load %arg7[%c0_37, %c146] : memref<4x640xf32, #tpu.memory_space<vmem>>, vector<4x384xf32>
      %c28 = arith.constant 28 : index
      %c0_38 = arith.constant 0 : index
      %35 = vector.load %arg8[%c28, %c0_38] : memref<36x384xf32, #tpu.memory_space<vmem>>, vector<4x384xf32>
      tpu.vector_store %arg8[%c28, %c0_38], %34 {strides = array<i32>} : memref<36x384xf32, #tpu.memory_space<vmem>>, vector<4x384xf32>,
      %c0_39 = arith.constant 0 : index
      %c147 = arith.constant 147 : index
      %36 = vector.load %arg7[%c0_39, %c147] : memref<4x640xf32, #tpu.memory_space<vmem>>, vector<4x384xf32>
      %c32 = arith.constant 32 : index
      %c0_40 = arith.constant 0 : index
      %37 = vector.load %arg8[%c32, %c0_40] : memref<36x384xf32, #tpu.memory_space<vmem>>, vector<4x384xf32>
      tpu.vector_store %arg8[%c32, %c0_40], %36 {strides = array<i32>} : memref<36x384xf32, #tpu.memory_space<vmem>>, vector<4x384xf32>,
      %38 = arith.index_cast %arg9 : i32 to index
      %c0_41 = arith.constant 0 : index
      %c0_42 = arith.constant 0 : index
      %39 = vector.load %arg2[%38, %c0_41, %c0_42] : memref<2x4x36xf32, #tpu.memory_space<vmem>>, vector<1x4x36xf32>
      %40 = vector.shape_cast %39 : vector<1x4x36xf32> to vector<4x36xf32>
      %c0_43 = arith.constant 0 : index
      %c0_44 = arith.constant 0 : index
      %41 = vector.load %arg8[%c0_43, %c0_44] : memref<36x384xf32, #tpu.memory_space<vmem>>, vector<36x384xf32>
      %cst_45 = arith.constant dense<0.000000e+00> : vector<4x384xf32>
      %42 = tpu.matmul %40, %41, %cst_45 {dimension_numbers = #tpu.dot_dimension_numbers<[1], [0], [0], [1], [0, 0, 1, 1], [], []>} : vector<4x36xf32>, vector<36x384xf32>, vector<4x384xf32> -> vector<4x384xf32>
      %43 = arith.index_cast %arg9 : i32 to index
      %c0_46 = arith.constant 0 : index
      %c0_47 = arith.constant 0 : index
      %44 = vector.load %arg3[%43, %c0_46, %c0_47] : memref<2x4x1xf32, #tpu.memory_space<vmem>>, vector<1x4x1xf32>
      %45 = vector.shape_cast %44 : vector<1x4x1xf32> to vector<4x1xf32>
      %46 = vector.broadcast %45 : vector<4x1xf32> to vector<4x384xf32>
      %47 = arith.addf %42, %46 : vector<4x384xf32>
      %c0_48 = arith.constant 0 : index
      %c128_49 = arith.constant 128 : index
      %48 = vector.load %arg6[%c0_48, %c128_49] : memref<4x640xf32, #tpu.memory_space<vmem>>, vector<4x384xf32>
      %49 = arith.addf %48, %47 : vector<4x384xf32>
      %50 = vector.broadcast %7 : vector<1x384xf32> to vector<4x384xf32>
      %51 = arith.mulf %49, %50 : vector<4x384xf32>
      %c0_50 = arith.constant 0 : index
      %c128_51 = arith.constant 128 : index
      %52 = vector.load %arg6[%c0_50, %c128_51] : memref<4x640xf32, #tpu.memory_space<vmem>>, vector<4x384xf32>
      tpu.vector_store %arg6[%c0_50, %c128_51], %51 {strides = array<i32>} : memref<4x640xf32, #tpu.memory_space<vmem>>, vector<4x384xf32>,
    }
    %c2_i32_9 = arith.constant 2 : i32
    %c0_10 = arith.constant 0 : index
    %c128_11 = arith.constant 128 : index
    %9 = vector.load %arg6[%c0_10, %c128_11] : memref<4x640xf32, #tpu.memory_space<vmem>>, vector<4x384xf32>
    %c0_12 = arith.constant 0 : index
    %c0_13 = arith.constant 0 : index
    %c0_14 = arith.constant 0 : index
    %10 = vector.load %arg5[%c0_12, %c0_13, %c0_14] : memref<1x4x384xf32, #tpu.memory_space<vmem>>, vector<1x4x384xf32>
    %11 = vector.shape_cast %10 : vector<1x4x384xf32> to vector<4x384xf32>
    %12 = vector.shape_cast %9 : vector<4x384xf32> to vector<1x4x384xf32>
    tpu.vector_store %arg5[%c0_12, %c0_13, %c0_14], %12 {strides = array<i32>} : memref<1x4x384xf32, #tpu.memory_space<vmem>>, vector<1x4x384xf32>,
    return
  }
  func.func @transform_0(%arg0: i32) -> (i32, i32, i32) {
    %c0_i32 = arith.constant 0 : i32
    %c0_i32_0 = arith.constant 0 : i32
    %c0_i32_1 = arith.constant 0 : i32
    return %arg0, %c0_i32, %c0_i32_0 : i32, i32, i32
  }
  func.func @transform_1(%arg0: i32) -> (i32, i32, i32) {
    %c0_i32 = arith.constant 0 : i32
    %c0_i32_0 = arith.constant 0 : i32
    %c0_i32_1 = arith.constant 0 : i32
    %c0_i32_2 = arith.constant 0 : i32
    return %c0_i32, %c0_i32_0, %c0_i32_1 : i32, i32, i32
  }
  func.func @transform_2(%arg0: i32) -> (i32, i32, i32) {
    %c0_i32 = arith.constant 0 : i32
    %c0_i32_0 = arith.constant 0 : i32
    %c0_i32_1 = arith.constant 0 : i32
    %c0_i32_2 = arith.constant 0 : i32
    return %c0_i32, %c0_i32_0, %c0_i32_1 : i32, i32, i32
  }
  func.func @transform_3(%arg0: i32) -> (i32, i32) {
    %c0_i32 = arith.constant 0 : i32
    %c0_i32_0 = arith.constant 0 : i32
    %c0_i32_1 = arith.constant 0 : i32
    return %c0_i32, %c0_i32_0 : i32, i32
  }
  func.func @transform_4(%arg0: i32) -> (i32, i32, i32) {
    %c0_i32 = arith.constant 0 : i32
    %c0_i32_0 = arith.constant 0 : i32
    %c0_i32_1 = arith.constant 0 : i32
    return %arg0, %c0_i32, %c0_i32_0 : i32, i32, i32
  }
}

module attributes {stable_mosaic.version = 11 : i64} {
  func.func @_conv_kernel(%arg0: i32, %arg1: memref<1x3x384xf32, #tpu.memory_space<vmem>>, %arg2: memref<4x27xf32, #tpu.memory_space<vmem>>, %arg3: memref<4x1xf32, #tpu.memory_space<vmem>>, %arg4: memref<1x384xf32, #tpu.memory_space<vmem>>, %arg5: memref<1x4x384xf32, #tpu.memory_space<vmem>>, %arg6: memref<3x640xf32, #tpu.memory_space<vmem>>, %arg7: memref<27x384xf32, #tpu.memory_space<vmem>>) attributes {dimension_semantics = [#tpu.dimension_semantics<parallel>], iteration_bounds = array<i64: 2>, scalar_prefetch = 0 : i64, scratch_operands = 2 : i64, tpu.core_type = #tpu.core_type<tc>, window_params = [{transform_indices = @transform_0, window_bounds = array<i64: 1, 3, 384>}, {pipeline_mode = #tpu.pipeline_mode<synchronous>, transform_indices = @transform_1, window_bounds = array<i64: 4, 27>}, {pipeline_mode = #tpu.pipeline_mode<synchronous>, transform_indices = @transform_2, window_bounds = array<i64: 4, 1>}, {pipeline_mode = #tpu.pipeline_mode<synchronous>, transform_indices = @transform_3, window_bounds = array<i64: 1, 384>}, {transform_indices = @transform_4, window_bounds = array<i64: 1, 4, 384>}]} {
    %cst = arith.constant 0.000000e+00 : f32
    %0 = vector.broadcast %cst : f32 to vector<3x128xf32>
    %c0 = arith.constant 0 : index
    %c0_0 = arith.constant 0 : index
    %1 = vector.load %arg6[%c0, %c0_0] : memref<3x640xf32, #tpu.memory_space<vmem>>, vector<3x128xf32>
    tpu.vector_store %arg6[%c0, %c0_0], %0 {strides = array<i32>} : memref<3x640xf32, #tpu.memory_space<vmem>>, vector<3x128xf32>,
    %cst_1 = arith.constant 0.000000e+00 : f32
    %2 = vector.broadcast %cst_1 : f32 to vector<3x128xf32>
    %c0_2 = arith.constant 0 : index
    %c512 = arith.constant 512 : index
    %3 = vector.load %arg6[%c0_2, %c512] : memref<3x640xf32, #tpu.memory_space<vmem>>, vector<3x128xf32>
    tpu.vector_store %arg6[%c0_2, %c512], %2 {strides = array<i32>} : memref<3x640xf32, #tpu.memory_space<vmem>>, vector<3x128xf32>,
    %c0_3 = arith.constant 0 : index
    %c0_4 = arith.constant 0 : index
    %c0_5 = arith.constant 0 : index
    %4 = vector.load %arg1[%c0_3, %c0_4, %c0_5] : memref<1x3x384xf32, #tpu.memory_space<vmem>>, vector<1x3x384xf32>
    %5 = vector.shape_cast %4 : vector<1x3x384xf32> to vector<3x384xf32>
    %c0_6 = arith.constant 0 : index
    %c128 = arith.constant 128 : index
    %6 = vector.load %arg6[%c0_6, %c128] : memref<3x640xf32, #tpu.memory_space<vmem>>, vector<3x384xf32>
    tpu.vector_store %arg6[%c0_6, %c128], %5 {strides = array<i32>} : memref<3x640xf32, #tpu.memory_space<vmem>>, vector<3x384xf32>,
    %c0_7 = arith.constant 0 : index
    %c109 = arith.constant 109 : index
    %7 = vector.load %arg6[%c0_7, %c109] : memref<3x640xf32, #tpu.memory_space<vmem>>, vector<3x384xf32>
    %c0_8 = arith.constant 0 : index
    %c0_9 = arith.constant 0 : index
    %8 = vector.load %arg7[%c0_8, %c0_9] : memref<27x384xf32, #tpu.memory_space<vmem>>, vector<3x384xf32>
    tpu.vector_store %arg7[%c0_8, %c0_9], %7 {strides = array<i32>} : memref<27x384xf32, #tpu.memory_space<vmem>>, vector<3x384xf32>,
    %c0_10 = arith.constant 0 : index
    %c110 = arith.constant 110 : index
    %9 = vector.load %arg6[%c0_10, %c110] : memref<3x640xf32, #tpu.memory_space<vmem>>, vector<3x384xf32>
    %c3 = arith.constant 3 : index
    %c0_11 = arith.constant 0 : index
    %10 = vector.load %arg7[%c3, %c0_11] : memref<27x384xf32, #tpu.memory_space<vmem>>, vector<3x384xf32>
    tpu.vector_store %arg7[%c3, %c0_11], %9 {strides = array<i32>} : memref<27x384xf32, #tpu.memory_space<vmem>>, vector<3x384xf32>,
    %c0_12 = arith.constant 0 : index
    %c111 = arith.constant 111 : index
    %11 = vector.load %arg6[%c0_12, %c111] : memref<3x640xf32, #tpu.memory_space<vmem>>, vector<3x384xf32>
    %c6 = arith.constant 6 : index
    %c0_13 = arith.constant 0 : index
    %12 = vector.load %arg7[%c6, %c0_13] : memref<27x384xf32, #tpu.memory_space<vmem>>, vector<3x384xf32>
    tpu.vector_store %arg7[%c6, %c0_13], %11 {strides = array<i32>} : memref<27x384xf32, #tpu.memory_space<vmem>>, vector<3x384xf32>,
    %c0_14 = arith.constant 0 : index
    %c127 = arith.constant 127 : index
    %13 = vector.load %arg6[%c0_14, %c127] : memref<3x640xf32, #tpu.memory_space<vmem>>, vector<3x384xf32>
    %c9 = arith.constant 9 : index
    %c0_15 = arith.constant 0 : index
    %14 = vector.load %arg7[%c9, %c0_15] : memref<27x384xf32, #tpu.memory_space<vmem>>, vector<3x384xf32>
    tpu.vector_store %arg7[%c9, %c0_15], %13 {strides = array<i32>} : memref<27x384xf32, #tpu.memory_space<vmem>>, vector<3x384xf32>,
    %c0_16 = arith.constant 0 : index
    %c128_17 = arith.constant 128 : index
    %15 = vector.load %arg6[%c0_16, %c128_17] : memref<3x640xf32, #tpu.memory_space<vmem>>, vector<3x384xf32>
    %c12 = arith.constant 12 : index
    %c0_18 = arith.constant 0 : index
    %16 = vector.load %arg7[%c12, %c0_18] : memref<27x384xf32, #tpu.memory_space<vmem>>, vector<3x384xf32>
    tpu.vector_store %arg7[%c12, %c0_18], %15 {strides = array<i32>} : memref<27x384xf32, #tpu.memory_space<vmem>>, vector<3x384xf32>,
    %c0_19 = arith.constant 0 : index
    %c129 = arith.constant 129 : index
    %17 = vector.load %arg6[%c0_19, %c129] : memref<3x640xf32, #tpu.memory_space<vmem>>, vector<3x384xf32>
    %c15 = arith.constant 15 : index
    %c0_20 = arith.constant 0 : index
    %18 = vector.load %arg7[%c15, %c0_20] : memref<27x384xf32, #tpu.memory_space<vmem>>, vector<3x384xf32>
    tpu.vector_store %arg7[%c15, %c0_20], %17 {strides = array<i32>} : memref<27x384xf32, #tpu.memory_space<vmem>>, vector<3x384xf32>,
    %c0_21 = arith.constant 0 : index
    %c145 = arith.constant 145 : index
    %19 = vector.load %arg6[%c0_21, %c145] : memref<3x640xf32, #tpu.memory_space<vmem>>, vector<3x384xf32>
    %c18 = arith.constant 18 : index
    %c0_22 = arith.constant 0 : index
    %20 = vector.load %arg7[%c18, %c0_22] : memref<27x384xf32, #tpu.memory_space<vmem>>, vector<3x384xf32>
    tpu.vector_store %arg7[%c18, %c0_22], %19 {strides = array<i32>} : memref<27x384xf32, #tpu.memory_space<vmem>>, vector<3x384xf32>,
    %c0_23 = arith.constant 0 : index
    %c146 = arith.constant 146 : index
    %21 = vector.load %arg6[%c0_23, %c146] : memref<3x640xf32, #tpu.memory_space<vmem>>, vector<3x384xf32>
    %c21 = arith.constant 21 : index
    %c0_24 = arith.constant 0 : index
    %22 = vector.load %arg7[%c21, %c0_24] : memref<27x384xf32, #tpu.memory_space<vmem>>, vector<3x384xf32>
    tpu.vector_store %arg7[%c21, %c0_24], %21 {strides = array<i32>} : memref<27x384xf32, #tpu.memory_space<vmem>>, vector<3x384xf32>,
    %c0_25 = arith.constant 0 : index
    %c147 = arith.constant 147 : index
    %23 = vector.load %arg6[%c0_25, %c147] : memref<3x640xf32, #tpu.memory_space<vmem>>, vector<3x384xf32>
    %c24 = arith.constant 24 : index
    %c0_26 = arith.constant 0 : index
    %24 = vector.load %arg7[%c24, %c0_26] : memref<27x384xf32, #tpu.memory_space<vmem>>, vector<3x384xf32>
    tpu.vector_store %arg7[%c24, %c0_26], %23 {strides = array<i32>} : memref<27x384xf32, #tpu.memory_space<vmem>>, vector<3x384xf32>,
    %c0_27 = arith.constant 0 : index
    %c0_28 = arith.constant 0 : index
    %25 = vector.load %arg2[%c0_27, %c0_28] : memref<4x27xf32, #tpu.memory_space<vmem>>, vector<4x27xf32>
    %c0_29 = arith.constant 0 : index
    %c0_30 = arith.constant 0 : index
    %26 = vector.load %arg7[%c0_29, %c0_30] : memref<27x384xf32, #tpu.memory_space<vmem>>, vector<27x384xf32>
    %cst_31 = arith.constant dense<0.000000e+00> : vector<4x384xf32>
    %27 = tpu.matmul %25, %26, %cst_31 {dimension_numbers = #tpu.dot_dimension_numbers<[1], [0], [0], [1], [0, 0, 1, 1], [], []>} : vector<4x27xf32>, vector<27x384xf32>, vector<4x384xf32> -> vector<4x384xf32>
    %c0_32 = arith.constant 0 : index
    %c0_33 = arith.constant 0 : index
    %28 = vector.load %arg3[%c0_32, %c0_33] : memref<4x1xf32, #tpu.memory_space<vmem>>, vector<4x1xf32>
    %29 = vector.broadcast %28 : vector<4x1xf32> to vector<4x384xf32>
    %30 = arith.addf %27, %29 : vector<4x384xf32>
    %c0_34 = arith.constant 0 : index
    %c0_35 = arith.constant 0 : index
    %31 = vector.load %arg4[%c0_34, %c0_35] : memref<1x384xf32, #tpu.memory_space<vmem>>, vector<1x384xf32>
    %32 = vector.broadcast %31 : vector<1x384xf32> to vector<4x384xf32>
    %33 = arith.mulf %30, %32 : vector<4x384xf32>
    %c0_36 = arith.constant 0 : index
    %c0_37 = arith.constant 0 : index
    %c0_38 = arith.constant 0 : index
    %34 = vector.load %arg5[%c0_36, %c0_37, %c0_38] : memref<1x4x384xf32, #tpu.memory_space<vmem>>, vector<1x4x384xf32>
    %35 = vector.shape_cast %34 : vector<1x4x384xf32> to vector<4x384xf32>
    %36 = vector.shape_cast %33 : vector<4x384xf32> to vector<1x4x384xf32>
    tpu.vector_store %arg5[%c0_36, %c0_37, %c0_38], %36 {strides = array<i32>} : memref<1x4x384xf32, #tpu.memory_space<vmem>>, vector<1x4x384xf32>,
    return
  }
  func.func @transform_0(%arg0: i32) -> (i32, i32, i32) {
    %c0_i32 = arith.constant 0 : i32
    %c0_i32_0 = arith.constant 0 : i32
    %c0_i32_1 = arith.constant 0 : i32
    return %arg0, %c0_i32, %c0_i32_0 : i32, i32, i32
  }
  func.func @transform_1(%arg0: i32) -> (i32, i32) {
    %c0_i32 = arith.constant 0 : i32
    %c0_i32_0 = arith.constant 0 : i32
    %c0_i32_1 = arith.constant 0 : i32
    return %c0_i32, %c0_i32_0 : i32, i32
  }
  func.func @transform_2(%arg0: i32) -> (i32, i32) {
    %c0_i32 = arith.constant 0 : i32
    %c0_i32_0 = arith.constant 0 : i32
    %c0_i32_1 = arith.constant 0 : i32
    return %c0_i32, %c0_i32_0 : i32, i32
  }
  func.func @transform_3(%arg0: i32) -> (i32, i32) {
    %c0_i32 = arith.constant 0 : i32
    %c0_i32_0 = arith.constant 0 : i32
    %c0_i32_1 = arith.constant 0 : i32
    return %c0_i32, %c0_i32_0 : i32, i32
  }
  func.func @transform_4(%arg0: i32) -> (i32, i32, i32) {
    %c0_i32 = arith.constant 0 : i32
    %c0_i32_0 = arith.constant 0 : i32
    %c0_i32_1 = arith.constant 0 : i32
    return %arg0, %c0_i32, %c0_i32_0 : i32, i32, i32
  }
}

module attributes {stable_mosaic.version = 11 : i64} {
  func.func @_conv1x1_kernel(%arg0: i32, %arg1: memref<1x16x128xf32, #tpu.memory_space<vmem>>, %arg2: memref<8x16xf32, #tpu.memory_space<vmem>>, %arg3: memref<8x1xf32, #tpu.memory_space<vmem>>, %arg4: memref<1x128xf32, #tpu.memory_space<vmem>>, %arg5: memref<1x8x128xf32, #tpu.memory_space<vmem>>) attributes {dimension_semantics = [#tpu.dimension_semantics<parallel>], iteration_bounds = array<i64: 2>, scalar_prefetch = 0 : i64, scratch_operands = 0 : i64, tpu.core_type = #tpu.core_type<tc>, window_params = [{transform_indices = @transform_0, window_bounds = array<i64: 1, 16, 128>}, {pipeline_mode = #tpu.pipeline_mode<synchronous>, transform_indices = @transform_1, window_bounds = array<i64: 8, 16>}, {pipeline_mode = #tpu.pipeline_mode<synchronous>, transform_indices = @transform_2, window_bounds = array<i64: 8, 1>}, {pipeline_mode = #tpu.pipeline_mode<synchronous>, transform_indices = @transform_3, window_bounds = array<i64: 1, 128>}, {transform_indices = @transform_4, window_bounds = array<i64: 1, 8, 128>}]} {
    %c0 = arith.constant 0 : index
    %c0_0 = arith.constant 0 : index
    %0 = vector.load %arg2[%c0, %c0_0] : memref<8x16xf32, #tpu.memory_space<vmem>>, vector<8x16xf32>
    %c0_1 = arith.constant 0 : index
    %c0_2 = arith.constant 0 : index
    %c0_3 = arith.constant 0 : index
    %1 = vector.load %arg1[%c0_1, %c0_2, %c0_3] : memref<1x16x128xf32, #tpu.memory_space<vmem>>, vector<1x16x128xf32>
    %2 = vector.shape_cast %1 : vector<1x16x128xf32> to vector<16x128xf32>
    %cst = arith.constant dense<0.000000e+00> : vector<8x128xf32>
    %3 = tpu.matmul %0, %2, %cst {dimension_numbers = #tpu.dot_dimension_numbers<[1], [0], [0], [1], [0, 0, 1, 1], [], []>} : vector<8x16xf32>, vector<16x128xf32>, vector<8x128xf32> -> vector<8x128xf32>
    %c0_4 = arith.constant 0 : index
    %c0_5 = arith.constant 0 : index
    %4 = vector.load %arg3[%c0_4, %c0_5] : memref<8x1xf32, #tpu.memory_space<vmem>>, vector<8x1xf32>
    %5 = vector.broadcast %4 : vector<8x1xf32> to vector<8x128xf32>
    %6 = arith.addf %3, %5 : vector<8x128xf32>
    %c0_6 = arith.constant 0 : index
    %c0_7 = arith.constant 0 : index
    %7 = vector.load %arg4[%c0_6, %c0_7] : memref<1x128xf32, #tpu.memory_space<vmem>>, vector<1x128xf32>
    %8 = vector.broadcast %7 : vector<1x128xf32> to vector<8x128xf32>
    %9 = arith.mulf %6, %8 : vector<8x128xf32>
    %c0_8 = arith.constant 0 : index
    %c0_9 = arith.constant 0 : index
    %c0_10 = arith.constant 0 : index
    %10 = vector.load %arg5[%c0_8, %c0_9, %c0_10] : memref<1x8x128xf32, #tpu.memory_space<vmem>>, vector<1x8x128xf32>
    %11 = vector.shape_cast %10 : vector<1x8x128xf32> to vector<8x128xf32>
    %12 = vector.shape_cast %9 : vector<8x128xf32> to vector<1x8x128xf32>
    tpu.vector_store %arg5[%c0_8, %c0_9, %c0_10], %12 {strides = array<i32>} : memref<1x8x128xf32, #tpu.memory_space<vmem>>, vector<1x8x128xf32>,
    return
  }
  func.func @transform_0(%arg0: i32) -> (i32, i32, i32) {
    %c0_i32 = arith.constant 0 : i32
    %c0_i32_0 = arith.constant 0 : i32
    %c0_i32_1 = arith.constant 0 : i32
    return %arg0, %c0_i32, %c0_i32_0 : i32, i32, i32
  }
  func.func @transform_1(%arg0: i32) -> (i32, i32) {
    %c0_i32 = arith.constant 0 : i32
    %c0_i32_0 = arith.constant 0 : i32
    %c0_i32_1 = arith.constant 0 : i32
    return %c0_i32, %c0_i32_0 : i32, i32
  }
  func.func @transform_2(%arg0: i32) -> (i32, i32) {
    %c0_i32 = arith.constant 0 : i32
    %c0_i32_0 = arith.constant 0 : i32
    %c0_i32_1 = arith.constant 0 : i32
    return %c0_i32, %c0_i32_0 : i32, i32
  }
  func.func @transform_3(%arg0: i32) -> (i32, i32) {
    %c0_i32 = arith.constant 0 : i32
    %c0_i32_0 = arith.constant 0 : i32
    %c0_i32_1 = arith.constant 0 : i32
    return %c0_i32, %c0_i32_0 : i32, i32
  }
  func.func @transform_4(%arg0: i32) -> (i32, i32, i32) {
    %c0_i32 = arith.constant 0 : i32
    %c0_i32_0 = arith.constant 0 : i32
    %c0_i32_1 = arith.constant 0 : i32
    return %arg0, %c0_i32, %c0_i32_0 : i32, i32, i32
  }
}

module attributes {stable_mosaic.version = 11 : i64} {
  func.func @_res_stack_kernel(%arg0: i32, %arg1: memref<1x8x128xf32, #tpu.memory_space<vmem>>, %arg2: memref<2x8x72xf32, #tpu.memory_space<vmem>>, %arg3: memref<2x8x1xf32, #tpu.memory_space<vmem>>, %arg4: memref<1x128xf32, #tpu.memory_space<vmem>>, %arg5: memref<1x8x128xf32, #tpu.memory_space<vmem>>, %arg6: memref<8x384xf32, #tpu.memory_space<vmem>>, %arg7: memref<8x384xf32, #tpu.memory_space<vmem>>, %arg8: memref<72x128xf32, #tpu.memory_space<vmem>>) attributes {dimension_semantics = [#tpu.dimension_semantics<parallel>], iteration_bounds = array<i64: 2>, scalar_prefetch = 0 : i64, scratch_operands = 3 : i64, tpu.core_type = #tpu.core_type<tc>, window_params = [{transform_indices = @transform_0, window_bounds = array<i64: 1, 8, 128>}, {pipeline_mode = #tpu.pipeline_mode<synchronous>, transform_indices = @transform_1, window_bounds = array<i64: 2, 8, 72>}, {pipeline_mode = #tpu.pipeline_mode<synchronous>, transform_indices = @transform_2, window_bounds = array<i64: 2, 8, 1>}, {pipeline_mode = #tpu.pipeline_mode<synchronous>, transform_indices = @transform_3, window_bounds = array<i64: 1, 128>}, {transform_indices = @transform_4, window_bounds = array<i64: 1, 8, 128>}]} {
    %cst = arith.constant 0.000000e+00 : f32
    %0 = vector.broadcast %cst : f32 to vector<8x128xf32>
    %c0 = arith.constant 0 : index
    %c0_0 = arith.constant 0 : index
    %1 = vector.load %arg6[%c0, %c0_0] : memref<8x384xf32, #tpu.memory_space<vmem>>, vector<8x128xf32>
    tpu.vector_store %arg6[%c0, %c0_0], %0 {strides = array<i32>} : memref<8x384xf32, #tpu.memory_space<vmem>>, vector<8x128xf32>,
    %cst_1 = arith.constant 0.000000e+00 : f32
    %2 = vector.broadcast %cst_1 : f32 to vector<8x128xf32>
    %c0_2 = arith.constant 0 : index
    %c256 = arith.constant 256 : index
    %3 = vector.load %arg6[%c0_2, %c256] : memref<8x384xf32, #tpu.memory_space<vmem>>, vector<8x128xf32>
    tpu.vector_store %arg6[%c0_2, %c256], %2 {strides = array<i32>} : memref<8x384xf32, #tpu.memory_space<vmem>>, vector<8x128xf32>,
    %c0_3 = arith.constant 0 : index
    %c0_4 = arith.constant 0 : index
    %c0_5 = arith.constant 0 : index
    %4 = vector.load %arg1[%c0_3, %c0_4, %c0_5] : memref<1x8x128xf32, #tpu.memory_space<vmem>>, vector<1x8x128xf32>
    %5 = vector.shape_cast %4 : vector<1x8x128xf32> to vector<8x128xf32>
    %c0_6 = arith.constant 0 : index
    %c128 = arith.constant 128 : index
    %6 = vector.load %arg6[%c0_6, %c128] : memref<8x384xf32, #tpu.memory_space<vmem>>, vector<8x128xf32>
    tpu.vector_store %arg6[%c0_6, %c128], %5 {strides = array<i32>} : memref<8x384xf32, #tpu.memory_space<vmem>>, vector<8x128xf32>,
    %c0_7 = arith.constant 0 : index
    %c0_8 = arith.constant 0 : index
    %7 = vector.load %arg4[%c0_7, %c0_8] : memref<1x128xf32, #tpu.memory_space<vmem>>, vector<1x128xf32>
    %c0_i32 = arith.constant 0 : i32
    %c2_i32 = arith.constant 2 : i32
    %8 = arith.addi %c0_i32, %c2_i32 : i32
    %c1_i32 = arith.constant 1 : i32
    scf.for %arg9 = %c0_i32 to %8 step %c1_i32  : i32 {
      %c0_15 = arith.constant 0 : index
      %c0_16 = arith.constant 0 : index
      %13 = vector.load %arg6[%c0_15, %c0_16] : memref<8x384xf32, #tpu.memory_space<vmem>>, vector<8x384xf32>
      %cst_17 = arith.constant 0.000000e+00 : f32
      %14 = vector.broadcast %cst_17 : f32 to vector<8x384xf32>
      %15 = arith.cmpf ogt, %13, %14 : vector<8x384xf32>
      %cst_18 = arith.constant 0.00999999977 : f32
      %16 = vector.broadcast %cst_18 : f32 to vector<8x384xf32>
      %17 = arith.mulf %16, %13 : vector<8x384xf32>
      %18 = arith.select %15, %13, %17 : vector<8x384xi1>, vector<8x384xf32>
      %c0_19 = arith.constant 0 : index
      %c0_20 = arith.constant 0 : index
      %19 = vector.load %arg7[%c0_19, %c0_20] : memref<8x384xf32, #tpu.memory_space<vmem>>, vector<8x384xf32>
      tpu.vector_store %arg7[%c0_19, %c0_20], %18 {strides = array<i32>} : memref<8x384xf32, #tpu.memory_space<vmem>>, vector<8x384xf32>,
      %c0_21 = arith.constant 0 : index
      %c117 = arith.constant 117 : index
      %20 = vector.load %arg7[%c0_21, %c117] : memref<8x384xf32, #tpu.memory_space<vmem>>, vector<8x128xf32>
      %c0_22 = arith.constant 0 : index
      %c0_23 = arith.constant 0 : index
      %21 = vector.load %arg8[%c0_22, %c0_23] : memref<72x128xf32, #tpu.memory_space<vmem>>, vector<8x128xf32>
      tpu.vector_store %arg8[%c0_22, %c0_23], %20 {strides = array<i32>} : memref<72x128xf32, #tpu.memory_space<vmem>>, vector<8x128xf32>,
      %c0_24 = arith.constant 0 : index
      %c118 = arith.constant 118 : index
      %22 = vector.load %arg7[%c0_24, %c118] : memref<8x384xf32, #tpu.memory_space<vmem>>, vector<8x128xf32>
      %c8 = arith.constant 8 : index
      %c0_25 = arith.constant 0 : index
      %23 = vector.load %arg8[%c8, %c0_25] : memref<72x128xf32, #tpu.memory_space<vmem>>, vector<8x128xf32>
      tpu.vector_store %arg8[%c8, %c0_25], %22 {strides = array<i32>} : memref<72x128xf32, #tpu.memory_space<vmem>>, vector<8x128xf32>,
      %c0_26 = arith.constant 0 : index
      %c119 = arith.constant 119 : index
      %24 = vector.load %arg7[%c0_26, %c119] : memref<8x384xf32, #tpu.memory_space<vmem>>, vector<8x128xf32>
      %c16 = arith.constant 16 : index
      %c0_27 = arith.constant 0 : index
      %25 = vector.load %arg8[%c16, %c0_27] : memref<72x128xf32, #tpu.memory_space<vmem>>, vector<8x128xf32>
      tpu.vector_store %arg8[%c16, %c0_27], %24 {strides = array<i32>} : memref<72x128xf32, #tpu.memory_space<vmem>>, vector<8x128xf32>,
      %c0_28 = arith.constant 0 : index
      %c127 = arith.constant 127 : index
      %26 = vector.load %arg7[%c0_28, %c127] : memref<8x384xf32, #tpu.memory_space<vmem>>, vector<8x128xf32>
      %c24 = arith.constant 24 : index
      %c0_29 = arith.constant 0 : index
      %27 = vector.load %arg8[%c24, %c0_29] : memref<72x128xf32, #tpu.memory_space<vmem>>, vector<8x128xf32>
      tpu.vector_store %arg8[%c24, %c0_29], %26 {strides = array<i32>} : memref<72x128xf32, #tpu.memory_space<vmem>>, vector<8x128xf32>,
      %c0_30 = arith.constant 0 : index
      %c128_31 = arith.constant 128 : index
      %28 = vector.load %arg7[%c0_30, %c128_31] : memref<8x384xf32, #tpu.memory_space<vmem>>, vector<8x128xf32>
      %c32 = arith.constant 32 : index
      %c0_32 = arith.constant 0 : index
      %29 = vector.load %arg8[%c32, %c0_32] : memref<72x128xf32, #tpu.memory_space<vmem>>, vector<8x128xf32>
      tpu.vector_store %arg8[%c32, %c0_32], %28 {strides = array<i32>} : memref<72x128xf32, #tpu.memory_space<vmem>>, vector<8x128xf32>,
      %c0_33 = arith.constant 0 : index
      %c129 = arith.constant 129 : index
      %30 = vector.load %arg7[%c0_33, %c129] : memref<8x384xf32, #tpu.memory_space<vmem>>, vector<8x128xf32>
      %c40 = arith.constant 40 : index
      %c0_34 = arith.constant 0 : index
      %31 = vector.load %arg8[%c40, %c0_34] : memref<72x128xf32, #tpu.memory_space<vmem>>, vector<8x128xf32>
      tpu.vector_store %arg8[%c40, %c0_34], %30 {strides = array<i32>} : memref<72x128xf32, #tpu.memory_space<vmem>>, vector<8x128xf32>,
      %c0_35 = arith.constant 0 : index
      %c137 = arith.constant 137 : index
      %32 = vector.load %arg7[%c0_35, %c137] : memref<8x384xf32, #tpu.memory_space<vmem>>, vector<8x128xf32>
      %c48 = arith.constant 48 : index
      %c0_36 = arith.constant 0 : index
      %33 = vector.load %arg8[%c48, %c0_36] : memref<72x128xf32, #tpu.memory_space<vmem>>, vector<8x128xf32>
      tpu.vector_store %arg8[%c48, %c0_36], %32 {strides = array<i32>} : memref<72x128xf32, #tpu.memory_space<vmem>>, vector<8x128xf32>,
      %c0_37 = arith.constant 0 : index
      %c138 = arith.constant 138 : index
      %34 = vector.load %arg7[%c0_37, %c138] : memref<8x384xf32, #tpu.memory_space<vmem>>, vector<8x128xf32>
      %c56 = arith.constant 56 : index
      %c0_38 = arith.constant 0 : index
      %35 = vector.load %arg8[%c56, %c0_38] : memref<72x128xf32, #tpu.memory_space<vmem>>, vector<8x128xf32>
      tpu.vector_store %arg8[%c56, %c0_38], %34 {strides = array<i32>} : memref<72x128xf32, #tpu.memory_space<vmem>>, vector<8x128xf32>,
      %c0_39 = arith.constant 0 : index
      %c139 = arith.constant 139 : index
      %36 = vector.load %arg7[%c0_39, %c139] : memref<8x384xf32, #tpu.memory_space<vmem>>, vector<8x128xf32>
      %c64 = arith.constant 64 : index
      %c0_40 = arith.constant 0 : index
      %37 = vector.load %arg8[%c64, %c0_40] : memref<72x128xf32, #tpu.memory_space<vmem>>, vector<8x128xf32>
      tpu.vector_store %arg8[%c64, %c0_40], %36 {strides = array<i32>} : memref<72x128xf32, #tpu.memory_space<vmem>>, vector<8x128xf32>,
      %38 = arith.index_cast %arg9 : i32 to index
      %c0_41 = arith.constant 0 : index
      %c0_42 = arith.constant 0 : index
      %39 = vector.load %arg2[%38, %c0_41, %c0_42] : memref<2x8x72xf32, #tpu.memory_space<vmem>>, vector<1x8x72xf32>
      %40 = vector.shape_cast %39 : vector<1x8x72xf32> to vector<8x72xf32>
      %c0_43 = arith.constant 0 : index
      %c0_44 = arith.constant 0 : index
      %41 = vector.load %arg8[%c0_43, %c0_44] : memref<72x128xf32, #tpu.memory_space<vmem>>, vector<72x128xf32>
      %cst_45 = arith.constant dense<0.000000e+00> : vector<8x128xf32>
      %42 = tpu.matmul %40, %41, %cst_45 {dimension_numbers = #tpu.dot_dimension_numbers<[1], [0], [0], [1], [0, 0, 1, 1], [], []>} : vector<8x72xf32>, vector<72x128xf32>, vector<8x128xf32> -> vector<8x128xf32>
      %43 = arith.index_cast %arg9 : i32 to index
      %c0_46 = arith.constant 0 : index
      %c0_47 = arith.constant 0 : index
      %44 = vector.load %arg3[%43, %c0_46, %c0_47] : memref<2x8x1xf32, #tpu.memory_space<vmem>>, vector<1x8x1xf32>
      %45 = vector.shape_cast %44 : vector<1x8x1xf32> to vector<8x1xf32>
      %46 = vector.broadcast %45 : vector<8x1xf32> to vector<8x128xf32>
      %47 = arith.addf %42, %46 : vector<8x128xf32>
      %c0_48 = arith.constant 0 : index
      %c128_49 = arith.constant 128 : index
      %48 = vector.load %arg6[%c0_48, %c128_49] : memref<8x384xf32, #tpu.memory_space<vmem>>, vector<8x128xf32>
      %49 = arith.addf %48, %47 : vector<8x128xf32>
      %50 = vector.broadcast %7 : vector<1x128xf32> to vector<8x128xf32>
      %51 = arith.mulf %49, %50 : vector<8x128xf32>
      %c0_50 = arith.constant 0 : index
      %c128_51 = arith.constant 128 : index
      %52 = vector.load %arg6[%c0_50, %c128_51] : memref<8x384xf32, #tpu.memory_space<vmem>>, vector<8x128xf32>
      tpu.vector_store %arg6[%c0_50, %c128_51], %51 {strides = array<i32>} : memref<8x384xf32, #tpu.memory_space<vmem>>, vector<8x128xf32>,
    }
    %c2_i32_9 = arith.constant 2 : i32
    %c0_10 = arith.constant 0 : index
    %c128_11 = arith.constant 128 : index
    %9 = vector.load %arg6[%c0_10, %c128_11] : memref<8x384xf32, #tpu.memory_space<vmem>>, vector<8x128xf32>
    %c0_12 = arith.constant 0 : index
    %c0_13 = arith.constant 0 : index
    %c0_14 = arith.constant 0 : index
    %10 = vector.load %arg5[%c0_12, %c0_13, %c0_14] : memref<1x8x128xf32, #tpu.memory_space<vmem>>, vector<1x8x128xf32>
    %11 = vector.shape_cast %10 : vector<1x8x128xf32> to vector<8x128xf32>
    %12 = vector.shape_cast %9 : vector<8x128xf32> to vector<1x8x128xf32>
    tpu.vector_store %arg5[%c0_12, %c0_13, %c0_14], %12 {strides = array<i32>} : memref<1x8x128xf32, #tpu.memory_space<vmem>>, vector<1x8x128xf32>,
    return
  }
  func.func @transform_0(%arg0: i32) -> (i32, i32, i32) {
    %c0_i32 = arith.constant 0 : i32
    %c0_i32_0 = arith.constant 0 : i32
    %c0_i32_1 = arith.constant 0 : i32
    return %arg0, %c0_i32, %c0_i32_0 : i32, i32, i32
  }
  func.func @transform_1(%arg0: i32) -> (i32, i32, i32) {
    %c0_i32 = arith.constant 0 : i32
    %c0_i32_0 = arith.constant 0 : i32
    %c0_i32_1 = arith.constant 0 : i32
    %c0_i32_2 = arith.constant 0 : i32
    return %c0_i32, %c0_i32_0, %c0_i32_1 : i32, i32, i32
  }
  func.func @transform_2(%arg0: i32) -> (i32, i32, i32) {
    %c0_i32 = arith.constant 0 : i32
    %c0_i32_0 = arith.constant 0 : i32
    %c0_i32_1 = arith.constant 0 : i32
    %c0_i32_2 = arith.constant 0 : i32
    return %c0_i32, %c0_i32_0, %c0_i32_1 : i32, i32, i32
  }
  func.func @transform_3(%arg0: i32) -> (i32, i32) {
    %c0_i32 = arith.constant 0 : i32
    %c0_i32_0 = arith.constant 0 : i32
    %c0_i32_1 = arith.constant 0 : i32
    return %c0_i32, %c0_i32_0 : i32, i32
  }
  func.func @transform_4(%arg0: i32) -> (i32, i32, i32) {
    %c0_i32 = arith.constant 0 : i32
    %c0_i32_0 = arith.constant 0 : i32
    %c0_i32_1 = arith.constant 0 : i32
    return %arg0, %c0_i32, %c0_i32_0 : i32, i32, i32
  }
}

module attributes {stable_mosaic.version = 11 : i64} {
  func.func @_res_stack_kernel(%arg0: i32, %arg1: memref<1x16x128xf32, #tpu.memory_space<vmem>>, %arg2: memref<2x16x144xf32, #tpu.memory_space<vmem>>, %arg3: memref<2x16x1xf32, #tpu.memory_space<vmem>>, %arg4: memref<1x128xf32, #tpu.memory_space<vmem>>, %arg5: memref<1x16x128xf32, #tpu.memory_space<vmem>>, %arg6: memref<16x384xf32, #tpu.memory_space<vmem>>, %arg7: memref<16x384xf32, #tpu.memory_space<vmem>>, %arg8: memref<144x128xf32, #tpu.memory_space<vmem>>) attributes {dimension_semantics = [#tpu.dimension_semantics<parallel>], iteration_bounds = array<i64: 2>, scalar_prefetch = 0 : i64, scratch_operands = 3 : i64, tpu.core_type = #tpu.core_type<tc>, window_params = [{transform_indices = @transform_0, window_bounds = array<i64: 1, 16, 128>}, {pipeline_mode = #tpu.pipeline_mode<synchronous>, transform_indices = @transform_1, window_bounds = array<i64: 2, 16, 144>}, {pipeline_mode = #tpu.pipeline_mode<synchronous>, transform_indices = @transform_2, window_bounds = array<i64: 2, 16, 1>}, {pipeline_mode = #tpu.pipeline_mode<synchronous>, transform_indices = @transform_3, window_bounds = array<i64: 1, 128>}, {transform_indices = @transform_4, window_bounds = array<i64: 1, 16, 128>}]} {
    %cst = arith.constant 0.000000e+00 : f32
    %0 = vector.broadcast %cst : f32 to vector<16x128xf32>
    %c0 = arith.constant 0 : index
    %c0_0 = arith.constant 0 : index
    %1 = vector.load %arg6[%c0, %c0_0] : memref<16x384xf32, #tpu.memory_space<vmem>>, vector<16x128xf32>
    tpu.vector_store %arg6[%c0, %c0_0], %0 {strides = array<i32>} : memref<16x384xf32, #tpu.memory_space<vmem>>, vector<16x128xf32>,
    %cst_1 = arith.constant 0.000000e+00 : f32
    %2 = vector.broadcast %cst_1 : f32 to vector<16x128xf32>
    %c0_2 = arith.constant 0 : index
    %c256 = arith.constant 256 : index
    %3 = vector.load %arg6[%c0_2, %c256] : memref<16x384xf32, #tpu.memory_space<vmem>>, vector<16x128xf32>
    tpu.vector_store %arg6[%c0_2, %c256], %2 {strides = array<i32>} : memref<16x384xf32, #tpu.memory_space<vmem>>, vector<16x128xf32>,
    %c0_3 = arith.constant 0 : index
    %c0_4 = arith.constant 0 : index
    %c0_5 = arith.constant 0 : index
    %4 = vector.load %arg1[%c0_3, %c0_4, %c0_5] : memref<1x16x128xf32, #tpu.memory_space<vmem>>, vector<1x16x128xf32>
    %5 = vector.shape_cast %4 : vector<1x16x128xf32> to vector<16x128xf32>
    %c0_6 = arith.constant 0 : index
    %c128 = arith.constant 128 : index
    %6 = vector.load %arg6[%c0_6, %c128] : memref<16x384xf32, #tpu.memory_space<vmem>>, vector<16x128xf32>
    tpu.vector_store %arg6[%c0_6, %c128], %5 {strides = array<i32>} : memref<16x384xf32, #tpu.memory_space<vmem>>, vector<16x128xf32>,
    %c0_7 = arith.constant 0 : index
    %c0_8 = arith.constant 0 : index
    %7 = vector.load %arg4[%c0_7, %c0_8] : memref<1x128xf32, #tpu.memory_space<vmem>>, vector<1x128xf32>
    %c0_i32 = arith.constant 0 : i32
    %c2_i32 = arith.constant 2 : i32
    %8 = arith.addi %c0_i32, %c2_i32 : i32
    %c1_i32 = arith.constant 1 : i32
    scf.for %arg9 = %c0_i32 to %8 step %c1_i32  : i32 {
      %c0_15 = arith.constant 0 : index
      %c0_16 = arith.constant 0 : index
      %13 = vector.load %arg6[%c0_15, %c0_16] : memref<16x384xf32, #tpu.memory_space<vmem>>, vector<16x384xf32>
      %cst_17 = arith.constant 0.000000e+00 : f32
      %14 = vector.broadcast %cst_17 : f32 to vector<16x384xf32>
      %15 = arith.cmpf ogt, %13, %14 : vector<16x384xf32>
      %cst_18 = arith.constant 0.00999999977 : f32
      %16 = vector.broadcast %cst_18 : f32 to vector<16x384xf32>
      %17 = arith.mulf %16, %13 : vector<16x384xf32>
      %18 = arith.select %15, %13, %17 : vector<16x384xi1>, vector<16x384xf32>
      %c0_19 = arith.constant 0 : index
      %c0_20 = arith.constant 0 : index
      %19 = vector.load %arg7[%c0_19, %c0_20] : memref<16x384xf32, #tpu.memory_space<vmem>>, vector<16x384xf32>
      tpu.vector_store %arg7[%c0_19, %c0_20], %18 {strides = array<i32>} : memref<16x384xf32, #tpu.memory_space<vmem>>, vector<16x384xf32>,
      %c0_21 = arith.constant 0 : index
      %c121 = arith.constant 121 : index
      %20 = vector.load %arg7[%c0_21, %c121] : memref<16x384xf32, #tpu.memory_space<vmem>>, vector<16x128xf32>
      %c0_22 = arith.constant 0 : index
      %c0_23 = arith.constant 0 : index
      %21 = vector.load %arg8[%c0_22, %c0_23] : memref<144x128xf32, #tpu.memory_space<vmem>>, vector<16x128xf32>
      tpu.vector_store %arg8[%c0_22, %c0_23], %20 {strides = array<i32>} : memref<144x128xf32, #tpu.memory_space<vmem>>, vector<16x128xf32>,
      %c0_24 = arith.constant 0 : index
      %c122 = arith.constant 122 : index
      %22 = vector.load %arg7[%c0_24, %c122] : memref<16x384xf32, #tpu.memory_space<vmem>>, vector<16x128xf32>
      %c16 = arith.constant 16 : index
      %c0_25 = arith.constant 0 : index
      %23 = vector.load %arg8[%c16, %c0_25] : memref<144x128xf32, #tpu.memory_space<vmem>>, vector<16x128xf32>
      tpu.vector_store %arg8[%c16, %c0_25], %22 {strides = array<i32>} : memref<144x128xf32, #tpu.memory_space<vmem>>, vector<16x128xf32>,
      %c0_26 = arith.constant 0 : index
      %c123 = arith.constant 123 : index
      %24 = vector.load %arg7[%c0_26, %c123] : memref<16x384xf32, #tpu.memory_space<vmem>>, vector<16x128xf32>
      %c32 = arith.constant 32 : index
      %c0_27 = arith.constant 0 : index
      %25 = vector.load %arg8[%c32, %c0_27] : memref<144x128xf32, #tpu.memory_space<vmem>>, vector<16x128xf32>
      tpu.vector_store %arg8[%c32, %c0_27], %24 {strides = array<i32>} : memref<144x128xf32, #tpu.memory_space<vmem>>, vector<16x128xf32>,
      %c0_28 = arith.constant 0 : index
      %c127 = arith.constant 127 : index
      %26 = vector.load %arg7[%c0_28, %c127] : memref<16x384xf32, #tpu.memory_space<vmem>>, vector<16x128xf32>
      %c48 = arith.constant 48 : index
      %c0_29 = arith.constant 0 : index
      %27 = vector.load %arg8[%c48, %c0_29] : memref<144x128xf32, #tpu.memory_space<vmem>>, vector<16x128xf32>
      tpu.vector_store %arg8[%c48, %c0_29], %26 {strides = array<i32>} : memref<144x128xf32, #tpu.memory_space<vmem>>, vector<16x128xf32>,
      %c0_30 = arith.constant 0 : index
      %c128_31 = arith.constant 128 : index
      %28 = vector.load %arg7[%c0_30, %c128_31] : memref<16x384xf32, #tpu.memory_space<vmem>>, vector<16x128xf32>
      %c64 = arith.constant 64 : index
      %c0_32 = arith.constant 0 : index
      %29 = vector.load %arg8[%c64, %c0_32] : memref<144x128xf32, #tpu.memory_space<vmem>>, vector<16x128xf32>
      tpu.vector_store %arg8[%c64, %c0_32], %28 {strides = array<i32>} : memref<144x128xf32, #tpu.memory_space<vmem>>, vector<16x128xf32>,
      %c0_33 = arith.constant 0 : index
      %c129 = arith.constant 129 : index
      %30 = vector.load %arg7[%c0_33, %c129] : memref<16x384xf32, #tpu.memory_space<vmem>>, vector<16x128xf32>
      %c80 = arith.constant 80 : index
      %c0_34 = arith.constant 0 : index
      %31 = vector.load %arg8[%c80, %c0_34] : memref<144x128xf32, #tpu.memory_space<vmem>>, vector<16x128xf32>
      tpu.vector_store %arg8[%c80, %c0_34], %30 {strides = array<i32>} : memref<144x128xf32, #tpu.memory_space<vmem>>, vector<16x128xf32>,
      %c0_35 = arith.constant 0 : index
      %c133 = arith.constant 133 : index
      %32 = vector.load %arg7[%c0_35, %c133] : memref<16x384xf32, #tpu.memory_space<vmem>>, vector<16x128xf32>
      %c96 = arith.constant 96 : index
      %c0_36 = arith.constant 0 : index
      %33 = vector.load %arg8[%c96, %c0_36] : memref<144x128xf32, #tpu.memory_space<vmem>>, vector<16x128xf32>
      tpu.vector_store %arg8[%c96, %c0_36], %32 {strides = array<i32>} : memref<144x128xf32, #tpu.memory_space<vmem>>, vector<16x128xf32>,
      %c0_37 = arith.constant 0 : index
      %c134 = arith.constant 134 : index
      %34 = vector.load %arg7[%c0_37, %c134] : memref<16x384xf32, #tpu.memory_space<vmem>>, vector<16x128xf32>
      %c112 = arith.constant 112 : index
      %c0_38 = arith.constant 0 : index
      %35 = vector.load %arg8[%c112, %c0_38] : memref<144x128xf32, #tpu.memory_space<vmem>>, vector<16x128xf32>
      tpu.vector_store %arg8[%c112, %c0_38], %34 {strides = array<i32>} : memref<144x128xf32, #tpu.memory_space<vmem>>, vector<16x128xf32>,
      %c0_39 = arith.constant 0 : index
      %c135 = arith.constant 135 : index
      %36 = vector.load %arg7[%c0_39, %c135] : memref<16x384xf32, #tpu.memory_space<vmem>>, vector<16x128xf32>
      %c128_40 = arith.constant 128 : index
      %c0_41 = arith.constant 0 : index
      %37 = vector.load %arg8[%c128_40, %c0_41] : memref<144x128xf32, #tpu.memory_space<vmem>>, vector<16x128xf32>
      tpu.vector_store %arg8[%c128_40, %c0_41], %36 {strides = array<i32>} : memref<144x128xf32, #tpu.memory_space<vmem>>, vector<16x128xf32>,
      %38 = arith.index_cast %arg9 : i32 to index
      %c0_42 = arith.constant 0 : index
      %c0_43 = arith.constant 0 : index
      %39 = vector.load %arg2[%38, %c0_42, %c0_43] : memref<2x16x144xf32, #tpu.memory_space<vmem>>, vector<1x16x144xf32>
      %40 = vector.shape_cast %39 : vector<1x16x144xf32> to vector<16x144xf32>
      %c0_44 = arith.constant 0 : index
      %c0_45 = arith.constant 0 : index
      %41 = vector.load %arg8[%c0_44, %c0_45] : memref<144x128xf32, #tpu.memory_space<vmem>>, vector<144x128xf32>
      %cst_46 = arith.constant dense<0.000000e+00> : vector<16x128xf32>
      %42 = tpu.matmul %40, %41, %cst_46 {dimension_numbers = #tpu.dot_dimension_numbers<[1], [0], [0], [1], [0, 0, 1, 1], [], []>} : vector<16x144xf32>, vector<144x128xf32>, vector<16x128xf32> -> vector<16x128xf32>
      %43 = arith.index_cast %arg9 : i32 to index
      %c0_47 = arith.constant 0 : index
      %c0_48 = arith.constant 0 : index
      %44 = vector.load %arg3[%43, %c0_47, %c0_48] : memref<2x16x1xf32, #tpu.memory_space<vmem>>, vector<1x16x1xf32>
      %45 = vector.shape_cast %44 : vector<1x16x1xf32> to vector<16x1xf32>
      %46 = vector.broadcast %45 : vector<16x1xf32> to vector<16x128xf32>
      %47 = arith.addf %42, %46 : vector<16x128xf32>
      %c0_49 = arith.constant 0 : index
      %c128_50 = arith.constant 128 : index
      %48 = vector.load %arg6[%c0_49, %c128_50] : memref<16x384xf32, #tpu.memory_space<vmem>>, vector<16x128xf32>
      %49 = arith.addf %48, %47 : vector<16x128xf32>
      %50 = vector.broadcast %7 : vector<1x128xf32> to vector<16x128xf32>
      %51 = arith.mulf %49, %50 : vector<16x128xf32>
      %c0_51 = arith.constant 0 : index
      %c128_52 = arith.constant 128 : index
      %52 = vector.load %arg6[%c0_51, %c128_52] : memref<16x384xf32, #tpu.memory_space<vmem>>, vector<16x128xf32>
      tpu.vector_store %arg6[%c0_51, %c128_52], %51 {strides = array<i32>} : memref<16x384xf32, #tpu.memory_space<vmem>>, vector<16x128xf32>,
    }
    %c2_i32_9 = arith.constant 2 : i32
    %c0_10 = arith.constant 0 : index
    %c128_11 = arith.constant 128 : index
    %9 = vector.load %arg6[%c0_10, %c128_11] : memref<16x384xf32, #tpu.memory_space<vmem>>, vector<16x128xf32>
    %c0_12 = arith.constant 0 : index
    %c0_13 = arith.constant 0 : index
    %c0_14 = arith.constant 0 : index
    %10 = vector.load %arg5[%c0_12, %c0_13, %c0_14] : memref<1x16x128xf32, #tpu.memory_space<vmem>>, vector<1x16x128xf32>
    %11 = vector.shape_cast %10 : vector<1x16x128xf32> to vector<16x128xf32>
    %12 = vector.shape_cast %9 : vector<16x128xf32> to vector<1x16x128xf32>
    tpu.vector_store %arg5[%c0_12, %c0_13, %c0_14], %12 {strides = array<i32>} : memref<1x16x128xf32, #tpu.memory_space<vmem>>, vector<1x16x128xf32>,
    return
  }
  func.func @transform_0(%arg0: i32) -> (i32, i32, i32) {
    %c0_i32 = arith.constant 0 : i32
    %c0_i32_0 = arith.constant 0 : i32
    %c0_i32_1 = arith.constant 0 : i32
    return %arg0, %c0_i32, %c0_i32_0 : i32, i32, i32
  }
  func.func @transform_1(%arg0: i32) -> (i32, i32, i32) {
    %c0_i32 = arith.constant 0 : i32
    %c0_i32_0 = arith.constant 0 : i32
    %c0_i32_1 = arith.constant 0 : i32
    %c0_i32_2 = arith.constant 0 : i32
    return %c0_i32, %c0_i32_0, %c0_i32_1 : i32, i32, i32
  }
  func.func @transform_2(%arg0: i32) -> (i32, i32, i32) {
    %c0_i32 = arith.constant 0 : i32
    %c0_i32_0 = arith.constant 0 : i32
    %c0_i32_1 = arith.constant 0 : i32
    %c0_i32_2 = arith.constant 0 : i32
    return %c0_i32, %c0_i32_0, %c0_i32_1 : i32, i32, i32
  }
  func.func @transform_3(%arg0: i32) -> (i32, i32) {
    %c0_i32 = arith.constant 0 : i32
    %c0_i32_0 = arith.constant 0 : i32
    %c0_i32_1 = arith.constant 0 : i32
    return %c0_i32, %c0_i32_0 : i32, i32
  }
  func.func @transform_4(%arg0: i32) -> (i32, i32, i32) {
    %c0_i32 = arith.constant 0 : i32
    %c0_i32_0 = arith.constant 0 : i32
    %c0_i32_1 = arith.constant 0 : i32
    return %arg0, %c0_i32, %c0_i32_0 : i32, i32, i32
  }
}

module attributes {stable_mosaic.version = 11 : i64} {
  func.func @_conv1x1_kernel(%arg0: i32, %arg1: memref<1x32x128xf32, #tpu.memory_space<vmem>>, %arg2: memref<16x32xf32, #tpu.memory_space<vmem>>, %arg3: memref<16x1xf32, #tpu.memory_space<vmem>>, %arg4: memref<1x128xf32, #tpu.memory_space<vmem>>, %arg5: memref<1x16x128xf32, #tpu.memory_space<vmem>>) attributes {dimension_semantics = [#tpu.dimension_semantics<parallel>], iteration_bounds = array<i64: 2>, scalar_prefetch = 0 : i64, scratch_operands = 0 : i64, tpu.core_type = #tpu.core_type<tc>, window_params = [{transform_indices = @transform_0, window_bounds = array<i64: 1, 32, 128>}, {pipeline_mode = #tpu.pipeline_mode<synchronous>, transform_indices = @transform_1, window_bounds = array<i64: 16, 32>}, {pipeline_mode = #tpu.pipeline_mode<synchronous>, transform_indices = @transform_2, window_bounds = array<i64: 16, 1>}, {pipeline_mode = #tpu.pipeline_mode<synchronous>, transform_indices = @transform_3, window_bounds = array<i64: 1, 128>}, {transform_indices = @transform_4, window_bounds = array<i64: 1, 16, 128>}]} {
    %c0 = arith.constant 0 : index
    %c0_0 = arith.constant 0 : index
    %0 = vector.load %arg2[%c0, %c0_0] : memref<16x32xf32, #tpu.memory_space<vmem>>, vector<16x32xf32>
    %c0_1 = arith.constant 0 : index
    %c0_2 = arith.constant 0 : index
    %c0_3 = arith.constant 0 : index
    %1 = vector.load %arg1[%c0_1, %c0_2, %c0_3] : memref<1x32x128xf32, #tpu.memory_space<vmem>>, vector<1x32x128xf32>
    %2 = vector.shape_cast %1 : vector<1x32x128xf32> to vector<32x128xf32>
    %cst = arith.constant dense<0.000000e+00> : vector<16x128xf32>
    %3 = tpu.matmul %0, %2, %cst {dimension_numbers = #tpu.dot_dimension_numbers<[1], [0], [0], [1], [0, 0, 1, 1], [], []>} : vector<16x32xf32>, vector<32x128xf32>, vector<16x128xf32> -> vector<16x128xf32>
    %c0_4 = arith.constant 0 : index
    %c0_5 = arith.constant 0 : index
    %4 = vector.load %arg3[%c0_4, %c0_5] : memref<16x1xf32, #tpu.memory_space<vmem>>, vector<16x1xf32>
    %5 = vector.broadcast %4 : vector<16x1xf32> to vector<16x128xf32>
    %6 = arith.addf %3, %5 : vector<16x128xf32>
    %c0_6 = arith.constant 0 : index
    %c0_7 = arith.constant 0 : index
    %7 = vector.load %arg4[%c0_6, %c0_7] : memref<1x128xf32, #tpu.memory_space<vmem>>, vector<1x128xf32>
    %8 = vector.broadcast %7 : vector<1x128xf32> to vector<16x128xf32>
    %9 = arith.mulf %6, %8 : vector<16x128xf32>
    %c0_8 = arith.constant 0 : index
    %c0_9 = arith.constant 0 : index
    %c0_10 = arith.constant 0 : index
    %10 = vector.load %arg5[%c0_8, %c0_9, %c0_10] : memref<1x16x128xf32, #tpu.memory_space<vmem>>, vector<1x16x128xf32>
    %11 = vector.shape_cast %10 : vector<1x16x128xf32> to vector<16x128xf32>
    %12 = vector.shape_cast %9 : vector<16x128xf32> to vector<1x16x128xf32>
    tpu.vector_store %arg5[%c0_8, %c0_9, %c0_10], %12 {strides = array<i32>} : memref<1x16x128xf32, #tpu.memory_space<vmem>>, vector<1x16x128xf32>,
    return
  }
  func.func @transform_0(%arg0: i32) -> (i32, i32, i32) {
    %c0_i32 = arith.constant 0 : i32
    %c0_i32_0 = arith.constant 0 : i32
    %c0_i32_1 = arith.constant 0 : i32
    return %arg0, %c0_i32, %c0_i32_0 : i32, i32, i32
  }
  func.func @transform_1(%arg0: i32) -> (i32, i32) {
    %c0_i32 = arith.constant 0 : i32
    %c0_i32_0 = arith.constant 0 : i32
    %c0_i32_1 = arith.constant 0 : i32
    return %c0_i32, %c0_i32_0 : i32, i32
  }
  func.func @transform_2(%arg0: i32) -> (i32, i32) {
    %c0_i32 = arith.constant 0 : i32
    %c0_i32_0 = arith.constant 0 : i32
    %c0_i32_1 = arith.constant 0 : i32
    return %c0_i32, %c0_i32_0 : i32, i32
  }
  func.func @transform_3(%arg0: i32) -> (i32, i32) {
    %c0_i32 = arith.constant 0 : i32
    %c0_i32_0 = arith.constant 0 : i32
    %c0_i32_1 = arith.constant 0 : i32
    return %c0_i32, %c0_i32_0 : i32, i32
  }
  func.func @transform_4(%arg0: i32) -> (i32, i32, i32) {
    %c0_i32 = arith.constant 0 : i32
    %c0_i32_0 = arith.constant 0 : i32
    %c0_i32_1 = arith.constant 0 : i32
    return %arg0, %c0_i32, %c0_i32_0 : i32, i32, i32
  }
}

module attributes {stable_mosaic.version = 11 : i64} {
  func.func @_conv1x1_cat2_kernel(%arg0: i32, %arg1: memref<1x8x128xf32, #tpu.memory_space<vmem>>, %arg2: memref<1x8x128xf32, #tpu.memory_space<vmem>>, %arg3: memref<8x8xf32, #tpu.memory_space<vmem>>, %arg4: memref<8x8xf32, #tpu.memory_space<vmem>>, %arg5: memref<8x1xf32, #tpu.memory_space<vmem>>, %arg6: memref<1x128xf32, #tpu.memory_space<vmem>>, %arg7: memref<1x8x128xf32, #tpu.memory_space<vmem>>) attributes {dimension_semantics = [#tpu.dimension_semantics<parallel>], iteration_bounds = array<i64: 2>, scalar_prefetch = 0 : i64, scratch_operands = 0 : i64, tpu.core_type = #tpu.core_type<tc>, window_params = [{transform_indices = @transform_0, window_bounds = array<i64: 1, 8, 128>}, {transform_indices = @transform_1, window_bounds = array<i64: 1, 8, 128>}, {pipeline_mode = #tpu.pipeline_mode<synchronous>, transform_indices = @transform_2, window_bounds = array<i64: 8, 8>}, {pipeline_mode = #tpu.pipeline_mode<synchronous>, transform_indices = @transform_3, window_bounds = array<i64: 8, 8>}, {pipeline_mode = #tpu.pipeline_mode<synchronous>, transform_indices = @transform_4, window_bounds = array<i64: 8, 1>}, {pipeline_mode = #tpu.pipeline_mode<synchronous>, transform_indices = @transform_5, window_bounds = array<i64: 1, 128>}, {transform_indices = @transform_6, window_bounds = array<i64: 1, 8, 128>}]} {
    %c0 = arith.constant 0 : index
    %c0_0 = arith.constant 0 : index
    %0 = vector.load %arg3[%c0, %c0_0] : memref<8x8xf32, #tpu.memory_space<vmem>>, vector<8x8xf32>
    %c0_1 = arith.constant 0 : index
    %c0_2 = arith.constant 0 : index
    %c0_3 = arith.constant 0 : index
    %1 = vector.load %arg1[%c0_1, %c0_2, %c0_3] : memref<1x8x128xf32, #tpu.memory_space<vmem>>, vector<1x8x128xf32>
    %2 = vector.shape_cast %1 : vector<1x8x128xf32> to vector<8x128xf32>
    %cst = arith.constant dense<0.000000e+00> : vector<8x128xf32>
    %3 = tpu.matmul %0, %2, %cst {dimension_numbers = #tpu.dot_dimension_numbers<[1], [0], [0], [1], [0, 0, 1, 1], [], []>} : vector<8x8xf32>, vector<8x128xf32>, vector<8x128xf32> -> vector<8x128xf32>
    %c0_4 = arith.constant 0 : index
    %c0_5 = arith.constant 0 : index
    %4 = vector.load %arg4[%c0_4, %c0_5] : memref<8x8xf32, #tpu.memory_space<vmem>>, vector<8x8xf32>
    %c0_6 = arith.constant 0 : index
    %c0_7 = arith.constant 0 : index
    %c0_8 = arith.constant 0 : index
    %5 = vector.load %arg2[%c0_6, %c0_7, %c0_8] : memref<1x8x128xf32, #tpu.memory_space<vmem>>, vector<1x8x128xf32>
    %6 = vector.shape_cast %5 : vector<1x8x128xf32> to vector<8x128xf32>
    %cst_9 = arith.constant dense<0.000000e+00> : vector<8x128xf32>
    %7 = tpu.matmul %4, %6, %cst_9 {dimension_numbers = #tpu.dot_dimension_numbers<[1], [0], [0], [1], [0, 0, 1, 1], [], []>} : vector<8x8xf32>, vector<8x128xf32>, vector<8x128xf32> -> vector<8x128xf32>
    %8 = arith.addf %3, %7 : vector<8x128xf32>
    %c0_10 = arith.constant 0 : index
    %c0_11 = arith.constant 0 : index
    %9 = vector.load %arg5[%c0_10, %c0_11] : memref<8x1xf32, #tpu.memory_space<vmem>>, vector<8x1xf32>
    %10 = vector.broadcast %9 : vector<8x1xf32> to vector<8x128xf32>
    %11 = arith.addf %8, %10 : vector<8x128xf32>
    %c0_12 = arith.constant 0 : index
    %c0_13 = arith.constant 0 : index
    %12 = vector.load %arg6[%c0_12, %c0_13] : memref<1x128xf32, #tpu.memory_space<vmem>>, vector<1x128xf32>
    %13 = vector.broadcast %12 : vector<1x128xf32> to vector<8x128xf32>
    %14 = arith.mulf %11, %13 : vector<8x128xf32>
    %c0_14 = arith.constant 0 : index
    %c0_15 = arith.constant 0 : index
    %c0_16 = arith.constant 0 : index
    %15 = vector.load %arg7[%c0_14, %c0_15, %c0_16] : memref<1x8x128xf32, #tpu.memory_space<vmem>>, vector<1x8x128xf32>
    %16 = vector.shape_cast %15 : vector<1x8x128xf32> to vector<8x128xf32>
    %17 = vector.shape_cast %14 : vector<8x128xf32> to vector<1x8x128xf32>
    tpu.vector_store %arg7[%c0_14, %c0_15, %c0_16], %17 {strides = array<i32>} : memref<1x8x128xf32, #tpu.memory_space<vmem>>, vector<1x8x128xf32>,
    return
  }
  func.func @transform_0(%arg0: i32) -> (i32, i32, i32) {
    %c0_i32 = arith.constant 0 : i32
    %c0_i32_0 = arith.constant 0 : i32
    %c0_i32_1 = arith.constant 0 : i32
    return %arg0, %c0_i32, %c0_i32_0 : i32, i32, i32
  }
  func.func @transform_1(%arg0: i32) -> (i32, i32, i32) {
    %c0_i32 = arith.constant 0 : i32
    %c0_i32_0 = arith.constant 0 : i32
    %c0_i32_1 = arith.constant 0 : i32
    return %arg0, %c0_i32, %c0_i32_0 : i32, i32, i32
  }
  func.func @transform_2(%arg0: i32) -> (i32, i32) {
    %c0_i32 = arith.constant 0 : i32
    %c0_i32_0 = arith.constant 0 : i32
    %c0_i32_1 = arith.constant 0 : i32
    return %c0_i32, %c0_i32_0 : i32, i32
  }
  func.func @transform_3(%arg0: i32) -> (i32, i32) {
    %c0_i32 = arith.constant 0 : i32
    %c0_i32_0 = arith.constant 0 : i32
    %c0_i32_1 = arith.constant 0 : i32
    return %c0_i32, %c0_i32_0 : i32, i32
  }
  func.func @transform_4(%arg0: i32) -> (i32, i32) {
    %c0_i32 = arith.constant 0 : i32
    %c0_i32_0 = arith.constant 0 : i32
    %c0_i32_1 = arith.constant 0 : i32
    return %c0_i32, %c0_i32_0 : i32, i32
  }
  func.func @transform_5(%arg0: i32) -> (i32, i32) {
    %c0_i32 = arith.constant 0 : i32
    %c0_i32_0 = arith.constant 0 : i32
    %c0_i32_1 = arith.constant 0 : i32
    return %c0_i32, %c0_i32_0 : i32, i32
  }
  func.func @transform_6(%arg0: i32) -> (i32, i32, i32) {
    %c0_i32 = arith.constant 0 : i32
    %c0_i32_0 = arith.constant 0 : i32
    %c0_i32_1 = arith.constant 0 : i32
    return %arg0, %c0_i32, %c0_i32_0 : i32, i32, i32
  }
}

module attributes {stable_mosaic.version = 11 : i64} {
  func.func @_conv1x1_kernel(%arg0: i32, %arg1: memref<1x8x128xf32, #tpu.memory_space<vmem>>, %arg2: memref<4x8xf32, #tpu.memory_space<vmem>>, %arg3: memref<4x1xf32, #tpu.memory_space<vmem>>, %arg4: memref<1x128xf32, #tpu.memory_space<vmem>>, %arg5: memref<1x4x128xf32, #tpu.memory_space<vmem>>) attributes {dimension_semantics = [#tpu.dimension_semantics<parallel>], iteration_bounds = array<i64: 2>, scalar_prefetch = 0 : i64, scratch_operands = 0 : i64, tpu.core_type = #tpu.core_type<tc>, window_params = [{transform_indices = @transform_0, window_bounds = array<i64: 1, 8, 128>}, {pipeline_mode = #tpu.pipeline_mode<synchronous>, transform_indices = @transform_1, window_bounds = array<i64: 4, 8>}, {pipeline_mode = #tpu.pipeline_mode<synchronous>, transform_indices = @transform_2, window_bounds = array<i64: 4, 1>}, {pipeline_mode = #tpu.pipeline_mode<synchronous>, transform_indices = @transform_3, window_bounds = array<i64: 1, 128>}, {transform_indices = @transform_4, window_bounds = array<i64: 1, 4, 128>}]} {
    %c0 = arith.constant 0 : index
    %c0_0 = arith.constant 0 : index
    %0 = vector.load %arg2[%c0, %c0_0] : memref<4x8xf32, #tpu.memory_space<vmem>>, vector<4x8xf32>
    %c0_1 = arith.constant 0 : index
    %c0_2 = arith.constant 0 : index
    %c0_3 = arith.constant 0 : index
    %1 = vector.load %arg1[%c0_1, %c0_2, %c0_3] : memref<1x8x128xf32, #tpu.memory_space<vmem>>, vector<1x8x128xf32>
    %2 = vector.shape_cast %1 : vector<1x8x128xf32> to vector<8x128xf32>
    %cst = arith.constant dense<0.000000e+00> : vector<4x128xf32>
    %3 = tpu.matmul %0, %2, %cst {dimension_numbers = #tpu.dot_dimension_numbers<[1], [0], [0], [1], [0, 0, 1, 1], [], []>} : vector<4x8xf32>, vector<8x128xf32>, vector<4x128xf32> -> vector<4x128xf32>
    %c0_4 = arith.constant 0 : index
    %c0_5 = arith.constant 0 : index
    %4 = vector.load %arg3[%c0_4, %c0_5] : memref<4x1xf32, #tpu.memory_space<vmem>>, vector<4x1xf32>
    %5 = vector.broadcast %4 : vector<4x1xf32> to vector<4x128xf32>
    %6 = arith.addf %3, %5 : vector<4x128xf32>
    %c0_6 = arith.constant 0 : index
    %c0_7 = arith.constant 0 : index
    %7 = vector.load %arg4[%c0_6, %c0_7] : memref<1x128xf32, #tpu.memory_space<vmem>>, vector<1x128xf32>
    %8 = vector.broadcast %7 : vector<1x128xf32> to vector<4x128xf32>
    %9 = arith.mulf %6, %8 : vector<4x128xf32>
    %c0_8 = arith.constant 0 : index
    %c0_9 = arith.constant 0 : index
    %c0_10 = arith.constant 0 : index
    %10 = vector.load %arg5[%c0_8, %c0_9, %c0_10] : memref<1x4x128xf32, #tpu.memory_space<vmem>>, vector<1x4x128xf32>
    %11 = vector.shape_cast %10 : vector<1x4x128xf32> to vector<4x128xf32>
    %12 = vector.shape_cast %9 : vector<4x128xf32> to vector<1x4x128xf32>
    tpu.vector_store %arg5[%c0_8, %c0_9, %c0_10], %12 {strides = array<i32>} : memref<1x4x128xf32, #tpu.memory_space<vmem>>, vector<1x4x128xf32>,
    return
  }
  func.func @transform_0(%arg0: i32) -> (i32, i32, i32) {
    %c0_i32 = arith.constant 0 : i32
    %c0_i32_0 = arith.constant 0 : i32
    %c0_i32_1 = arith.constant 0 : i32
    return %arg0, %c0_i32, %c0_i32_0 : i32, i32, i32
  }
  func.func @transform_1(%arg0: i32) -> (i32, i32) {
    %c0_i32 = arith.constant 0 : i32
    %c0_i32_0 = arith.constant 0 : i32
    %c0_i32_1 = arith.constant 0 : i32
    return %c0_i32, %c0_i32_0 : i32, i32
  }
  func.func @transform_2(%arg0: i32) -> (i32, i32) {
    %c0_i32 = arith.constant 0 : i32
    %c0_i32_0 = arith.constant 0 : i32
    %c0_i32_1 = arith.constant 0 : i32
    return %c0_i32, %c0_i32_0 : i32, i32
  }
  func.func @transform_3(%arg0: i32) -> (i32, i32) {
    %c0_i32 = arith.constant 0 : i32
    %c0_i32_0 = arith.constant 0 : i32
    %c0_i32_1 = arith.constant 0 : i32
    return %c0_i32, %c0_i32_0 : i32, i32
  }
  func.func @transform_4(%arg0: i32) -> (i32, i32, i32) {
    %c0_i32 = arith.constant 0 : i32
    %c0_i32_0 = arith.constant 0 : i32
    %c0_i32_1 = arith.constant 0 : i32
    return %arg0, %c0_i32, %c0_i32_0 : i32, i32, i32
  }
}

module attributes {stable_mosaic.version = 11 : i64} {
  func.func @_conv1x1_cat2_kernel(%arg0: i32, %arg1: memref<1x4x384xf32, #tpu.memory_space<vmem>>, %arg2: memref<1x4x384xf32, #tpu.memory_space<vmem>>, %arg3: memref<4x4xf32, #tpu.memory_space<vmem>>, %arg4: memref<4x4xf32, #tpu.memory_space<vmem>>, %arg5: memref<4x1xf32, #tpu.memory_space<vmem>>, %arg6: memref<1x384xf32, #tpu.memory_space<vmem>>, %arg7: memref<1x4x384xf32, #tpu.memory_space<vmem>>) attributes {dimension_semantics = [#tpu.dimension_semantics<parallel>], iteration_bounds = array<i64: 2>, scalar_prefetch = 0 : i64, scratch_operands = 0 : i64, tpu.core_type = #tpu.core_type<tc>, window_params = [{transform_indices = @transform_0, window_bounds = array<i64: 1, 4, 384>}, {transform_indices = @transform_1, window_bounds = array<i64: 1, 4, 384>}, {pipeline_mode = #tpu.pipeline_mode<synchronous>, transform_indices = @transform_2, window_bounds = array<i64: 4, 4>}, {pipeline_mode = #tpu.pipeline_mode<synchronous>, transform_indices = @transform_3, window_bounds = array<i64: 4, 4>}, {pipeline_mode = #tpu.pipeline_mode<synchronous>, transform_indices = @transform_4, window_bounds = array<i64: 4, 1>}, {pipeline_mode = #tpu.pipeline_mode<synchronous>, transform_indices = @transform_5, window_bounds = array<i64: 1, 384>}, {transform_indices = @transform_6, window_bounds = array<i64: 1, 4, 384>}]} {
    %c0 = arith.constant 0 : index
    %c0_0 = arith.constant 0 : index
    %0 = vector.load %arg3[%c0, %c0_0] : memref<4x4xf32, #tpu.memory_space<vmem>>, vector<4x4xf32>
    %c0_1 = arith.constant 0 : index
    %c0_2 = arith.constant 0 : index
    %c0_3 = arith.constant 0 : index
    %1 = vector.load %arg1[%c0_1, %c0_2, %c0_3] : memref<1x4x384xf32, #tpu.memory_space<vmem>>, vector<1x4x384xf32>
    %2 = vector.shape_cast %1 : vector<1x4x384xf32> to vector<4x384xf32>
    %cst = arith.constant dense<0.000000e+00> : vector<4x384xf32>
    %3 = tpu.matmul %0, %2, %cst {dimension_numbers = #tpu.dot_dimension_numbers<[1], [0], [0], [1], [0, 0, 1, 1], [], []>} : vector<4x4xf32>, vector<4x384xf32>, vector<4x384xf32> -> vector<4x384xf32>
    %c0_4 = arith.constant 0 : index
    %c0_5 = arith.constant 0 : index
    %4 = vector.load %arg4[%c0_4, %c0_5] : memref<4x4xf32, #tpu.memory_space<vmem>>, vector<4x4xf32>
    %c0_6 = arith.constant 0 : index
    %c0_7 = arith.constant 0 : index
    %c0_8 = arith.constant 0 : index
    %5 = vector.load %arg2[%c0_6, %c0_7, %c0_8] : memref<1x4x384xf32, #tpu.memory_space<vmem>>, vector<1x4x384xf32>
    %6 = vector.shape_cast %5 : vector<1x4x384xf32> to vector<4x384xf32>
    %cst_9 = arith.constant dense<0.000000e+00> : vector<4x384xf32>
    %7 = tpu.matmul %4, %6, %cst_9 {dimension_numbers = #tpu.dot_dimension_numbers<[1], [0], [0], [1], [0, 0, 1, 1], [], []>} : vector<4x4xf32>, vector<4x384xf32>, vector<4x384xf32> -> vector<4x384xf32>
    %8 = arith.addf %3, %7 : vector<4x384xf32>
    %c0_10 = arith.constant 0 : index
    %c0_11 = arith.constant 0 : index
    %9 = vector.load %arg5[%c0_10, %c0_11] : memref<4x1xf32, #tpu.memory_space<vmem>>, vector<4x1xf32>
    %10 = vector.broadcast %9 : vector<4x1xf32> to vector<4x384xf32>
    %11 = arith.addf %8, %10 : vector<4x384xf32>
    %c0_12 = arith.constant 0 : index
    %c0_13 = arith.constant 0 : index
    %12 = vector.load %arg6[%c0_12, %c0_13] : memref<1x384xf32, #tpu.memory_space<vmem>>, vector<1x384xf32>
    %13 = vector.broadcast %12 : vector<1x384xf32> to vector<4x384xf32>
    %14 = arith.mulf %11, %13 : vector<4x384xf32>
    %c0_14 = arith.constant 0 : index
    %c0_15 = arith.constant 0 : index
    %c0_16 = arith.constant 0 : index
    %15 = vector.load %arg7[%c0_14, %c0_15, %c0_16] : memref<1x4x384xf32, #tpu.memory_space<vmem>>, vector<1x4x384xf32>
    %16 = vector.shape_cast %15 : vector<1x4x384xf32> to vector<4x384xf32>
    %17 = vector.shape_cast %14 : vector<4x384xf32> to vector<1x4x384xf32>
    tpu.vector_store %arg7[%c0_14, %c0_15, %c0_16], %17 {strides = array<i32>} : memref<1x4x384xf32, #tpu.memory_space<vmem>>, vector<1x4x384xf32>,
    return
  }
  func.func @transform_0(%arg0: i32) -> (i32, i32, i32) {
    %c0_i32 = arith.constant 0 : i32
    %c0_i32_0 = arith.constant 0 : i32
    %c0_i32_1 = arith.constant 0 : i32
    return %arg0, %c0_i32, %c0_i32_0 : i32, i32, i32
  }
  func.func @transform_1(%arg0: i32) -> (i32, i32, i32) {
    %c0_i32 = arith.constant 0 : i32
    %c0_i32_0 = arith.constant 0 : i32
    %c0_i32_1 = arith.constant 0 : i32
    return %arg0, %c0_i32, %c0_i32_0 : i32, i32, i32
  }
  func.func @transform_2(%arg0: i32) -> (i32, i32) {
    %c0_i32 = arith.constant 0 : i32
    %c0_i32_0 = arith.constant 0 : i32
    %c0_i32_1 = arith.constant 0 : i32
    return %c0_i32, %c0_i32_0 : i32, i32
  }
  func.func @transform_3(%arg0: i32) -> (i32, i32) {
    %c0_i32 = arith.constant 0 : i32
    %c0_i32_0 = arith.constant 0 : i32
    %c0_i32_1 = arith.constant 0 : i32
    return %c0_i32, %c0_i32_0 : i32, i32
  }
  func.func @transform_4(%arg0: i32) -> (i32, i32) {
    %c0_i32 = arith.constant 0 : i32
    %c0_i32_0 = arith.constant 0 : i32
    %c0_i32_1 = arith.constant 0 : i32
    return %c0_i32, %c0_i32_0 : i32, i32
  }
  func.func @transform_5(%arg0: i32) -> (i32, i32) {
    %c0_i32 = arith.constant 0 : i32
    %c0_i32_0 = arith.constant 0 : i32
    %c0_i32_1 = arith.constant 0 : i32
    return %c0_i32, %c0_i32_0 : i32, i32
  }
  func.func @transform_6(%arg0: i32) -> (i32, i32, i32) {
    %c0_i32 = arith.constant 0 : i32
    %c0_i32_0 = arith.constant 0 : i32
    %c0_i32_1 = arith.constant 0 : i32
    return %arg0, %c0_i32, %c0_i32_0 : i32, i32, i32
  }
}

module attributes {stable_mosaic.version = 11 : i64} {
  func.func @_conv_kernel(%arg0: i32, %arg1: memref<1x4x384xf32, #tpu.memory_space<vmem>>, %arg2: memref<2x36xf32, #tpu.memory_space<vmem>>, %arg3: memref<2x1xf32, #tpu.memory_space<vmem>>, %arg4: memref<1x384xf32, #tpu.memory_space<vmem>>, %arg5: memref<1x2x384xf32, #tpu.memory_space<vmem>>, %arg6: memref<4x640xf32, #tpu.memory_space<vmem>>, %arg7: memref<36x384xf32, #tpu.memory_space<vmem>>) attributes {dimension_semantics = [#tpu.dimension_semantics<parallel>], iteration_bounds = array<i64: 2>, scalar_prefetch = 0 : i64, scratch_operands = 2 : i64, tpu.core_type = #tpu.core_type<tc>, window_params = [{transform_indices = @transform_0, window_bounds = array<i64: 1, 4, 384>}, {pipeline_mode = #tpu.pipeline_mode<synchronous>, transform_indices = @transform_1, window_bounds = array<i64: 2, 36>}, {pipeline_mode = #tpu.pipeline_mode<synchronous>, transform_indices = @transform_2, window_bounds = array<i64: 2, 1>}, {pipeline_mode = #tpu.pipeline_mode<synchronous>, transform_indices = @transform_3, window_bounds = array<i64: 1, 384>}, {transform_indices = @transform_4, window_bounds = array<i64: 1, 2, 384>}]} {
    %cst = arith.constant 0.000000e+00 : f32
    %0 = vector.broadcast %cst : f32 to vector<4x128xf32>
    %c0 = arith.constant 0 : index
    %c0_0 = arith.constant 0 : index
    %1 = vector.load %arg6[%c0, %c0_0] : memref<4x640xf32, #tpu.memory_space<vmem>>, vector<4x128xf32>
    tpu.vector_store %arg6[%c0, %c0_0], %0 {strides = array<i32>} : memref<4x640xf32, #tpu.memory_space<vmem>>, vector<4x128xf32>,
    %cst_1 = arith.constant 0.000000e+00 : f32
    %2 = vector.broadcast %cst_1 : f32 to vector<4x128xf32>
    %c0_2 = arith.constant 0 : index
    %c512 = arith.constant 512 : index
    %3 = vector.load %arg6[%c0_2, %c512] : memref<4x640xf32, #tpu.memory_space<vmem>>, vector<4x128xf32>
    tpu.vector_store %arg6[%c0_2, %c512], %2 {strides = array<i32>} : memref<4x640xf32, #tpu.memory_space<vmem>>, vector<4x128xf32>,
    %c0_3 = arith.constant 0 : index
    %c0_4 = arith.constant 0 : index
    %c0_5 = arith.constant 0 : index
    %4 = vector.load %arg1[%c0_3, %c0_4, %c0_5] : memref<1x4x384xf32, #tpu.memory_space<vmem>>, vector<1x4x384xf32>
    %5 = vector.shape_cast %4 : vector<1x4x384xf32> to vector<4x384xf32>
    %c0_6 = arith.constant 0 : index
    %c128 = arith.constant 128 : index
    %6 = vector.load %arg6[%c0_6, %c128] : memref<4x640xf32, #tpu.memory_space<vmem>>, vector<4x384xf32>
    tpu.vector_store %arg6[%c0_6, %c128], %5 {strides = array<i32>} : memref<4x640xf32, #tpu.memory_space<vmem>>, vector<4x384xf32>,
    %c0_7 = arith.constant 0 : index
    %c109 = arith.constant 109 : index
    %7 = vector.load %arg6[%c0_7, %c109] : memref<4x640xf32, #tpu.memory_space<vmem>>, vector<4x384xf32>
    %c0_8 = arith.constant 0 : index
    %c0_9 = arith.constant 0 : index
    %8 = vector.load %arg7[%c0_8, %c0_9] : memref<36x384xf32, #tpu.memory_space<vmem>>, vector<4x384xf32>
    tpu.vector_store %arg7[%c0_8, %c0_9], %7 {strides = array<i32>} : memref<36x384xf32, #tpu.memory_space<vmem>>, vector<4x384xf32>,
    %c0_10 = arith.constant 0 : index
    %c110 = arith.constant 110 : index
    %9 = vector.load %arg6[%c0_10, %c110] : memref<4x640xf32, #tpu.memory_space<vmem>>, vector<4x384xf32>
    %c4 = arith.constant 4 : index
    %c0_11 = arith.constant 0 : index
    %10 = vector.load %arg7[%c4, %c0_11] : memref<36x384xf32, #tpu.memory_space<vmem>>, vector<4x384xf32>
    tpu.vector_store %arg7[%c4, %c0_11], %9 {strides = array<i32>} : memref<36x384xf32, #tpu.memory_space<vmem>>, vector<4x384xf32>,
    %c0_12 = arith.constant 0 : index
    %c111 = arith.constant 111 : index
    %11 = vector.load %arg6[%c0_12, %c111] : memref<4x640xf32, #tpu.memory_space<vmem>>, vector<4x384xf32>
    %c8 = arith.constant 8 : index
    %c0_13 = arith.constant 0 : index
    %12 = vector.load %arg7[%c8, %c0_13] : memref<36x384xf32, #tpu.memory_space<vmem>>, vector<4x384xf32>
    tpu.vector_store %arg7[%c8, %c0_13], %11 {strides = array<i32>} : memref<36x384xf32, #tpu.memory_space<vmem>>, vector<4x384xf32>,
    %c0_14 = arith.constant 0 : index
    %c127 = arith.constant 127 : index
    %13 = vector.load %arg6[%c0_14, %c127] : memref<4x640xf32, #tpu.memory_space<vmem>>, vector<4x384xf32>
    %c12 = arith.constant 12 : index
    %c0_15 = arith.constant 0 : index
    %14 = vector.load %arg7[%c12, %c0_15] : memref<36x384xf32, #tpu.memory_space<vmem>>, vector<4x384xf32>
    tpu.vector_store %arg7[%c12, %c0_15], %13 {strides = array<i32>} : memref<36x384xf32, #tpu.memory_space<vmem>>, vector<4x384xf32>,
    %c0_16 = arith.constant 0 : index
    %c128_17 = arith.constant 128 : index
    %15 = vector.load %arg6[%c0_16, %c128_17] : memref<4x640xf32, #tpu.memory_space<vmem>>, vector<4x384xf32>
    %c16 = arith.constant 16 : index
    %c0_18 = arith.constant 0 : index
    %16 = vector.load %arg7[%c16, %c0_18] : memref<36x384xf32, #tpu.memory_space<vmem>>, vector<4x384xf32>
    tpu.vector_store %arg7[%c16, %c0_18], %15 {strides = array<i32>} : memref<36x384xf32, #tpu.memory_space<vmem>>, vector<4x384xf32>,
    %c0_19 = arith.constant 0 : index
    %c129 = arith.constant 129 : index
    %17 = vector.load %arg6[%c0_19, %c129] : memref<4x640xf32, #tpu.memory_space<vmem>>, vector<4x384xf32>
    %c20 = arith.constant 20 : index
    %c0_20 = arith.constant 0 : index
    %18 = vector.load %arg7[%c20, %c0_20] : memref<36x384xf32, #tpu.memory_space<vmem>>, vector<4x384xf32>
    tpu.vector_store %arg7[%c20, %c0_20], %17 {strides = array<i32>} : memref<36x384xf32, #tpu.memory_space<vmem>>, vector<4x384xf32>,
    %c0_21 = arith.constant 0 : index
    %c145 = arith.constant 145 : index
    %19 = vector.load %arg6[%c0_21, %c145] : memref<4x640xf32, #tpu.memory_space<vmem>>, vector<4x384xf32>
    %c24 = arith.constant 24 : index
    %c0_22 = arith.constant 0 : index
    %20 = vector.load %arg7[%c24, %c0_22] : memref<36x384xf32, #tpu.memory_space<vmem>>, vector<4x384xf32>
    tpu.vector_store %arg7[%c24, %c0_22], %19 {strides = array<i32>} : memref<36x384xf32, #tpu.memory_space<vmem>>, vector<4x384xf32>,
    %c0_23 = arith.constant 0 : index
    %c146 = arith.constant 146 : index
    %21 = vector.load %arg6[%c0_23, %c146] : memref<4x640xf32, #tpu.memory_space<vmem>>, vector<4x384xf32>
    %c28 = arith.constant 28 : index
    %c0_24 = arith.constant 0 : index
    %22 = vector.load %arg7[%c28, %c0_24] : memref<36x384xf32, #tpu.memory_space<vmem>>, vector<4x384xf32>
    tpu.vector_store %arg7[%c28, %c0_24], %21 {strides = array<i32>} : memref<36x384xf32, #tpu.memory_space<vmem>>, vector<4x384xf32>,
    %c0_25 = arith.constant 0 : index
    %c147 = arith.constant 147 : index
    %23 = vector.load %arg6[%c0_25, %c147] : memref<4x640xf32, #tpu.memory_space<vmem>>, vector<4x384xf32>
    %c32 = arith.constant 32 : index
    %c0_26 = arith.constant 0 : index
    %24 = vector.load %arg7[%c32, %c0_26] : memref<36x384xf32, #tpu.memory_space<vmem>>, vector<4x384xf32>
    tpu.vector_store %arg7[%c32, %c0_26], %23 {strides = array<i32>} : memref<36x384xf32, #tpu.memory_space<vmem>>, vector<4x384xf32>,
    %c0_27 = arith.constant 0 : index
    %c0_28 = arith.constant 0 : index
    %25 = vector.load %arg2[%c0_27, %c0_28] : memref<2x36xf32, #tpu.memory_space<vmem>>, vector<2x36xf32>
    %c0_29 = arith.constant 0 : index
    %c0_30 = arith.constant 0 : index
    %26 = vector.load %arg7[%c0_29, %c0_30] : memref<36x384xf32, #tpu.memory_space<vmem>>, vector<36x384xf32>
    %cst_31 = arith.constant dense<0.000000e+00> : vector<2x384xf32>
    %27 = tpu.matmul %25, %26, %cst_31 {dimension_numbers = #tpu.dot_dimension_numbers<[1], [0], [0], [1], [0, 0, 1, 1], [], []>} : vector<2x36xf32>, vector<36x384xf32>, vector<2x384xf32> -> vector<2x384xf32>
    %c0_32 = arith.constant 0 : index
    %c0_33 = arith.constant 0 : index
    %28 = vector.load %arg3[%c0_32, %c0_33] : memref<2x1xf32, #tpu.memory_space<vmem>>, vector<2x1xf32>
    %29 = vector.broadcast %28 : vector<2x1xf32> to vector<2x384xf32>
    %30 = arith.addf %27, %29 : vector<2x384xf32>
    %c0_34 = arith.constant 0 : index
    %c0_35 = arith.constant 0 : index
    %31 = vector.load %arg4[%c0_34, %c0_35] : memref<1x384xf32, #tpu.memory_space<vmem>>, vector<1x384xf32>
    %32 = vector.broadcast %31 : vector<1x384xf32> to vector<2x384xf32>
    %33 = arith.mulf %30, %32 : vector<2x384xf32>
    %c0_36 = arith.constant 0 : index
    %c0_37 = arith.constant 0 : index
    %c0_38 = arith.constant 0 : index
    %34 = vector.load %arg5[%c0_36, %c0_37, %c0_38] : memref<1x2x384xf32, #tpu.memory_space<vmem>>, vector<1x2x384xf32>
    %35 = vector.shape_cast %34 : vector<1x2x384xf32> to vector<2x384xf32>
    %36 = vector.shape_cast %33 : vector<2x384xf32> to vector<1x2x384xf32>
    tpu.vector_store %arg5[%c0_36, %c0_37, %c0_38], %36 {strides = array<i32>} : memref<1x2x384xf32, #tpu.memory_space<vmem>>, vector<1x2x384xf32>,
    return
  }
  func.func @transform_0(%arg0: i32) -> (i32, i32, i32) {
    %c0_i32 = arith.constant 0 : i32
    %c0_i32_0 = arith.constant 0 : i32
    %c0_i32_1 = arith.constant 0 : i32
    return %arg0, %c0_i32, %c0_i32_0 : i32, i32, i32
  }
  func.func @transform_1(%arg0: i32) -> (i32, i32) {
    %c0_i32 = arith.constant 0 : i32
    %c0_i32_0 = arith.constant 0 : i32
    %c0_i32_1 = arith.constant 0 : i32
    return %c0_i32, %c0_i32_0 : i32, i32
  }
  func.func @transform_2(%arg0: i32) -> (i32, i32) {
    %c0_i32 = arith.constant 0 : i32
    %c0_i32_0 = arith.constant 0 : i32
    %c0_i32_1 = arith.constant 0 : i32
    return %c0_i32, %c0_i32_0 : i32, i32
  }
  func.func @transform_3(%arg0: i32) -> (i32, i32) {
    %c0_i32 = arith.constant 0 : i32
    %c0_i32_0 = arith.constant 0 : i32
    %c0_i32_1 = arith.constant 0 : i32
    return %c0_i32, %c0_i32_0 : i32, i32
  }
  func.func @transform_4(%arg0: i32) -> (i32, i32, i32) {
    %c0_i32 = arith.constant 0 : i32
    %c0_i32_0 = arith.constant 0 : i32
    %c0_i32_1 = arith.constant 0 : i32
    return %arg0, %c0_i32, %c0_i32_0 : i32, i32, i32
  }
}

</mosaic_0001>

<bundles_post_ra>
// kernel: spectral_unet_forward.14
= control target key start
LH: loop header
LB: loop body
LE: loop exit
PB: predicated region body
PF: predicated region fallthrough
CT: control target
= control target key end

     0   :  { %s839_s15 = smov 0   ;;  %s913_s0 = inlined_call_operand.vmem [shape: f32[2,4,384], index: 0, kind: input, shape index: {}]   ;;  %s914_s1 = inlined_call_operand.vmem [shape: f32[2,4,36], index: 1, kind: input, shape index: {}]   ;;  %s915_s2 = inlined_call_operand.vmem [shape: f32[2,4,1], index: 2, kind: input, shape index: {}]   ;;  %s916_s3 = inlined_call_operand.vmem [shape: f32[1,384], index: 3, kind: input, shape index: {}]   ;;  %s917_s4 = inlined_call_operand.vmem [shape: f32[2,4,384], index: 4, kind: output, shape index: {}]  }
   0x1 LB: > { %s702_s16 = sadd.s32 4294967295, %s795_s15   ;;  %p706_p0 = scmp.ge.s32.totalorder %s795_s15, 1  ;;  %s795_s15 = sphi %s839_s15, %s14_s15  }
   0x2   : > { %p162_p1 = scmp.lt.s32.totalorder %s795_s15, 3 }
   0x4   : > { %p163_p2 = pnand %p706_p0, %p162_p1 }
   0x5   : > { %v850_v0 = vld [vmem:[%s916_s3] sm:$0x7] (!%p163_p2)  ;;  %p188_p3 = scmp.lt.s32.totalorder (!%p163_p2), %s702_s16, 1  ;;  %v801_v1 = vmov (!%p163_p2), 0.0   ;;  %s860_s26 = smov (!%p163_p2), 0  }
   0x6   : > { %166 = sbr.rel (%p163_p2) target bundleno = 444 (0x1bc), region = 36  ;;  %198 = vst [vmem:[#allocation2] sm:$0xf] (!%p163_p2), %v801_v1  ;;  %199 = vst [vmem:[#allocation2 + $0x10] sm:$0xf] (!%p163_p2), %v801_v1 }
   0xd   : > { %s919_s16 = smov (!%p188_p3, %s702_s16), 1 }
   0xe   : > { %s750_s19 = smul.u32 12, %s919_s16 }
  0x10   : > { %s192_s22 = scalar_lea.vmem %s913_s0, %s750_s19  ;;  %s858_s25 = scalar_lea.vmem %s917_s4, %s750_s19 }
  0x11   : > { %v200_v2 = vld [vmem:[%s192_s22] sm:$0xff]  ;;  %v201_v3 = vld [vmem:[%s192_s22 + $0x8] sm:$0xf] }
  0x12   : > { %202 = vst [vmem:[#allocation2 + $0x4] sm:$0xff] %v200_v2  ;;  %203 = vst [vmem:[#allocation2 + $0xc] sm:$0xf] %v201_v3 }
  0x13 LB: >> { %v213_v6 = vld [vmem:[#allocation2 + $0x10] sm:$0xf]  ;;  %s802_s27 = smov 19   ;;  %s803_s28 = smov 18   ;;  %v806_v20 = vmov 0.0|0.0   ;;  %v810_v25 = vmov 0.0   ;;  %s799_s26 = sphi %s860_s26, %s210_s26  }
  0x14   : >> { %vm216_vm2 = vcmp.gt.f32.partialorder %v213_v6, 0.0  ;;  %v219_v9 = vmul.f32 0.01, %v213_v6  ;;  %s804_s29 = smov 1   ;;  %s805_s30 = smov 17   ;;  %744 = vmatprep.subr.bf16.mxu1 %v806_v20  ;;  %529 = vmatprep.mubr.f32.mxu0 %v810_v25  ;;  %vm812_vm3 = vmmov 0  }
  0x15   : >> { %s807_s5 = smov 127   ;;  %s808_s6 = smov 111   ;;  %733 = vmatprep.mubr.msk.f32.mxu1 %vm812_vm3, %v810_v25  ;;  %v813_v26 = vmov 0   ;;  %vm264_vm4 = vcmask 146432   ;;  %vm240_vm5 = vcmask 154624   ;;  %vm312_vm6 = vcmask 7168  }
  0x16   : >> { %v222_v12 = vsel %vm216_vm2, %v213_v6, %v219_v9  ;;  %s809_s7 = smov 110   ;;  %s811_s8 = smov 109   ;;  %780 = vset.pattern.permute.xlu0 %v813_v26  ;;  %vm288_vm7 = vcmask 138240   ;;  %vm344_vm8 = vcmask 1039360   ;;  %vm368_vm9 = vcmask 908288  }
  0x17   : >> { %225 = vst [vmem:[#allocation3 + $0x10] sm:$0xf] %v222_v12  ;;  %s709_s9 = sshll.u32 %s799_s26, 2  ;;  %vm392_vm10 = vcmask 900096   ;;  %vm416_vm11 = vcmask 891904   ;;  %vm455_vm12 = vcmask 1043456  }
  0x18   : >> { %s444_s12 = scalar_lea.vmem %s915_s2, %s709_s9  ;;  %s427_s16 = scalar_lea.vmem %s914_s1, %s709_s9  ;;  %vm451_vm13 = vcmask 293888  }
  0x19   : >> { %v212_v4 = vld [vmem:[#allocation2 + $0x8] sm:$0xff]  ;;  %v211_v5 = vld [vmem:[#allocation2] sm:$0xff]  ;;  %s210_s26 = sadd.s32 1, %s799_s26  }
  0x1a   : >> { %vm215_vm0 = vcmp.gt.f32.partialorder %v212_v4, 0.0  ;;  %v218_v7 = vmul.f32 0.01, %v212_v4  ;;  %vm214_vm1 = vcmp.gt.f32.partialorder %v211_v5, 0.0  ;;  %v217_v8 = vmul.f32 0.01, %v211_v5 }
  0x1b   : >> { %v445_v27 = vld [vmem:[%s444_s12] sm:$0xf]  ;;  %p207_p4 = scmp.ge.s32.totalorder %s210_s26, 2  }
  0x1c   : >> { %v221_v10 = vsel %vm215_vm0, %v212_v4, %v218_v7  ;;  %v220_v11 = vsel %vm214_vm1, %v211_v5, %v217_v8 }
  0x1d   : >> { %224 = vst [vmem:[#allocation3 + $0x8] sm:$0xff] %v221_v10  ;;  %236 = vrot.lane.b32.xlu0 %v221_v10, %s802_s27  ;;  %223 = vst [vmem:[#allocation3] sm:$0xff] %v220_v11  ;;  %258 = vrot.lane.b32.xlu1 %v220_v11, %s803_s28  ;;  %v255_v13 = vcombine.low %v221_v10, %v221_v10  ;;  %v230_v14 = vcombine.high %v220_v11, %v220_v11 }
  0x1e   : >> { %v254_v17 = vcombine.low %v220_v11, %v220_v11  ;;  %v231_v18 = vcombine.high %v221_v10, %v221_v10 }
  0x21   : >> { %306 = vrot.lane.b32.xlu0 %v220_v11, %s804_s29  ;;  %284 = vrot.lane.b32.xlu1 %v221_v10, %s805_s30 }
  0x24   : >> { %v330_v15 = vld [vmem:[#allocation3 + $0x4] sm:$0xff]  ;;  %v331_v19 = vld [vmem:[#allocation3 + $0xc] sm:$0xff] }
  0x25   : >> { %260 = vrot.lane.b32.xlu1 %v255_v13, %s803_s28  ;;  %234 = vrot.lane.b32.xlu0 %v230_v14, %s802_s27  ;;  %v358_v16 = vcombine.high %v330_v15, %v330_v15  ;;  %327 = vst [vmem:[#allocation4 + $0x30] sm:$0xf] %v330_v15  ;;  %v335_v21 = vcombine.low %v331_v19, %v331_v19  ;;  %v323_v22 = vld [vmem:[#allocation3 + $0xc] sm:$0xf] }
  0x26   : >> { %329 = vst [vmem:[#allocation4 + $0x40] sm:$0xf] %v323_v22  ;;  %v334_v23 = vcombine.low %v330_v15, %v330_v15  ;;  %v359_v24 = vcombine.high %v331_v19, %v331_v19 }
  0x27   : >> { %328 = vst [vmem:[#allocation4 + $0x38] sm:$0xf] %v358_v16 }
  0x29   : >> { %308 = vrot.lane.b32.xlu1 %v255_v13, %s804_s29  ;;  %282 = vrot.lane.b32.xlu0 %v230_v14, %s805_s30 }
  0x2d   : >> { %256 = vrot.lane.b32.xlu1 %v254_v17, %s803_s28  ;;  %232 = vrot.lane.b32.xlu0 %v220_v11, %s802_s27 }
  0x31   : >> { %304 = vrot.lane.b32.xlu1 %v254_v17, %s804_s29  ;;  %280 = vrot.lane.b32.xlu0 %v220_v11, %s805_s30 }
  0x35   : >> { %262 = vrot.lane.b32.xlu1 %v221_v10, %s803_s28  ;;  %238 = vrot.lane.b32.xlu0 %v231_v18, %s802_s27 }
  0x39   : >> { %310 = vrot.lane.b32.xlu1 %v221_v10, %s804_s29  ;;  %286 = vrot.lane.b32.xlu0 %v231_v18, %s805_s30 }
  0x3d   : >> { %340 = vrot.lane.b32.xlu1 %v335_v21, %s807_s5  ;;  %338 = vrot.lane.b32.xlu0 %v330_v15, %s807_s5 }
  0x41   : >> { %364 = vrot.lane.b32.xlu1 %v331_v19, %s808_s6  ;;  %362 = vrot.lane.b32.xlu0 %v358_v16, %s808_s6 }
  0x45   : >> { %388 = vrot.lane.b32.xlu1 %v335_v21, %s809_s7  ;;  %386 = vrot.lane.b32.xlu0 %v330_v15, %s809_s7 }
  0x49   : >> { %360 = vrot.lane.b32.xlu1 %v330_v15, %s808_s6  ;;  %336 = vrot.lane.b32.xlu0 %v334_v23, %s807_s5 }
  0x4d   : >> { %342 = vrot.lane.b32.xlu1 %v331_v19, %s807_s5  ;;  %384 = vrot.lane.b32.xlu0 %v334_v23, %s809_s7 }
  0x51   : >> { %390 = vrot.lane.b32.xlu1 %v331_v19, %s809_s7  ;;  %366 = vrot.lane.b32.xlu0 %v359_v24, %s808_s6 }
  0x55   : >> { %412 = vrot.lane.b32.xlu1 %v331_v19, %s811_s8  ;;  %410 = vrot.lane.b32.xlu0 %v358_v16, %s811_s8 }
  0x59   : >> { %414 = vrot.lane.b32.xlu1 %v359_v24, %s811_s8  ;;  %408 = vrot.lane.b32.xlu0 %v330_v15, %s811_s8 }
  0x5d   : >> { %448 = vperm.xlu0 %780, %v445_v27  }
  0x8f   : >> { %v237_v28 = vpop.permute.xlu0 %236  ;;  %v259_v29 = vpop.permute.xlu1 %258 }
  0x93   : >> { %v307_v30 = vpop.permute.xlu0 %306  ;;  %v285_v31 = vpop.permute.xlu1 %284 }
  0x97   : >> { %v261_v32 = vpop.permute.xlu1 %260  ;;  %v235_v33 = vpop.permute.xlu0 %234 }
  0x98   : >> { %v266_v34 = vsel %vm264_vm4, %v259_v29, %v261_v32  ;;  %v242_v35 = vsel %vm240_vm5, %v235_v33, %v237_v28 }
  0x99   : >> { %272 = vst [vmem:[#allocation4 + $0x8] sm:$0xf0] %v266_v34  ;;  %248 = vst [vmem:[#allocation4 + $0x8] sm:$0xf] %v242_v35 }
  0x9b   : >> { %v309_v36 = vpop.permute.xlu1 %308  ;;  %v283_v37 = vpop.permute.xlu0 %282 }
  0x9c   : >> { %v314_v38 = vsel %vm312_vm6, %v307_v30, %v309_v36  ;;  %v290_v39 = vsel %vm288_vm7, %v283_v37, %v285_v31 }
  0x9d   : >> { %320 = vst [vmem:[#allocation4 + $0x20] sm:$0xf0] %v314_v38  ;;  %296 = vst [vmem:[#allocation4 + $0x20] sm:$0xf] %v290_v39 }
  0x9f   : >> { %v257_v40 = vpop.permute.xlu1 %256  ;;  %v233_v41 = vpop.permute.xlu0 %232 }
  0xa0   : >> { %v265_v42 = vsel %vm264_vm4, %v257_v40, %v259_v29  ;;  %v241_v43 = vsel %vm240_vm5, %v233_v41, %v235_v33  ;;  %v430_v48 = vld [vmem:[#allocation4 + $0x8] sm:$0xff]  ;;  %v428_v41 = vld [vmem:[%s427_s16] sm:$0xf] }
  0xa1   : >> { %271 = vst [vmem:[#allocation4] sm:$0xf0] %v265_v42  ;;  %247 = vst [vmem:[#allocation4] sm:$0xf] %v241_v43 }
  0xa3   : >> { %v305_v44 = vpop.permute.xlu1 %304  ;;  %v281_v45 = vpop.permute.xlu0 %280 }
  0xa4   : >> { %v313_v46 = vsel %vm312_vm6, %v305_v44, %v307_v30  ;;  %v289_v47 = vsel %vm288_vm7, %v281_v45, %v283_v37  ;;  %v433_v49 = vld [vmem:[#allocation4 + $0x20] sm:$0xff]  ;;  %v615_v44 = vlaneseq }
  0xa5   : >> { %319 = vst [vmem:[#allocation4 + $0x18] sm:$0xf0] %v313_v46  ;;  %295 = vst [vmem:[#allocation4 + $0x18] sm:$0xf] %v289_v47  ;;  %v736_v50 = vpack.c.bf16 %v433_v49, %v430_v48 }
  0xa6   : >> { %v616_v45 = vshrl.u32 %v615_v44, 7 }
  0xa7   : >> { %v263_v51 = vpop.permute.xlu1 %262  ;;  %737 = vmatprep.subr.bf16.mxu0 %v736_v50  ;;  %v239_v52 = vpop.permute.xlu0 %238 }
  0xa8   : >> { %v267_v53 = vsel %vm264_vm4, %v261_v32, %v263_v51  ;;  %v243_v54 = vsel %vm240_vm5, %v237_v28, %v239_v52  ;;  %v429_v59 = vld [vmem:[#allocation4] sm:$0xff]  ;;  %v617_v46 = vsub.s32 0, %v616_v45  ;;  %v621_v47 = vsub.s32 1, %v616_v45 }
  0xa9   : >> { %273 = vst [vmem:[#allocation4 + $0x10] sm:$0xf0] %v267_v53  ;;  %249 = vst [vmem:[#allocation4 + $0x10] sm:$0xf] %v243_v54  ;;  %v625_v48 = vsub.s32 2, %v616_v45 }
  0xaa   : >> { %v618_v50 = vrot.slane %v850_v0, %v617_v46  ;;  %v622_v51 = vrot.slane %v850_v0, %v621_v47  ;;  %v607_v53 = vld [vmem:[#allocation2 + $0xc] sm:$0xf] }
  0xab   : >> { %v311_v55 = vpop.permute.xlu1 %310  ;;  %v287_v56 = vpop.permute.xlu0 %286 }
  0xac   : >> { %v315_v57 = vsel %vm312_vm6, %v309_v36, %v311_v55  ;;  %v291_v58 = vsel %vm288_vm7, %v285_v31, %v287_v56  ;;  %v432_v60 = vld [vmem:[#allocation4 + $0x18] sm:$0xff] }
  0xad   : >> { %321 = vst [vmem:[#allocation4 + $0x28] sm:$0xf0] %v315_v57  ;;  %297 = vst [vmem:[#allocation4 + $0x28] sm:$0xf] %v291_v58  ;;  %v738_v61 = vpack.c.bf16 %v432_v60, %v429_v59  ;;  %v626_v57 = vrot.slane %v850_v0, %v625_v48  ;;  %v606_v60 = vld [vmem:[#allocation2 + $0x4] sm:$0xff] }
  0xaf   : >> { %v341_v62 = vpop.permute.xlu1 %340  ;;  %739 = vmatpush1.bf16.msra.mxu0 %v738_v61  ;;  %v339_v63 = vpop.permute.xlu0 %338 }
  0xb0   : >> { %v346_v1 = vsel %vm344_vm8, %v339_v63, %v341_v62  ;;  %v431_v5 = vld [vmem:[#allocation4 + $0x10] sm:$0xff] }
  0xb1   : >> { %352 = vst [vmem:[#allocation4 + $0x38] sm:$0xf0] %v346_v1 }
  0xb3   : >> { %v365_v2 = vpop.permute.xlu1 %364  ;;  %v363_v3 = vpop.permute.xlu0 %362 }
  0xb4   : >> { %v370_v4 = vsel %vm368_vm9, %v363_v3, %v365_v2  ;;  %v434_v6 = vld [vmem:[#allocation4 + $0x28] sm:$0xff] }
  0xb5   : >> { %376 = vst [vmem:[#allocation4 + $0x50] sm:$0xf] %v370_v4  ;;  %v745_v7 = vpack.c.bf16 %v434_v6, %v431_v5 }
  0xb7   : >> { %v389_v8 = vpop.permute.xlu1 %388  ;;  %746 = vmatpush3.bf16.msra.mxu1 %v745_v7  ;;  %v387_v9 = vpop.permute.xlu0 %386 }
  0xb8   : >> { %v394_v10 = vsel %vm392_vm10, %v387_v9, %v389_v8  ;;  %747 = vmatprep.subr.bf16.mxu1 %v806_v20  ;;  %v436_v19 = vld [vmem:[#allocation4 + $0x38] sm:$0xff] }
  0xb9   : >> { %400 = vst [vmem:[#allocation4 + $0x50] sm:$0xf0] %v394_v10 }
  0xbb   : >> { %v361_v11 = vpop.permute.xlu1 %360  ;;  %v337_v12 = vpop.permute.xlu0 %336 }
  0xbc   : >> { %v369_v13 = vsel %vm368_vm9, %v361_v11, %v363_v3  ;;  %v345_v14 = vsel %vm344_vm8, %v337_v12, %v339_v63  ;;  %v628_v63 = vcombine.low %v618_v50, %v622_v51 }
  0xbd   : >> { %375 = vst [vmem:[#allocation4 + $0x48] sm:$0xf] %v369_v13  ;;  %351 = vst [vmem:[#allocation4 + $0x30] sm:$0xf0] %v345_v14 }
  0xbf   : >> { %v343_v15 = vpop.permute.xlu1 %342  ;;  %v385_v16 = vpop.permute.xlu0 %384 }
  0xc0   : >> { %v347_v17 = vsel %vm344_vm8, %v341_v62, %v343_v15  ;;  %v393_v18 = vsel %vm392_vm10, %v385_v16, %v387_v9  ;;  %v439_v21 = vld [vmem:[#allocation4 + $0x50] sm:$0xff] }
  0xc1   : >> { %353 = vst [vmem:[#allocation4 + $0x40] sm:$0xf0] %v347_v17  ;;  %399 = vst [vmem:[#allocation4 + $0x48] sm:$0xf0] %v393_v18  ;;  %v740_v20 = vpack.c.bf16 %v439_v21, %v436_v19 }
  0xc3   : >> { %v391_v22 = vpop.permute.xlu1 %390  ;;  %741 = vmatprep.subr.bf16.mxu0 %v740_v20  ;;  %v367_v23 = vpop.permute.xlu0 %366 }
  0xc4   : >> { %v395_v24 = vsel %vm392_vm10, %v389_v8, %v391_v22  ;;  %v371_v26 = vsel %vm368_vm9, %v365_v2, %v367_v23  ;;  %v435_v30 = vld [vmem:[#allocation4 + $0x30] sm:$0xff] }
  0xc5   : >> { %401 = vst [vmem:[#allocation4 + $0x58] sm:$0xf0] %v395_v24  ;;  %377 = vst [vmem:[#allocation4 + $0x58] sm:$0xf] %v371_v26 }
  0xc7   : >> { %v413_v27 = vpop.permute.xlu1 %412  ;;  %v411_v28 = vpop.permute.xlu0 %410 }
  0xc8   : >> { %v418_v29 = vsel %vm416_vm11, %v411_v28, %v413_v27  ;;  %v438_v31 = vld [vmem:[#allocation4 + $0x48] sm:$0xff]  ;;  %v437_v37 = vld [vmem:[#allocation4 + $0x40] sm:$0xff] }
  0xc9   : >> { %424 = vst [vmem:[#allocation4 + $0x68] sm:$0xf] %v418_v29  ;;  %v742_v32 = vpack.c.bf16 %v438_v31, %v435_v30 }
  0xcb   : >> { %v415_v33 = vpop.permute.xlu1 %414  ;;  %743 = vmatpush1.bf16.msra.mxu0 %v742_v32  ;;  %v409_v34 = vpop.permute.xlu0 %408 }
  0xcc   : >> { %v419_v35 = vsel %vm416_vm11, %v413_v27, %v415_v33  ;;  %v417_v36 = vsel %vm416_vm11, %v409_v34, %v411_v28  ;;  %v440_v38 = vld [vmem:[#allocation4 + $0x58] sm:$0xff] }
  0xcd   : >> { %425 = vst [vmem:[#allocation4 + $0x70] sm:$0xf] %v419_v35  ;;  %423 = vst [vmem:[#allocation4 + $0x60] sm:$0xf] %v417_v36  ;;  %v748_v39 = vpack.c.bf16 %v440_v38, %v437_v37 }
  0xcf   : >> { %749 = vmatpush3.bf16.msra.mxu1 %v748_v39 }
  0xd0   : >> { %v442_v40 = vld [vmem:[#allocation4 + $0x68] sm:$0xf]  ;;  %731 = vmatprep.subr.mxu1 %v810_v25 }
  0xd1   : >> { %710 = vmatprep.subr.msk.mxu0 %vm455_vm12, %v442_v40 }
  0xd4   : >> { %v441_v42 = vld [vmem:[#allocation4 + $0x60] sm:$0xf]  ;;  %v443_v43 = vld [vmem:[#allocation4 + $0x70] sm:$0xf] }
  0xd5   : >> { %711 = vmatpush1.msk.msra.mxu0 %vm455_vm12, %v441_v42  ;;  %732 = vmatpush3.msk.msra.mxu1 %vm455_vm12, %v443_v43 }
  0xd6   : >> { %712 = vmatmul.mubr.msk.f32.vlgmr.msra.gmra.mrb[0].mxu0 %vm451_vm13, %v428_v41  ;;  %734 = vmatmul.mubr.msk.f32.vlgmr.msra.gmra.mrb[0].mxu1 %vm451_vm13, %v428_v41 }
  0xdc   : >> { %v449_v25 = vpop.permute.xlu0 %448 }
 0x1a9   : >> { %v531_v49 = vpop.f32.mrb[0].mxu0  ;;  %v602_v52 = vpop.f32.mrb[0].mxu1 }
 0x1aa   : >> { %v532_v54 = vadd.f32 %v531_v49, %v449_v25  ;;  %v533_v55 = vpop.f32.mrb[1].mxu0  ;;  %v603_v56 = vadd.f32 %v602_v52, %v449_v25  ;;  %v735_v58 = vpop.f32.mrb[1].mxu1 }
 0x1ab   : >> { %v534_v59 = vadd.f32 %v533_v55, %v449_v25 }
 0x1ac   : >> { %v613_v61 = vadd.f32 %v607_v53, %v603_v56 }
 0x1ad   : >> { %v610_v62 = vcombine.low %v532_v54, %v534_v59  ;;  %209 = sbr.rel (!%p207_p4) target bundleno = 19 (0x13), region = 75 }
 0x1ae   : >> { %v631_v1 = vmul.f32 %v626_v57, %v613_v61 }
 0x1af   : >> { %v612_v2 = vadd.f32 %v610_v62, %v606_v60 }
 0x1b0   : >> { %633 = vst [vmem:[#allocation2 + $0xc] sm:$0xf] %v631_v1 }
 0x1b1   : >> { %v630_v3 = vmul.f32 %v628_v63, %v612_v2 }
 0x1b3   : >> { %632 = vst [vmem:[#allocation2 + $0x4] sm:$0xff] %v630_v3 }
 0x1b7   : > { %v635_v5 = vld [vmem:[#allocation2 + $0xc] sm:$0xf] }
 0x1b8   : > { %637 = vst [vmem:[%s858_s25 + $0x8] sm:$0xf] %v635_v5 }
 0x1ba   : > { %v634_v4 = vld [vmem:[#allocation2 + $0x4] sm:$0xff] }
 0x1bb   : > { %636 = vst [vmem:[%s858_s25] sm:$0xff] %v634_v4 }
 0x1bc PF: > { %s14_s15 = sadd.s32 1, %s795_s15  }
 0x1bd   : > { %p11_p5 = scmp.ge.s32.totalorder %s14_s15, 4  }
 0x1bf   :  { %13 = sbr.rel (!%p11_p5) target bundleno = 1 (0x1), region = 86 }

// kernel: spectral_unet_forward.13
= control target key start
LH: loop header
LB: loop body
LE: loop exit
PB: predicated region body
PF: predicated region fallthrough
CT: control target
= control target key end

     0   :  { %s826_s15 = smov 0   ;;  %s919_s0 = inlined_call_operand.vmem [shape: f32[2,3,384], index: 0, kind: input, shape index: {}]   ;;  %s920_s1 = inlined_call_operand.vmem [shape: f32[4,27], index: 1, kind: input, shape index: {}]   ;;  %s921_s2 = inlined_call_operand.vmem [shape: f32[4,1], index: 2, kind: input, shape index: {}]   ;;  %s922_s3 = inlined_call_operand.vmem [shape: f32[1,384], index: 3, kind: input, shape index: {}]   ;;  %s923_s4 = inlined_call_operand.vmem [shape: f32[2,4,384], index: 4, kind: output, shape index: {}]  }
   0x1 LB: > { %s692_s16 = sadd.s32 4294967295, %s786_s15   ;;  %p696_p0 = scmp.ge.s32.totalorder %s786_s15, 1  ;;  %s786_s15 = sphi %s826_s15, %s14_s15  }
   0x2   : > { %p162_p1 = scmp.lt.s32.totalorder %s786_s15, 3 }
   0x4   : > { %p163_p2 = pnand %p696_p0, %p162_p1 }
   0x5   : > { %p188_p3 = scmp.lt.s32.totalorder (!%p163_p2), %s692_s16, 1  ;;  %v788_v0 = vmov (!%p163_p2), 0.0   ;;  %s789_s21 = smov (!%p163_p2), 19   ;;  %v794_v46 = vmov (!%p163_p2), 0.0|0.0   ;;  %vm798_vm0 = vmmov (!%p163_p2), 0   ;;  %vm218_vm1 = vcmask (!%p163_p2), 154624  }
   0x6   : > { %166 = sbr.rel (%p163_p2) target bundleno = 435 (0x1b3), region = 36  ;;  %198 = vst [vmem:[#allocation2] sm:$0x7] (!%p163_p2), %v788_v0  ;;  %199 = vst [vmem:[#allocation2 + $0x10] sm:$0x7] (!%p163_p2), %v788_v0  ;;  %534 = vmatprep.mubr.f32.mxu0 (!%p163_p2), %v788_v0  ;;  %s790_s22 = smov (!%p163_p2), 18   ;;  %732 = vmatprep.subr.bf16.mxu1 (!%p163_p2), %v794_v46 }
   0x7   : > { %s791_s23 = smov (!%p163_p2), 17   ;;  %s792_s24 = smov (!%p163_p2), 1   ;;  %719 = vmatprep.mubr.msk.f32.mxu1 (!%p163_p2), %vm798_vm0, %v788_v0  ;;  %v450_v63 = vld [vmem:[%s921_s2] sm:$0xf] (!%p163_p2)  ;;  %vm274_vm2 = vcmask (!%p163_p2), 138240   ;;  %vm305_vm3 = vcmask (!%p163_p2), 7168  }
   0x8   : > { %s793_s25 = smov (!%p163_p2), 127   ;;  %s795_s26 = smov (!%p163_p2), 111   ;;  %vm344_vm4 = vcmask (!%p163_p2), 1039360   ;;  %vm246_vm5 = vcmask (!%p163_p2), 146432   ;;  %vm375_vm6 = vcmask (!%p163_p2), 908288   ;;  %vm403_vm7 = vcmask (!%p163_p2), 900096  }
   0x9   : > { %s796_s27 = smov (!%p163_p2), 110   ;;  %s797_s28 = smov (!%p163_p2), 109   ;;  %vm427_vm8 = vcmask (!%p163_p2), 891904   ;;  %vm460_vm9 = vcmask (!%p163_p2), 1042432   ;;  %vm800_vm10 = vmmov (!%p163_p2), 1   ;;  %vm456_vm12 = vcmask (!%p163_p2), 220160  }
   0xa   : > { %vm893_vm11 = vmpackc.low (!%p163_p2), %vm460_vm9, %vm800_vm10 }
   0xd   : > { %s927_s16 = smov (!%p188_p3, %s692_s16), 1 }
   0xe   : > { %s739_s17 = smul.u32 12, %s927_s16 }
  0x10   : > { %s192_s20 = scalar_lea.vmem %s919_s0, %s739_s17  ;;  %s197_s11 = scalar_lea.vmem %s923_s4, %s739_s17 }
  0x11   : > { %v200_v1 = vld [vmem:[%s192_s20] sm:$0x77]  ;;  %v201_v2 = vld [vmem:[%s192_s20 + $0x8] sm:$0x7] }
  0x12   : > { %202 = vst [vmem:[#allocation2 + $0x4] sm:$0x77] %v200_v1  ;;  %203 = vst [vmem:[#allocation2 + $0xc] sm:$0x7] %v201_v2  ;;  %v799_v1 = vmov 0  }
  0x13   : > { %761 = vset.pattern.permute.xlu0 %v799_v1 }
  0x19   : > { %v205_v3 = vld [vmem:[#allocation2 + $0x8] sm:$0x77]  ;;  %v204_v7 = vld [vmem:[#allocation2] sm:$0x77] }
  0x1a   : > { %v229_v4 = vld [vmem:[#allocation2 + $0x8] sm:$0x77]  ;;  %214 = vrot.lane.b32.xlu0 %v205_v3, %s789_s21  ;;  %v256_v8 = vld [vmem:[#allocation2] sm:$0x77]  ;;  %v208_v11 = vcombine.high %v204_v7, %v204_v7  ;;  %v209_v34 = vcombine.high %v205_v3, %v205_v3 }
  0x1b   : > { %v236_v5 = vrot.slane %v229_v4, 5  ;;  %v257_v6 = vld [vmem:[#allocation2 + $0x8] sm:$0x77]  ;;  %v260_v12 = vcombine.high %v256_v8, %v256_v8  ;;  %v287_v13 = vld [vmem:[#allocation2] sm:$0x77]  ;;  %v262_v29 = vrot.slane %v256_v8, 2  ;;  %v233_v31 = vcombine.high %v229_v4, %v229_v4 }
  0x1c   : > { %v264_v9 = vrot.slane %v257_v6, 2  ;;  %v288_v10 = vld [vmem:[#allocation2 + $0x8] sm:$0x77]  ;;  %v291_v17 = vcombine.high %v287_v13, %v287_v13  ;;  %v228_v21 = vld [vmem:[#allocation2] sm:$0x77]  ;;  %v293_v30 = vrot.slane %v287_v13, 7  ;;  %v261_v35 = vcombine.high %v257_v6, %v257_v6 }
  0x1d   : > { %242 = vrot.lane.b32.xlu1 %v236_v5, %s790_s22  ;;  %v295_v14 = vrot.slane %v288_v10, 7  ;;  %v327_v15 = vld [vmem:[#allocation2 + $0xc] sm:$0x77]  ;;  %v263_v16 = vrot.slane %v260_v12, 2  ;;  %v315_v18 = vld [vmem:[#allocation2 + $0x4] sm:$0x77]  ;;  %v232_v25 = vcombine.high %v228_v21, %v228_v21  ;;  %v292_v37 = vcombine.high %v288_v10, %v288_v10 }
  0x1e   : > { %210 = vrot.lane.b32.xlu0 %v204_v7, %s789_s21  ;;  %v326_v19 = vld [vmem:[#allocation2 + $0x4] sm:$0x77]  ;;  %324 = vst [vmem:[#allocation3 + $0x20] sm:$0x70] %v315_v18  ;;  %v334_v20 = vrot.slane %v327_v15, 1  ;;  %v294_v22 = vrot.slane %v291_v17, 7  ;;  %v319_v26 = vcombine.low %v315_v18, %v315_v18  ;;  %v331_v40 = vcombine.high %v327_v15, %v327_v15 }
  0x1f   : > { %v330_v23 = vcombine.high %v326_v19, %v326_v19  ;;  %v234_v24 = vrot.slane %v228_v21, 5  ;;  %v235_v28 = vrot.slane %v232_v25, 5  ;;  %v332_v32 = vrot.slane %v326_v19, 1  ;;  %v779_v33 = vld [vmem:[#allocation2 + $0xc] ss:$0 sps:$4 sm:$0x77]  }
  0x20   : > { %323 = vst [vmem:[#allocation3 + $0x18] sm:$0x70] %v319_v26  ;;  %325 = vst [vmem:[#allocation3 + $0x28] sm:$0x70] %v779_v33  ;;  %v237_v36 = vrot.slane %v233_v31, 5  ;;  %v265_v39 = vrot.slane %v261_v35, 2 }
  0x21   : > { %270 = vrot.lane.b32.xlu1 %v264_v9, %s791_s23  ;;  %v333_v27 = vrot.slane %v330_v23, 1  ;;  %v357_v38 = vld [vmem:[#allocation2 + $0x4] sm:$0x77]  ;;  %v296_v41 = vrot.slane %v292_v37, 7  ;;  %v335_v44 = vrot.slane %v331_v40, 1 }
  0x22   : > { %212 = vrot.lane.b32.xlu0 %v208_v11, %s789_s21  ;;  %v361_v42 = vcombine.high %v357_v38, %v357_v38  ;;  %v385_v43 = vld [vmem:[#allocation2 + $0x4] sm:$0x77]  ;;  %v358_v45 = vld [vmem:[#allocation2 + $0xc] sm:$0x77]  ;;  %v363_v56 = vrot.slane %v357_v38, 6 }
  0x23   : > { %v389_v48 = vcombine.high %v385_v43, %v385_v43  ;;  %v365_v49 = vrot.slane %v358_v45, 6  ;;  %v386_v50 = vld [vmem:[#allocation2 + $0xc] sm:$0x77]  ;;  %v413_v52 = vld [vmem:[#allocation2 + $0x4] sm:$0x77]  ;;  %v391_v57 = vrot.slane %v385_v43, 3  ;;  %v362_v58 = vcombine.high %v358_v45, %v358_v45 }
  0x24   : > { %v364_v47 = vrot.slane %v361_v42, 6  ;;  %v393_v53 = vrot.slane %v386_v50, 3  ;;  %v417_v54 = vcombine.high %v413_v52, %v413_v52  ;;  %v414_v55 = vld [vmem:[#allocation2 + $0xc] sm:$0x77]  ;;  %v390_v59 = vcombine.high %v386_v50, %v386_v50 }
  0x25   : > { %301 = vrot.lane.b32.xlu1 %v295_v14, %s792_s24  ;;  %v392_v51 = vrot.slane %v389_v48, 3  ;;  %v366_v60 = vrot.slane %v362_v58, 6  ;;  %v418_v62 = vcombine.high %v414_v55, %v414_v55 }
  0x26   : > { %268 = vrot.lane.b32.xlu0 %v263_v16, %s791_s23  ;;  %v394_v61 = vrot.slane %v390_v59, 3 }
  0x29   : > { %340 = vrot.lane.b32.xlu1 %v334_v20, %s793_s25 }
  0x2a   : > { %299 = vrot.lane.b32.xlu0 %v294_v22, %s792_s24 }
  0x2d   : > { %238 = vrot.lane.b32.xlu1 %v234_v24, %s790_s22 }
  0x2e   : > { %338 = vrot.lane.b32.xlu0 %v333_v27, %s793_s25 }
  0x31   : > { %240 = vrot.lane.b32.xlu1 %v235_v28, %s790_s22 }
  0x32   : > { %266 = vrot.lane.b32.xlu0 %v262_v29, %s791_s23 }
  0x35   : > { %297 = vrot.lane.b32.xlu1 %v293_v30, %s792_s24 }
  0x36   : > { %336 = vrot.lane.b32.xlu0 %v332_v32, %s793_s25 }
  0x39   : > { %216 = vrot.lane.b32.xlu1 %v209_v34, %s789_s21 }
  0x3a   : > { %244 = vrot.lane.b32.xlu0 %v237_v36, %s790_s22 }
  0x3d   : > { %272 = vrot.lane.b32.xlu1 %v265_v39, %s791_s23 }
  0x3e   : > { %303 = vrot.lane.b32.xlu0 %v296_v41, %s792_s24 }
  0x41   : > { %342 = vrot.lane.b32.xlu1 %v335_v44, %s793_s25 }
  0x42   : > { %369 = vrot.lane.b32.xlu0 %v364_v47, %s795_s26 }
  0x45   : > { %371 = vrot.lane.b32.xlu1 %v365_v49, %s795_s26 }
  0x46   : > { %397 = vrot.lane.b32.xlu0 %v392_v51, %s796_s27 }
  0x49   : > { %399 = vrot.lane.b32.xlu1 %v393_v53, %s796_s27 }
  0x4a   : > { %421 = vrot.lane.b32.xlu0 %v417_v54, %s797_s28 }
  0x4d   : > { %423 = vrot.lane.b32.xlu1 %v414_v55, %s797_s28 }
  0x4e   : > { %367 = vrot.lane.b32.xlu0 %v363_v56, %s795_s26 }
  0x51   : > { %395 = vrot.lane.b32.xlu1 %v391_v57, %s796_s27 }
  0x52   : > { %419 = vrot.lane.b32.xlu0 %v413_v52, %s797_s28 }
  0x55   : > { %373 = vrot.lane.b32.xlu1 %v366_v60, %s795_s26 }
  0x56   : > { %401 = vrot.lane.b32.xlu0 %v394_v61, %s796_s27 }
  0x59   : > { %425 = vrot.lane.b32.xlu1 %v418_v62, %s797_s28 }
  0x5a   : > { %453 = vperm.xlu0 %761, %v450_v63  }
  0x8c   : > { %v215_v2 = vpop.permute.xlu0 %214 }
  0x8f   : > { %v243_v3 = vpop.permute.xlu1 %242 }
  0x90   : > { %v211_v4 = vpop.permute.xlu0 %210 }
  0x93   : > { %v271_v5 = vpop.permute.xlu1 %270 }
  0x94   : > { %v213_v6 = vpop.permute.xlu0 %212 }
  0x95   : > { %v219_v7 = vsel %vm218_vm1, %v211_v4, %v213_v6  ;;  %v220_v8 = vsel %vm218_vm1, %v213_v6, %v215_v2 }
  0x96   : > { %225 = vst [vmem:[#allocation3] sm:$0x7] %v219_v7  ;;  %226 = vst [vmem:[#allocation3 + $0x8] sm:$0x7] %v220_v8 }
  0x97   : > { %v302_v0 = vpop.permute.xlu1 %301 }
  0x98   : > { %v269_v9 = vpop.permute.xlu0 %268 }
  0x99   : > { %v276_v10 = vsel %vm274_vm2, %v269_v9, %v271_v5 }
  0x9a   : > { %282 = vst [vmem:[#allocation3 + $0x20] ss:$-20 sps:$4 sm:$0xc1] %v276_v10  }
  0x9b   : > { %v341_v11 = vpop.permute.xlu1 %340 }
  0x9c   : > { %v300_v12 = vpop.permute.xlu0 %299 }
  0x9d   : > { %v307_v13 = vsel %vm305_vm3, %v300_v12, %v302_v0 }
  0x9e   : > { %313 = vst [vmem:[#allocation3 + $0x20] sm:$0xe] %v307_v13  ;;  %v613_v13 = vlaneseq }
  0x9f   : > { %v239_v14 = vpop.permute.xlu1 %238 }
  0xa0   : > { %v339_v15 = vpop.permute.xlu0 %338 }
  0xa1   : > { %v346_v16 = vsel %vm344_vm4, %v339_v15, %v341_v11 }
  0xa2   : > { %352 = vst [vmem:[#allocation3 + $0x38] ss:$-20 sps:$4 sm:$0x83] %v346_v16   ;;  %v611_v16 = vld [vmem:[%s922_s3] sm:$0x7] }
  0xa3   : > { %v241_v17 = vpop.permute.xlu1 %240 }
  0xa4   : > { %v247_v18 = vsel %vm246_vm5, %v239_v14, %v241_v17  ;;  %v248_v19 = vsel %vm246_vm5, %v241_v17, %v243_v3  ;;  %v267_v20 = vpop.permute.xlu0 %266  ;;  %v614_v14 = vshrl.u32 %v613_v13, 7 }
  0xa5   : > { %253 = vst [vmem:[#allocation3] sm:$0x38] %v247_v18  ;;  %254 = vst [vmem:[#allocation3 + $0x8] sm:$0x38] %v248_v19  ;;  %v275_v21 = vsel %vm274_vm2, %v267_v20, %v269_v9  ;;  %v437_v9 = vld [vmem:[%s920_s1] sm:$0xf] }
  0xa6   : > { %281 = vst [vmem:[#allocation3 + $0x18] ss:$-20 sps:$4 sm:$0xc1] %v275_v21   ;;  %v619_v17 = vsub.s32 1, %v614_v14 }
  0xa7   : > { %v298_v22 = vpop.permute.xlu1 %297 }
  0xa8   : > { %v306_v23 = vsel %vm305_vm3, %v298_v22, %v300_v12  ;;  %v337_v24 = vpop.permute.xlu0 %336  ;;  %v620_v21 = vrot.slane %v611_v16, %v619_v17 }
  0xa9   : > { %312 = vst [vmem:[#allocation3 + $0x18] sm:$0xe] %v306_v23  ;;  %v345_v25 = vsel %vm344_vm4, %v337_v24, %v339_v15  ;;  %v442_v29 = vld [vmem:[#allocation3 + $0x20] sm:$0xff]  ;;  %v615_v15 = vsub.s32 0, %v614_v14  ;;  %v623_v24 = vsub.s32 2, %v614_v14 }
  0xaa   : > { %351 = vst [vmem:[#allocation3 + $0x30] ss:$-20 sps:$4 sm:$0x83] %v345_v25  }
  0xab   : > { %v217_v26 = vpop.permute.xlu1 %216  ;;  %v616_v19 = vrot.slane %v611_v16, %v615_v15 }
  0xac   : > { %v221_v27 = vsel %vm218_vm1, %v215_v2, %v217_v26  ;;  %v439_v28 = vld [vmem:[#allocation3 + $0x8] sm:$0xff]  ;;  %v245_v30 = vpop.permute.xlu0 %244 }
  0xad   : > { %227 = vst [vmem:[#allocation3 + $0x10] sm:$0x7] %v221_v27  ;;  %v722_v31 = vpack.c.bf16 %v442_v29, %v439_v28  ;;  %v249_v32 = vsel %vm246_vm5, %v243_v3, %v245_v30  ;;  %v438_v37 = vld [vmem:[#allocation3] sm:$0xff]  ;;  %v624_v28 = vrot.slane %v611_v16, %v623_v24 }
  0xae   : > { %255 = vst [vmem:[#allocation3 + $0x10] sm:$0x38] %v249_v32 }
  0xaf   : > { %v273_v33 = vpop.permute.xlu1 %272  ;;  %723 = vmatprep.subr.bf16.mxu0 %v722_v31 }
  0xb0   : > { %v277_v34 = vsel %vm274_vm2, %v271_v5, %v273_v33  ;;  %v304_v35 = vpop.permute.xlu0 %303 }
  0xb1   : > { %283 = vst [vmem:[#allocation3 + $0x28] ss:$-20 sps:$4 sm:$0xc1] %v277_v34   ;;  %v308_v36 = vsel %vm305_vm3, %v302_v0, %v304_v35  ;;  %v441_v38 = vld [vmem:[#allocation3 + $0x18] sm:$0xff] }
  0xb2   : > { %314 = vst [vmem:[#allocation3 + $0x28] sm:$0xe] %v308_v36  ;;  %v724_v40 = vpack.c.bf16 %v441_v38, %v438_v37 }
  0xb3   : > { %v343_v39 = vpop.permute.xlu1 %342 }
  0xb4   : > { %v347_v41 = vsel %vm344_vm4, %v341_v11, %v343_v39  ;;  %725 = vmatpush1.bf16.msra.mxu0 %v724_v40  ;;  %v370_v42 = vpop.permute.xlu0 %369 }
  0xb5   : > { %353 = vst [vmem:[#allocation3 + $0x40] ss:$-20 sps:$4 sm:$0x83] %v347_v41  }
  0xb7   : > { %v372_v43 = vpop.permute.xlu1 %371 }
  0xb8   : > { %v377_v44 = vsel %vm375_vm6, %v370_v42, %v372_v43  ;;  %v398_v45 = vpop.permute.xlu0 %397  ;;  %v440_v49 = vld [vmem:[#allocation3 + $0x10] sm:$0xff] }
  0xb9   : > { %383 = vst [vmem:[#allocation3 + $0x38] sm:$0x1c] %v377_v44 }
  0xbb   : > { %v400_v47 = vpop.permute.xlu1 %399 }
  0xbc   : > { %v405_v48 = vsel %vm403_vm7, %v398_v45, %v400_v47  ;;  %v443_v50 = vld [vmem:[#allocation3 + $0x28] sm:$0xff]  ;;  %v422_v51 = vpop.permute.xlu0 %421 }
  0xbd   : > { %411 = vst [vmem:[#allocation3 + $0x38] sm:$0xe0] %v405_v48  ;;  %v733_v52 = vpack.c.bf16 %v443_v50, %v440_v49 }
  0xbf   : > { %v424_v53 = vpop.permute.xlu1 %423  ;;  %734 = vmatpush3.bf16.msra.mxu1 %v733_v52 }
  0xc0   : > { %v429_v54 = vsel %vm427_vm8, %v422_v51, %v424_v53  ;;  %735 = vmatprep.subr.bf16.mxu1 %v794_v46  ;;  %v368_v55 = vpop.permute.xlu0 %367 }
  0xc1   : > { %435 = vst [vmem:[#allocation3 + $0x50] sm:$0x7] %v429_v54  ;;  %v376_v56 = vsel %vm375_vm6, %v368_v55, %v370_v42 }
  0xc2   : > { %382 = vst [vmem:[#allocation3 + $0x30] sm:$0x1c] %v376_v56 }
  0xc3   : > { %v396_v57 = vpop.permute.xlu1 %395 }
  0xc4   : > { %v404_v58 = vsel %vm403_vm7, %v396_v57, %v398_v45  ;;  %v420_v59 = vpop.permute.xlu0 %419  ;;  %v445_v63 = vld [vmem:[#allocation3 + $0x38] sm:$0xff] }
  0xc5   : > { %410 = vst [vmem:[#allocation3 + $0x30] sm:$0xe0] %v404_v58  ;;  %v428_v60 = vsel %vm427_vm8, %v420_v59, %v422_v51 }
  0xc6   : > { %434 = vst [vmem:[#allocation3 + $0x48] sm:$0x7] %v428_v60 }
  0xc7   : > { %v374_v61 = vpop.permute.xlu1 %373 }
  0xc8   : > { %v378_v62 = vsel %vm375_vm6, %v372_v43, %v374_v61  ;;  %v448_v1 = vld [vmem:[#allocation3 + $0x50] sm:$0x7]  ;;  %v402_v2 = vpop.permute.xlu0 %401 }
  0xc9   : > { %384 = vst [vmem:[#allocation3 + $0x40] sm:$0x1c] %v378_v62  ;;  %v726_v3 = vpack.c.bf16 %v448_v1, %v445_v63  ;;  %v406_v4 = vsel %vm403_vm7, %v400_v47, %v402_v2 }
  0xca   : > { %412 = vst [vmem:[#allocation3 + $0x40] sm:$0xe0] %v406_v4 }
  0xcb   : > { %v426_v5 = vpop.permute.xlu1 %425  ;;  %728 = vmatprep.subr.msk.bf16.mxu0 %vm893_vm11, %v726_v3 }
  0xcc   : > { %v430_v6 = vsel %vm427_vm8, %v424_v53, %v426_v5  ;;  %v444_v7 = vld [vmem:[#allocation3 + $0x30] sm:$0xff] }
  0xcd   : > { %436 = vst [vmem:[#allocation3 + $0x58] sm:$0x7] %v430_v6  ;;  %v447_v8 = vld [vmem:[#allocation3 + $0x48] sm:$0x7] }
  0xce   : > { %v729_v0 = vpack.c.bf16 %v447_v8, %v444_v7 }
  0xd0   : > { %731 = vmatpush1.bf16.msk.msra.mxu0 %vm893_vm11, %v729_v0 }
  0xd1   : > { %v446_v10 = vld [vmem:[#allocation3 + $0x40] sm:$0xff] }
  0xd3   : > { %701 = vmatmul.mubr.msk.f32.vlgmr.msra.gmra.mrb[0].mxu0 %vm456_vm12, %v437_v9 }
  0xd4   : > { %v449_v11 = vld [vmem:[#allocation3 + $0x58] sm:$0x7] }
  0xd5   : > { %v736_v12 = vpack.c.bf16 %v449_v11, %v446_v10 }
  0xd7   : > { %738 = vmatpush3.bf16.msk.msra.mxu1 %vm893_vm11, %v736_v12 }
  0xd9   : > { %v454_v18 = vpop.permute.xlu0 %453 }
  0xda   : > { %720 = vmatmul.mubr.msk.f32.vlgmr.msra.gmra.mrb[0].mxu1 %vm456_vm12, %v437_v9 }
 0x1a6   : > { %v536_v20 = vpop.f32.mrb[0].mxu0 }
 0x1a7   : > { %v538_v22 = vpop.f32.mrb[1].mxu0  ;;  %v537_v23 = vadd.f32 %v536_v20, %v454_v18 }
 0x1a8   : > { %v539_v25 = vadd.f32 %v538_v22, %v454_v18 }
 0x1a9   : > { %v628_v26 = vmul.f32 %v616_v19, %v537_v23 }
 0x1aa   : > { %v629_v27 = vmul.f32 %v620_v21, %v539_v25 }
 0x1ac   : > { %v633_v29 = vcombine.low %v628_v26, %v629_v27 }
 0x1ad   : > { %v607_v30 = vpop.f32.mrb[0].mxu1 }
 0x1ae   : > { %v608_v31 = vadd.f32 %v607_v30, %v454_v18  ;;  %v721_v32 = vpop.f32.mrb[1].mxu1  ;;  %635 = vst [vmem:[%s197_s11] sm:$0xff] %v633_v29 }
 0x1b0   : > { %v630_v33 = vmul.f32 %v624_v28, %v608_v31 }
 0x1b2   : > { %636 = vst [vmem:[%s197_s11 + $0x8] sm:$0xf] %v630_v33 }
 0x1b3 PF: > { %s14_s15 = sadd.s32 1, %s786_s15  }
 0x1b4   : > { %p11_p4 = scmp.ge.s32.totalorder %s14_s15, 4  }
 0x1b6   :  { %13 = sbr.rel (!%p11_p4) target bundleno = 1 (0x1), region = 66 }

// kernel: spectral_unet_forward.15
= control target key start
LH: loop header
LB: loop body
LE: loop exit
PB: predicated region body
PF: predicated region fallthrough
CT: control target
= control target key end

     0   :  { %s417_s15 = smov 0   ;;  %s443_s0 = inlined_call_operand.vmem [shape: f32[2,16,128], index: 0, kind: input, shape index: {}]   ;;  %s444_s1 = inlined_call_operand.vmem [shape: f32[8,16], index: 1, kind: input, shape index: {}]   ;;  %s445_s2 = inlined_call_operand.vmem [shape: f32[8,1], index: 2, kind: input, shape index: {}]   ;;  %s446_s3 = inlined_call_operand.vmem [shape: f32[1,128], index: 3, kind: input, shape index: {}]   ;;  %s447_s4 = inlined_call_operand.vmem [shape: f32[2,8,128], index: 4, kind: output, shape index: {}]  }
   0x1 LB: > { %s341_s16 = sadd.s32 4294967295, %s386_s15   ;;  %p345_p0 = scmp.ge.s32.totalorder %s386_s15, 1  ;;  %s386_s15 = sphi %s417_s15, %s14_s15  }
   0x2   : > { %p162_p1 = scmp.lt.s32.totalorder %s386_s15, 3 }
   0x4   : > { %p163_p2 = pnand %p345_p0, %p162_p1 }
   0x5   : > { %p187_p3 = scmp.lt.s32.totalorder (!%p163_p2), %s341_s16, 1  ;;  %v388_v0 = vmov (!%p163_p2), 0.0|0.0   ;;  %vm389_vm0 = vmmov (!%p163_p2), 0   ;;  %v390_v1 = vmov (!%p163_p2), 0.0   ;;  %v199_v2 = vld [vmem:[%s445_s2] sm:$0xff] (!%p163_p2)  ;;  %v391_v3 = vmov (!%p163_p2), 0  }
   0x6   : > { %166 = sbr.rel (%p163_p2) target bundleno = 239 (0xef), region = 36  ;;  %364 = vmatprep.subr.bf16.mxu0 (!%p163_p2), %v388_v0  ;;  %361 = vmatprep.mubr.msk.f32.mxu0 (!%p163_p2), %vm389_vm0, %v390_v1  ;;  %v196_v7 = vld [vmem:[%s444_s1] sm:$0xff] (!%p163_p2)  ;;  %vm205_vm1 = vcmask (!%p163_p2), 130048  }
   0x7   : > { %379 = vset.pattern.permute.xlu0 (!%p163_p2), %v391_v3  ;;  %v350_v10 = vld [vmem:[%s446_s3] ss:$0 sm:$0xff] (!%p163_p2) }
   0x8   : > { %202 = vperm.xlu0 (!%p163_p2), %379, %v199_v2  }
   0xd   : > { %s449_s16 = smov (!%p187_p3, %s341_s16), 1 }
   0xe   : > { %s353_s19 = sshll.u32 %s449_s16, 4  ;;  %s348_s25 = sshll.u32 %s449_s16, 3 }
   0xf   : > { %s191_s22 = scalar_lea.vmem %s443_s0, %s353_s19  ;;  %s195_s30 = scalar_lea.vmem %s447_s4, %s348_s25 }
  0x10   : > { %v197_v4 = vld [vmem:[%s191_s22] sm:$0xff]  ;;  %v198_v5 = vld [vmem:[%s191_s22 + $0x8] sm:$0xff] }
  0x11   : > { %v365_v6 = vpack.c.bf16 %v198_v5, %v197_v4 }
  0x13   : > { %366 = vmatpush3.bf16.msra.mxu0 %v365_v6 }
  0x16   : > { %362 = vmatmul.mubr.msk.f32.vlgmr.msra.gmra.mrb[0].mxu0 %vm205_vm1, %v196_v7 }
  0x87   : > { %v203_v8 = vpop.permute.xlu0 %202 }
  0xe9   : > { %v275_v9 = vpop.f32.mrb[0].mxu0 }
  0xea   : > { %v276_v11 = vadd.f32 %v275_v9, %v203_v8  ;;  %v363_v12 = vpop.f32.mrb[1].mxu0 }
  0xec   : > { %v286_v13 = vmul.f32 %v350_v10, %v276_v11 }
  0xee   : > { %287 = vst [vmem:[%s195_s30] sm:$0xff] %v286_v13 }
  0xef PF: > { %s14_s15 = sadd.s32 1, %s386_s15  }
  0xf0   : > { %p11_p4 = scmp.ge.s32.totalorder %s14_s15, 4  }
  0xf2   :  { %13 = sbr.rel (!%p11_p4) target bundleno = 1 (0x1), region = 66 }

// kernel: spectral_unet_forward.16
= control target key start
LH: loop header
LB: loop body
LE: loop exit
PB: predicated region body
PF: predicated region fallthrough
CT: control target
= control target key end

     0   :  { %s659_s15 = smov 0   ;;  %s720_s0 = inlined_call_operand.vmem [shape: f32[2,8,128], index: 0, kind: input, shape index: {}]   ;;  %s721_s1 = inlined_call_operand.vmem [shape: f32[2,8,72], index: 1, kind: input, shape index: {}]   ;;  %s722_s2 = inlined_call_operand.vmem [shape: f32[2,8,1], index: 2, kind: input, shape index: {}]   ;;  %s723_s3 = inlined_call_operand.vmem [shape: f32[1,128], index: 3, kind: input, shape index: {}]   ;;  %s724_s4 = inlined_call_operand.vmem [shape: f32[2,8,128], index: 4, kind: output, shape index: {}]  }
   0x1 LB: > { %s484_s16 = sadd.s32 4294967295, %s615_s15   ;;  %p488_p0 = scmp.ge.s32.totalorder %s615_s15, 1  ;;  %s615_s15 = sphi %s659_s15, %s14_s15  }
   0x2   : > { %p161_p1 = scmp.lt.s32.totalorder %s615_s15, 3 }
   0x4   : > { %p162_p2 = pnand %p488_p0, %p161_p1 }
   0x5   : > { %v670_v0 = vld [vmem:[%s723_s3] ss:$0 sm:$0xff] (!%p162_p2)  ;;  %p185_p3 = scmp.lt.s32.totalorder (!%p162_p2), %s484_s16, 1  ;;  %v621_v1 = vmov (!%p162_p2), 0.0   ;;  %s680_s26 = smov (!%p162_p2), 0  }
   0x6   : > { %165 = sbr.rel (%p162_p2) target bundleno = 398 (0x18e), region = 36  ;;  %193 = vst [vmem:[#allocation2] sm:$0xff] (!%p162_p2), %v621_v1  ;;  %194 = vst [vmem:[#allocation2 + $0x10] sm:$0xff] (!%p162_p2), %v621_v1 }
   0xd   : > { %s726_s16 = smov (!%p185_p3, %s484_s16), 1 }
   0xe   : > { %s489_s19 = sshll.u32 %s726_s16, 3 }
   0xf   : > { %s188_s22 = scalar_lea.vmem %s720_s0, %s489_s19  ;;  %s678_s25 = scalar_lea.vmem %s724_s4, %s489_s19 }
  0x10   : > { %v195_v2 = vld [vmem:[%s188_s22] sm:$0xff] }
  0x11   : > { %196 = vst [vmem:[#allocation2 + $0x8] sm:$0xff] %v195_v2 }
  0x12 LB: >> { %v204_v3 = vld [vmem:[#allocation2] sm:$0xff]  ;;  %v206_v5 = vld [vmem:[#allocation2 + $0x10] sm:$0xff]  ;;  %v622_v8 = vmov 0.0|0.0   ;;  %s623_s27 = smov 9   ;;  %s624_s28 = smov 11   ;;  %vm631_vm3 = vmmov 0   ;;  %s619_s26 = sphi %s680_s26, %s203_s26  }
  0x13   : >> { %vm207_vm0 = vcmp.gt.f32.partialorder %v204_v3, 0.0  ;;  %v210_v6 = vmul.f32 0.01, %v204_v3  ;;  %527 = vmatprep.subr.bf16.mxu0 %v622_v8  ;;  %v212_v11 = vmul.f32 0.01, %v206_v5  ;;  %vm209_vm2 = vcmp.gt.f32.partialorder %v206_v5, 0.0 }
  0x14   : >> { %s625_s29 = smov 1   ;;  %s626_s30 = smov 10   ;;  %v632_v15 = vmov 0.0   ;;  %v633_v16 = vmov 0   ;;  %vm227_vm4 = vcmask 89088   ;;  %vm239_vm5 = vcmask 80896  }
  0x15   : >> { %v213_v9 = vsel %vm207_vm0, %v204_v3, %v210_v6  ;;  %v215_v13 = vsel %vm209_vm2, %v206_v5, %v212_v11  ;;  %s627_s5 = smov 127   ;;  %s628_s6 = smov 119   ;;  %524 = vmatprep.mubr.msk.f32.mxu0 %vm631_vm3, %v632_v15  ;;  %603 = vset.pattern.permute.xlu1 %v633_v16  ;;  %vm251_vm6 = vcmask 72704   ;;  %vm263_vm7 = vcmask 7168  }
  0x16   : >> { %s629_s7 = smov 118   ;;  %s630_s8 = smov 117   ;;  %604 = vset.pattern.permute.xlu0 %v633_v16  ;;  %vm277_vm8 = vcmask 1039360   ;;  %vm289_vm9 = vcmask 973824   ;;  %vm301_vm10 = vcmask 965632   ;;  %vm313_vm11 = vcmask 957440  }
  0x17   : >> { %s491_s9 = sshll.u32 %s619_s26, 3  ;;  %vm336_vm12 = vcmask 588800   ;;  %s203_s26 = sadd.s32 1, %s619_s26  }
  0x18   : >> { %v685_v4 = vld [vmem:[#allocation2 + $0x8] sm:$0xff]  ;;  %s329_s12 = scalar_lea.vmem %s722_s2, %s491_s9  ;;  %s318_s16 = scalar_lea.vmem %s721_s1, %s491_s9 }
  0x19   : >> { %vm208_vm1 = vcmp.gt.f32.partialorder %v685_v4, 0.0  ;;  %v211_v7 = vmul.f32 0.01, %v685_v4  ;;  %v330_v17 = vld [vmem:[%s329_s12] sm:$0xff]  ;;  %p200_p4 = scmp.ge.s32.totalorder %s203_s26, 2  }
  0x1a   : >> { %v319_v53 = vld [vmem:[%s318_s16] sm:$0xff] }
  0x1b   : >> { %v691_v10 = vsel %vm208_vm1, %v685_v4, %v211_v7 }
  0x1c   : >> { %v578_v12 = vpack.i.bf16 %v691_v10, %v213_v9  ;;  %v588_v14 = vpack.i.bf16 %v215_v13, %v691_v10 }
  0x1e   : >> { %579 = vrot.lane.b32.xlu1 %v578_v12, %s623_s27  ;;  %569 = vrot.lane.b32.xlu0 %v578_v12, %s624_s28 }
  0x22   : >> { %584 = vrot.lane.b32.xlu1 %v578_v12, %s625_s29  ;;  %574 = vrot.lane.b32.xlu0 %v578_v12, %s626_s30 }
  0x26   : >> { %589 = vrot.lane.b32.xlu0 %v588_v14, %s627_s5  ;;  %594 = vrot.lane.b32.xlu1 %v588_v14, %s628_s6 }
  0x2a   : >> { %599 = vrot.lane.b32.xlu0 %v588_v14, %s629_s7  ;;  %309 = vrot.lane.b32.xlu1 %v691_v10, %s630_s8 }
  0x2e   : >> { %311 = vrot.lane.b32.xlu0 %v215_v13, %s630_s8  ;;  %333 = vperm.xlu1 %603, %v330_v17  }
  0x90   : >> { %v580_v18 = vpop.permute.xlu1 %579  ;;  %v570_v19 = vpop.permute.xlu0 %569 }
  0x91   : >> { %v572_v20 = vunpack.i.h.bf16 %v570_v19  ;;  %v571_v21 = vunpack.i.l.bf16 %v570_v19  ;;  %v582_v22 = vunpack.i.h.bf16 %v580_v18  ;;  %v581_v23 = vunpack.i.l.bf16 %v580_v18 }
  0x93   : >> { %v228_v30 = vsel %vm227_vm4, %v571_v21, %v572_v20  ;;  %v252_v37 = vsel %vm251_vm6, %v581_v23, %v582_v22 }
  0x94   : >> { %v585_v24 = vpop.permute.xlu1 %584  ;;  %v575_v25 = vpop.permute.xlu0 %574 }
  0x95   : >> { %v587_v26 = vunpack.i.h.bf16 %v585_v24  ;;  %v586_v27 = vunpack.i.l.bf16 %v585_v24  ;;  %v577_v28 = vunpack.i.h.bf16 %v575_v25  ;;  %v576_v29 = vunpack.i.l.bf16 %v575_v25 }
  0x97   : >> { %v240_v31 = vsel %vm239_vm5, %v576_v29, %v577_v28  ;;  %v264_v38 = vsel %vm263_vm7, %v586_v27, %v587_v26 }
  0x98   : >> { %v528_v32 = vpack.c.bf16 %v240_v31, %v228_v30  ;;  %v590_v33 = vpop.permute.xlu0 %589  ;;  %v595_v34 = vpop.permute.xlu1 %594  ;;  %v531_v42 = vpack.c.bf16 %v264_v38, %v252_v37 }
  0x99   : >> { %v592_v35 = vunpack.i.h.bf16 %v590_v33  ;;  %v591_v36 = vunpack.i.l.bf16 %v590_v33  ;;  %v597_v39 = vunpack.i.h.bf16 %v595_v34  ;;  %v596_v40 = vunpack.i.l.bf16 %v595_v34 }
  0x9a   : >> { %529 = vmatpush3.bf16.msra.mxu0 %v528_v32 }
  0x9b   : >> { %530 = vmatprep.subr.bf16.mxu0 %v622_v8  ;;  %v278_v41 = vsel %vm277_vm8, %v591_v36, %v592_v35  ;;  %v290_v47 = vsel %vm289_vm9, %v596_v40, %v597_v39 }
  0x9c   : >> { %v600_v43 = vpop.permute.xlu0 %599  ;;  %v534_v46 = vpack.c.bf16 %v278_v41, %v691_v10  ;;  %v310_v50 = vpop.permute.xlu1 %309 }
  0x9d   : >> { %v602_v44 = vunpack.i.h.bf16 %v600_v43  ;;  %v601_v45 = vunpack.i.l.bf16 %v600_v43 }
  0x9e   : >> { %532 = vmatpush3.bf16.msra.mxu0 %v531_v42 }
  0x9f   : >> { %533 = vmatprep.subr.bf16.mxu0 %v622_v8  ;;  %v302_v48 = vsel %vm301_vm10, %v601_v45, %v602_v44 }
  0xa0   : >> { %v537_v49 = vpack.c.bf16 %v302_v48, %v290_v47  ;;  %v312_v51 = vpop.permute.xlu0 %311 }
  0xa1   : >> { %v314_v52 = vsel %vm313_vm11, %v310_v50, %v312_v51 }
  0xa2   : >> { %535 = vmatpush3.bf16.msra.mxu0 %v534_v46 }
  0xa3   : >> { %536 = vmatprep.subr.bf16.mxu0 %v622_v8 }
  0xa6   : >> { %538 = vmatpush3.bf16.msra.mxu0 %v537_v49 }
  0xa7   : >> { %522 = vmatprep.subr.mxu0 %v632_v15 }
  0xaa   : >> { %523 = vmatpush3.msra.mxu0 %v314_v52 }
  0xab   : >> { %525 = vmatmul.mubr.msk.f32.vlgmr.msra.gmra.mrb[0].mxu0 %vm336_vm12, %v319_v53 }
  0xad   : >> { %v334_v54 = vpop.permute.xlu1 %333 }
 0x17e   : >> { %v406_v55 = vpop.f32.mrb[0].mxu0 }
 0x17f   : >> { %v407_v56 = vadd.f32 %v406_v55, %v334_v54  ;;  %v526_v57 = vpop.f32.mrb[1].mxu0  ;;  %202 = sbr.rel (!%p200_p4) target bundleno = 18 (0x12), region = 75 }
 0x181   : >> { %v411_v58 = vadd.f32 %v407_v56, %v685_v4 }
 0x183   : >> { %v418_v59 = vmul.f32 %v670_v0, %v411_v58 }
 0x185   : >> { %419 = vst [vmem:[#allocation2 + $0x8] sm:$0xff] %v418_v59 }
 0x18c   : > { %v420_v60 = vld [vmem:[#allocation2 + $0x8] sm:$0xff] }
 0x18d   : > { %421 = vst [vmem:[%s678_s25] sm:$0xff] %v420_v60 }
 0x18e PF: > { %s14_s15 = sadd.s32 1, %s615_s15  }
 0x18f   : > { %p11_p5 = scmp.ge.s32.totalorder %s14_s15, 4  }
 0x191   :  { %13 = sbr.rel (!%p11_p5) target bundleno = 1 (0x1), region = 86 }

// kernel: spectral_unet_forward.17
= control target key start
LH: loop header
LB: loop body
LE: loop exit
PB: predicated region body
PF: predicated region fallthrough
CT: control target
= control target key end

     0   :  { %s449_s15 = smov 0   ;;  %s483_s0 = inlined_call_operand.vmem [shape: f32[2,32,128], index: 0, kind: input, shape index: {}]   ;;  %s484_s1 = inlined_call_operand.vmem [shape: f32[16,32], index: 1, kind: input, shape index: {}]   ;;  %s485_s2 = inlined_call_operand.vmem [shape: f32[16,1], index: 2, kind: input, shape index: {}]   ;;  %s486_s3 = inlined_call_operand.vmem [shape: f32[1,128], index: 3, kind: input, shape index: {}]   ;;  %s487_s4 = inlined_call_operand.vmem [shape: f32[2,16,128], index: 4, kind: output, shape index: {}]  }
   0x1 LB: > { %s364_s16 = sadd.s32 4294967295, %s421_s15   ;;  %p368_p0 = scmp.ge.s32.totalorder %s421_s15, 1  ;;  %s421_s15 = sphi %s449_s15, %s14_s15  }
   0x2   : > { %p162_p1 = scmp.lt.s32.totalorder %s421_s15, 3 }
   0x4   : > { %p163_p2 = pnand %p368_p0, %p162_p1 }
   0x5   : > { %p188_p3 = scmp.lt.s32.totalorder (!%p163_p2), %s364_s16, 1  ;;  %v198_v0 = vld [vmem:[%s484_s1] sm:$0xff] (!%p163_p2)  ;;  %vm216_vm0 = vcmask (!%p163_p2), 261120   ;;  %v423_v2 = vmov (!%p163_p2), 0   ;;  %v205_v3 = vld [vmem:[%s485_s2 + $0x8] sm:$0xff] (!%p163_p2) }
   0x6   : > { %166 = sbr.rel (%p163_p2) target bundleno = 245 (0xf5), region = 36  ;;  %v204_v1 = vld [vmem:[%s485_s2] sm:$0xff] (!%p163_p2)  ;;  %394 = vmatprep.mubr.msk.f32.mxu0 (!%p163_p2), %vm216_vm0, %v198_v0  ;;  %414 = vset.pattern.permute.xlu0 (!%p163_p2), %v423_v2  ;;  %v199_v10 = vld [vmem:[%s484_s1 + $0x8] sm:$0xff] (!%p163_p2) }
   0x7   : > { %208 = vperm.xlu0 (!%p163_p2), %414, %v204_v1   ;;  %v375_v14 = vld [vmem:[%s486_s3] ss:$0 sm:$0xff] (!%p163_p2) }
   0xb   : > { %213 = vperm.xlu0 (!%p163_p2), %414, %v205_v3  }
   0xd   : > { %s489_s16 = smov (!%p188_p3, %s364_s16), 1 }
   0xe   : > { %s378_s23 = sshll.u32 %s489_s16, 5  ;;  %s379_s29 = sshll.u32 %s489_s16, 4 }
   0xf   : > { %s192_s26 = scalar_lea.vmem %s483_s0, %s378_s23  ;;  %s197_s8 = scalar_lea.vmem %s487_s4, %s379_s29 }
  0x10   : > { %v200_v4 = vld [vmem:[%s192_s26] sm:$0xff]  ;;  %v201_v5 = vld [vmem:[%s192_s26 + $0x8] sm:$0xff]  ;;  %v202_v6 = vld [vmem:[%s192_s26 + $0x10] sm:$0xff] }
  0x11   : > { %v397_v7 = vpack.c.bf16 %v201_v5, %v200_v4  ;;  %v203_v8 = vld [vmem:[%s192_s26 + $0x18] sm:$0xff] }
  0x12   : > { %v401_v9 = vpack.c.bf16 %v203_v8, %v202_v6 }
  0x13   : > { %398 = vmatprep.subr.bf16.mxu0 %v397_v7 }
  0x14   : > { %400 = vmatpush3.bf16.msra.mxu0 %v397_v7 }
  0x15   : > { %402 = vmatprep.subr.bf16.mxu0 %v401_v9 }
  0x18   : > { %404 = vmatpush3.bf16.msra.mxu0 %v401_v9 }
  0x1b   : > { %395 = vmatmul.mubr.msk.f32.vlgmr.msra.gmra.mrb[0].mxu0 %vm216_vm0, %v199_v10 }
  0x86   : > { %v209_v11 = vpop.permute.xlu0 %208 }
  0x8a   : > { %v214_v12 = vpop.permute.xlu0 %213 }
  0xee   : > { %v396_v13 = vpop.f32.mrb[0].mxu0 }
  0xef   : > { %v295_v15 = vadd.f32 %v396_v13, %v214_v12  ;;  %v289_v16 = vpop.f32.mrb[1].mxu0 }
  0xf0   : > { %v290_v17 = vadd.f32 %v289_v16, %v209_v11 }
  0xf1   : > { %v306_v18 = vmul.f32 %v375_v14, %v295_v15 }
  0xf2   : > { %v305_v19 = vmul.f32 %v375_v14, %v290_v17 }
  0xf3   : > { %308 = vst [vmem:[%s197_s8 + $0x8] sm:$0xff] %v306_v18 }
  0xf4   : > { %307 = vst [vmem:[%s197_s8] sm:$0xff] %v305_v19 }
  0xf5 PF: > { %s14_s15 = sadd.s32 1, %s421_s15  }
  0xf6   : > { %p11_p4 = scmp.ge.s32.totalorder %s14_s15, 4  }
  0xf8   :  { %13 = sbr.rel (!%p11_p4) target bundleno = 1 (0x1), region = 66 }

// kernel: spectral_unet_forward.18
= control target key start
LH: loop header
LB: loop body
LE: loop exit
PB: predicated region body
PF: predicated region fallthrough
CT: control target
= control target key end

     0   :  { %s860_s15 = smov 0   ;;  %s944_s0 = inlined_call_operand.vmem [shape: f32[2,16,128], index: 0, kind: input, shape index: {}]   ;;  %s945_s1 = inlined_call_operand.vmem [shape: f32[2,16,144], index: 1, kind: input, shape index: {}]   ;;  %s946_s2 = inlined_call_operand.vmem [shape: f32[2,16,1], index: 2, kind: input, shape index: {}]   ;;  %s947_s3 = inlined_call_operand.vmem [shape: f32[1,128], index: 3, kind: input, shape index: {}]   ;;  %s948_s4 = inlined_call_operand.vmem [shape: f32[2,16,128], index: 4, kind: output, shape index: {}]  }
   0x1 LB: > { %s634_s16 = sadd.s32 4294967295, %s818_s15   ;;  %p638_p0 = scmp.ge.s32.totalorder %s818_s15, 1  ;;  %s818_s15 = sphi %s860_s15, %s14_s15  }
   0x2   : > { %p162_p1 = scmp.lt.s32.totalorder %s818_s15, 3 }
   0x4   : > { %p163_p2 = pnand %p638_p0, %p162_p1 }
   0x5   : > { %v871_v0 = vld [vmem:[%s947_s3] ss:$0 sm:$0xff] (!%p163_p2)  ;;  %p188_p3 = scmp.lt.s32.totalorder (!%p163_p2), %s634_s16, 1  ;;  %v824_v1 = vmov (!%p163_p2), 0.0   ;;  %s881_s26 = smov (!%p163_p2), 0  }
   0x6   : > { %166 = sbr.rel (%p163_p2) target bundleno = 416 (0x1a0), region = 36  ;;  %198 = vst [vmem:[#allocation2] sm:$0xff] (!%p163_p2), %v824_v1  ;;  %199 = vst [vmem:[#allocation2 + $0x18] sm:$0xff] (!%p163_p2), %v824_v1 }
   0x7   : > { %200 = vst [vmem:[#allocation2 + $0x10] sm:$0xff] (!%p163_p2), %v824_v1  ;;  %201 = vst [vmem:[#allocation2 + $0x28] sm:$0xff] (!%p163_p2), %v824_v1 }
   0xd   : > { %s950_s16 = smov (!%p188_p3, %s634_s16), 1 }
   0xe   : > { %s651_s19 = sshll.u32 %s950_s16, 4 }
   0xf   : > { %s192_s22 = scalar_lea.vmem %s944_s0, %s651_s19  ;;  %s879_s25 = scalar_lea.vmem %s948_s4, %s651_s19 }
  0x10   : > { %v202_v2 = vld [vmem:[%s192_s22] sm:$0xff]  ;;  %v203_v3 = vld [vmem:[%s192_s22 + $0x8] sm:$0xff] }
  0x11   : > { %204 = vst [vmem:[#allocation2 + $0x8] sm:$0xff] %v202_v2  ;;  %205 = vst [vmem:[#allocation2 + $0x20] sm:$0xff] %v203_v3 }
  0x12 LB: >> { %v213_v4 = vld [vmem:[#allocation2] sm:$0xff]  ;;  %v216_v6 = vld [vmem:[#allocation2 + $0x18] sm:$0xff]  ;;  %v825_v9 = vmov 0.0|0.0   ;;  %s826_s27 = smov 6   ;;  %s827_s28 = smov 7   ;;  %v218_v19 = vld [vmem:[#allocation2 + $0x28] sm:$0xff]  ;;  %s822_s26 = sphi %s881_s26, %s212_s26  }
  0x13   : >> { %vm219_vm0 = vcmp.gt.f32.partialorder %v213_v4, 0.0  ;;  %v225_v7 = vmul.f32 0.01, %v213_v4  ;;  %654 = vmatprep.subr.bf16.mxu0 %v825_v9  ;;  %681 = vmatprep.subr.bf16.mxu1 %v825_v9  ;;  %vm222_vm2 = vcmp.gt.f32.partialorder %v216_v6, 0.0  ;;  %v228_v11 = vmul.f32 0.01, %v216_v6 }
  0x14   : >> { %v215_v20 = vld [vmem:[#allocation2 + $0x10] sm:$0xff]  ;;  %v230_v21 = vmul.f32 0.01, %v218_v19  ;;  %vm224_vm4 = vcmp.gt.f32.partialorder %v218_v19, 0.0  ;;  %s828_s29 = smov 5   ;;  %s829_s30 = smov 1  }
  0x15   : >> { %v231_v12 = vsel %vm219_vm0, %v213_v4, %v225_v7  ;;  %v234_v16 = vsel %vm222_vm2, %v216_v6, %v228_v11  ;;  %v227_v22 = vmul.f32 0.01, %v215_v20  ;;  %vm221_vm5 = vcmp.gt.f32.partialorder %v215_v20, 0.0  ;;  %s830_s5 = smov 127   ;;  %s831_s6 = smov 123  }
  0x16   : >> { %v236_v23 = vsel %vm224_vm4, %v218_v19, %v230_v21  ;;  %s832_s7 = smov 122   ;;  %s653_s8 = sshll.u32 %s822_s26, 5  ;;  %vm470_vm6 = vcmask 130048   ;;  %v834_v30 = vmov 0   ;;  %vm259_vm7 = vcmask 56320  }
  0x17   : >> { %v233_v24 = vsel %vm221_vm5, %v215_v20, %v227_v22  ;;  %s833_s9 = smov 121   ;;  %s904_s12 = scalar_lea.vmem %s945_s1, %s653_s8  ;;  %807 = vset.pattern.permute.xlu1 %v834_v30  ;;  %806 = vset.pattern.permute.xlu0 %v834_v30  ;;  %vm282_vm8 = vcmask 48128   ;;  %vm305_vm9 = vcmask 39936   ;;  %vm328_vm10 = vcmask 7168  }
  0x18   : >> { %v886_v5 = vld [vmem:[#allocation2 + $0x8] sm:$0xff]  ;;  %v892_v10 = vld [vmem:[#allocation2 + $0x20] sm:$0xff]  ;;  %v437_v29 = vld [vmem:[%s904_s12 + $0x18] sm:$0xff]  ;;  %s645_s13 = sshll.u32 %s822_s26, 4  ;;  %vm355_vm11 = vcmask 1039360   ;;  %vm378_vm12 = vcmask 1006592  }
  0x19   : >> { %vm220_vm1 = vcmp.gt.f32.partialorder %v886_v5, 0.0  ;;  %v226_v8 = vmul.f32 0.01, %v886_v5  ;;  %vm223_vm3 = vcmp.gt.f32.partialorder %v892_v10, 0.0  ;;  %v229_v14 = vmul.f32 0.01, %v892_v10  ;;  %647 = vmatprep.mubr.msk.f32.mxu1 %vm470_vm6, %v437_v29  ;;  %s457_s17 = scalar_lea.vmem %s946_s2, %s645_s13 }
  0x1a   : >> { %v435_v28 = vld [vmem:[%s904_s12 + $0x8] sm:$0xff]  ;;  %v458_v32 = vld [vmem:[%s457_s17] sm:$0xff]  ;;  %vm401_vm13 = vcmask 998400   ;;  %vm424_vm14 = vcmask 990208   ;;  %s212_s26 = sadd.s32 1, %s822_s26  }
  0x1b   : >> { %v232_v13 = vsel %vm220_vm1, %v886_v5, %v226_v8  ;;  %v235_v17 = vsel %vm223_vm3, %v892_v10, %v229_v14  ;;  %646 = vmatprep.mubr.msk.f32.mxu0 %vm470_vm6, %v435_v28  ;;  %v459_v31 = vld [vmem:[%s457_s17 + $0x8] sm:$0xff]  ;;  %p209_p4 = scmp.ge.s32.totalorder %s212_s26, 2  }
  0x1c   : >> { %v736_v15 = vpack.i.bf16 %v232_v13, %v231_v12  ;;  %v741_v18 = vpack.i.bf16 %v235_v17, %v234_v16  ;;  %v898_v25 = vpack.c.bf16 %v235_v17, %v232_v13  ;;  %v771_v26 = vpack.i.bf16 %v236_v23, %v235_v17 }
  0x1d   : >> { %v766_v27 = vpack.i.bf16 %v233_v24, %v232_v13 }
  0x1e   : >> { %737 = vrot.lane.b32.xlu1 %v736_v15, %s826_s27  ;;  %727 = vrot.lane.b32.xlu0 %v736_v15, %s827_s28 }
  0x22   : >> { %742 = vrot.lane.b32.xlu1 %v741_v18, %s826_s27  ;;  %732 = vrot.lane.b32.xlu0 %v741_v18, %s827_s28 }
  0x26   : >> { %752 = vrot.lane.b32.xlu1 %v741_v18, %s828_s29  ;;  %747 = vrot.lane.b32.xlu0 %v736_v15, %s828_s29 }
  0x2a   : >> { %762 = vrot.lane.b32.xlu1 %v741_v18, %s829_s30  ;;  %757 = vrot.lane.b32.xlu0 %v736_v15, %s829_s30 }
  0x2e   : >> { %772 = vrot.lane.b32.xlu1 %v771_v26, %s830_s5  ;;  %767 = vrot.lane.b32.xlu0 %v766_v27, %s830_s5 }
  0x32   : >> { %782 = vrot.lane.b32.xlu1 %v771_v26, %s831_s6  ;;  %777 = vrot.lane.b32.xlu0 %v766_v27, %s831_s6 }
  0x36   : >> { %792 = vrot.lane.b32.xlu1 %v771_v26, %s832_s7  ;;  %787 = vrot.lane.b32.xlu0 %v766_v27, %s832_s7 }
  0x3a   : >> { %802 = vrot.lane.b32.xlu1 %v771_v26, %s833_s9  ;;  %797 = vrot.lane.b32.xlu0 %v766_v27, %s833_s9 }
  0x3e   : >> { %467 = vperm.xlu1 %807, %v459_v31   ;;  %462 = vperm.xlu0 %806, %v458_v32  }
  0x90   : >> { %v738_v33 = vpop.permute.xlu1 %737  ;;  %v728_v34 = vpop.permute.xlu0 %727 }
  0x91   : >> { %v730_v35 = vunpack.i.h.bf16 %v728_v34  ;;  %v729_v36 = vunpack.i.l.bf16 %v728_v34  ;;  %v740_v37 = vunpack.i.h.bf16 %v738_v33  ;;  %v739_v38 = vunpack.i.l.bf16 %v738_v33 }
  0x93   : >> { %v260_v45 = vsel %vm259_vm7, %v729_v36, %v730_v35  ;;  %v283_v50 = vsel %vm282_vm8, %v739_v38, %v740_v37 }
  0x94   : >> { %v743_v39 = vpop.permute.xlu1 %742  ;;  %v733_v40 = vpop.permute.xlu0 %732 }
  0x95   : >> { %v745_v41 = vunpack.i.h.bf16 %v743_v39  ;;  %v744_v42 = vunpack.i.l.bf16 %v743_v39  ;;  %v735_v43 = vunpack.i.h.bf16 %v733_v40  ;;  %v734_v44 = vunpack.i.l.bf16 %v733_v40 }
  0x97   : >> { %v261_v46 = vsel %vm259_vm7, %v734_v44, %v735_v43  ;;  %v284_v51 = vsel %vm282_vm8, %v744_v42, %v745_v41 }
  0x98   : >> { %v655_v47 = vpack.c.bf16 %v261_v46, %v260_v45  ;;  %v753_v48 = vpop.permute.xlu1 %752  ;;  %v748_v49 = vpop.permute.xlu0 %747  ;;  %v658_v58 = vpack.c.bf16 %v284_v51, %v283_v50  ;;  %v434_v45 = vld [vmem:[%s904_s12] sm:$0xff]  ;;  %v436_v46 = vld [vmem:[%s904_s12 + $0x10] sm:$0xff] }
  0x99   : >> { %v755_v52 = vunpack.i.h.bf16 %v753_v48  ;;  %v754_v53 = vunpack.i.l.bf16 %v753_v48  ;;  %v750_v54 = vunpack.i.h.bf16 %v748_v49  ;;  %v749_v55 = vunpack.i.l.bf16 %v748_v49 }
  0x9a   : >> { %656 = vmatpush1.bf16.msra.mxu0 %v655_v47  ;;  %690 = vmatpush1.bf16.msra.mxu1 %v655_v47 }
  0x9b   : >> { %657 = vmatprep.subr.bf16.mxu0 %v825_v9  ;;  %682 = vmatprep.subr.bf16.mxu1 %v825_v9  ;;  %v306_v56 = vsel %vm305_vm9, %v749_v55, %v750_v54  ;;  %v307_v57 = vsel %vm305_vm9, %v754_v53, %v755_v52 }
  0x9c   : >> { %v763_v59 = vpop.permute.xlu1 %762  ;;  %v758_v60 = vpop.permute.xlu0 %757  ;;  %v661_v2 = vpack.c.bf16 %v307_v57, %v306_v56 }
  0x9d   : >> { %v765_v61 = vunpack.i.h.bf16 %v763_v59  ;;  %v764_v62 = vunpack.i.l.bf16 %v763_v59  ;;  %v760_v63 = vunpack.i.h.bf16 %v758_v60  ;;  %v759_v1 = vunpack.i.l.bf16 %v758_v60 }
  0x9e   : >> { %659 = vmatpush1.bf16.msra.mxu0 %v658_v58  ;;  %691 = vmatpush1.bf16.msra.mxu1 %v658_v58 }
  0x9f   : >> { %660 = vmatprep.subr.bf16.mxu0 %v825_v9  ;;  %683 = vmatprep.subr.bf16.mxu1 %v825_v9  ;;  %v329_v3 = vsel %vm328_vm10, %v759_v1, %v760_v63  ;;  %v330_v4 = vsel %vm328_vm10, %v764_v62, %v765_v61 }
  0xa0   : >> { %v773_v6 = vpop.permute.xlu1 %772  ;;  %v768_v7 = vpop.permute.xlu0 %767  ;;  %v664_v8 = vpack.c.bf16 %v330_v4, %v329_v3 }
  0xa1   : >> { %v775_v11 = vunpack.i.h.bf16 %v773_v6  ;;  %v774_v12 = vunpack.i.l.bf16 %v773_v6  ;;  %v770_v13 = vunpack.i.h.bf16 %v768_v7  ;;  %v769_v14 = vunpack.i.l.bf16 %v768_v7 }
  0xa2   : >> { %662 = vmatpush1.bf16.msra.mxu0 %v661_v2  ;;  %692 = vmatpush1.bf16.msra.mxu1 %v661_v2 }
  0xa3   : >> { %663 = vmatprep.subr.bf16.mxu0 %v825_v9  ;;  %684 = vmatprep.subr.bf16.mxu1 %v825_v9  ;;  %v356_v17 = vsel %vm355_vm11, %v769_v14, %v770_v13  ;;  %v357_v18 = vsel %vm355_vm11, %v774_v12, %v775_v11 }
  0xa4   : >> { %v783_v15 = vpop.permute.xlu1 %782  ;;  %v778_v16 = vpop.permute.xlu0 %777  ;;  %v670_v26 = vpack.c.bf16 %v357_v18, %v356_v17 }
  0xa5   : >> { %v785_v19 = vunpack.i.h.bf16 %v783_v15  ;;  %v784_v20 = vunpack.i.l.bf16 %v783_v15  ;;  %v780_v21 = vunpack.i.h.bf16 %v778_v16  ;;  %v779_v22 = vunpack.i.l.bf16 %v778_v16 }
  0xa6   : >> { %665 = vmatpush1.bf16.msra.mxu0 %v664_v8  ;;  %693 = vmatpush1.bf16.msra.mxu1 %v664_v8 }
  0xa7   : >> { %666 = vmatprep.subr.bf16.mxu0 %v825_v9  ;;  %685 = vmatprep.subr.bf16.mxu1 %v825_v9  ;;  %v379_v31 = vsel %vm378_vm12, %v779_v22, %v780_v21  ;;  %v380_v32 = vsel %vm378_vm12, %v784_v20, %v785_v19 }
  0xa8   : >> { %v793_v23 = vpop.permute.xlu1 %792  ;;  %v788_v24 = vpop.permute.xlu0 %787  ;;  %v673_v35 = vpack.c.bf16 %v380_v32, %v379_v31 }
  0xa9   : >> { %v795_v27 = vunpack.i.h.bf16 %v793_v23  ;;  %v794_v28 = vunpack.i.l.bf16 %v793_v23  ;;  %v790_v29 = vunpack.i.h.bf16 %v788_v24  ;;  %v789_v30 = vunpack.i.l.bf16 %v788_v24 }
  0xaa   : >> { %668 = vmatpush1.bf16.msra.mxu0 %v898_v25  ;;  %694 = vmatpush1.bf16.msra.mxu1 %v898_v25 }
  0xab   : >> { %669 = vmatprep.subr.bf16.mxu0 %v825_v9  ;;  %686 = vmatprep.subr.bf16.mxu1 %v825_v9  ;;  %v402_v36 = vsel %vm401_vm13, %v789_v30, %v790_v29  ;;  %v403_v37 = vsel %vm401_vm13, %v794_v28, %v795_v27 }
  0xac   : >> { %v803_v33 = vpop.permute.xlu1 %802  ;;  %v798_v34 = vpop.permute.xlu0 %797  ;;  %v676_v41 = vpack.c.bf16 %v403_v37, %v402_v36 }
  0xad   : >> { %v805_v25 = vunpack.i.h.bf16 %v803_v33  ;;  %v804_v38 = vunpack.i.l.bf16 %v803_v33  ;;  %v800_v39 = vunpack.i.h.bf16 %v798_v34  ;;  %v799_v40 = vunpack.i.l.bf16 %v798_v34 }
  0xae   : >> { %671 = vmatpush1.bf16.msra.mxu0 %v670_v26  ;;  %695 = vmatpush1.bf16.msra.mxu1 %v670_v26 }
  0xaf   : >> { %672 = vmatprep.subr.bf16.mxu0 %v825_v9  ;;  %687 = vmatprep.subr.bf16.mxu1 %v825_v9  ;;  %v425_v42 = vsel %vm424_vm14, %v799_v40, %v800_v39  ;;  %v426_v43 = vsel %vm424_vm14, %v804_v38, %v805_v25 }
  0xb0   : >> { %v679_v44 = vpack.c.bf16 %v426_v43, %v425_v42 }
  0xb2   : >> { %674 = vmatpush1.bf16.msra.mxu0 %v673_v35  ;;  %696 = vmatpush1.bf16.msra.mxu1 %v673_v35 }
  0xb3   : >> { %675 = vmatprep.subr.bf16.mxu0 %v825_v9  ;;  %688 = vmatprep.subr.bf16.mxu1 %v825_v9 }
  0xb6   : >> { %677 = vmatpush1.bf16.msra.mxu0 %v676_v41  ;;  %697 = vmatpush1.bf16.msra.mxu1 %v676_v41 }
  0xb7   : >> { %678 = vmatprep.subr.bf16.mxu0 %v825_v9  ;;  %689 = vmatprep.subr.bf16.mxu1 %v825_v9 }
  0xba   : >> { %680 = vmatpush1.bf16.msra.mxu0 %v679_v44  ;;  %698 = vmatpush1.bf16.msra.mxu1 %v679_v44 }
  0xbd   : >> { %542 = vmatmul.mubr.f32.vlgmr.msra.gmra.mrb[0].mxu0 %v434_v45  ;;  %547 = vmatmul.mubr.f32.vlgmr.msra.gmra.mrb[0].mxu1 %v436_v46  ;;  %v468_v47 = vpop.permute.xlu1 %467  ;;  %v463_v48 = vpop.permute.xlu0 %462 }
 0x190   : >> { %v543_v49 = vpop.f32.mrb[0].mxu0  ;;  %v548_v50 = vpop.f32.mrb[0].mxu1 }
 0x191   : >> { %v544_v51 = vadd.f32 %v543_v49, %v463_v48  ;;  %v549_v52 = vadd.f32 %v548_v50, %v468_v47  ;;  %v545_v53 = vpop.f32.mrb[1].mxu0  ;;  %v550_v54 = vpop.f32.mrb[1].mxu1  ;;  %211 = sbr.rel (!%p209_p4) target bundleno = 18 (0x12), region = 75 }
 0x193   : >> { %v554_v55 = vadd.f32 %v544_v51, %v886_v5  ;;  %v555_v56 = vadd.f32 %v549_v52, %v892_v10 }
 0x195   : >> { %v562_v9 = vmul.f32 %v871_v0, %v554_v55  ;;  %v563_v57 = vmul.f32 %v871_v0, %v555_v56 }
 0x197   : >> { %564 = vst [vmem:[#allocation2 + $0x8] sm:$0xff] %v562_v9  ;;  %565 = vst [vmem:[#allocation2 + $0x20] sm:$0xff] %v563_v57 }
 0x19e   : > { %v566_v58 = vld [vmem:[#allocation2 + $0x8] sm:$0xff]  ;;  %v567_v59 = vld [vmem:[#allocation2 + $0x20] sm:$0xff] }
 0x19f   : > { %568 = vst [vmem:[%s879_s25] sm:$0xff] %v566_v58  ;;  %569 = vst [vmem:[%s879_s25 + $0x8] sm:$0xff] %v567_v59 }
 0x1a0 PF: > { %s14_s15 = sadd.s32 1, %s818_s15  }
 0x1a1   : > { %p11_p5 = scmp.ge.s32.totalorder %s14_s15, 4  }
 0x1a3   :  { %13 = sbr.rel (!%p11_p5) target bundleno = 1 (0x1), region = 86 }

// kernel: spectral_unet_forward.22
= control target key start
LH: loop header
LB: loop body
LE: loop exit
PB: predicated region body
PF: predicated region fallthrough
CT: control target
= control target key end

     0   :  { %s403_s15 = smov 0   ;;  %s429_s0 = inlined_call_operand.vmem [shape: f32[2,8,128], index: 0, kind: input, shape index: {}]   ;;  %s430_s1 = inlined_call_operand.vmem [shape: f32[4,8], index: 1, kind: input, shape index: {}]   ;;  %s431_s2 = inlined_call_operand.vmem [shape: f32[4,1], index: 2, kind: input, shape index: {}]   ;;  %s432_s3 = inlined_call_operand.vmem [shape: f32[1,128], index: 3, kind: input, shape index: {}]   ;;  %s433_s4 = inlined_call_operand.vmem [shape: f32[2,4,128], index: 4, kind: output, shape index: {}]  }
   0x1 LB: > { %s337_s16 = sadd.s32 4294967295, %s373_s15   ;;  %p341_p0 = scmp.ge.s32.totalorder %s373_s15, 1  ;;  %s373_s15 = sphi %s403_s15, %s14_s15  }
   0x2   : > { %p161_p1 = scmp.lt.s32.totalorder %s373_s15, 3 }
   0x4   : > { %p162_p2 = pnand %p341_p0, %p161_p1 }
   0x5   : > { %p185_p3 = scmp.lt.s32.totalorder (!%p162_p2), %s337_s16, 1  ;;  %v375_v0 = vmov (!%p162_p2), 0.0   ;;  %vm376_vm0 = vmmov (!%p162_p2), 0   ;;  %v195_v1 = vld [vmem:[%s431_s2] sm:$0xf] (!%p162_p2)  ;;  %v377_v2 = vmov (!%p162_p2), 0  }
   0x6   : > { %165 = sbr.rel (%p162_p2) target bundleno = 235 (0xeb), region = 36  ;;  %350 = vmatprep.subr.mxu0 (!%p162_p2), %v375_v0  ;;  %352 = vmatprep.mubr.msk.f32.mxu0 (!%p162_p2), %vm376_vm0, %v375_v0  ;;  %v193_v3 = vld [vmem:[%s430_s1] sm:$0xf] (!%p162_p2)  ;;  %vm201_vm1 = vcmask (!%p162_p2), 64512  }
   0x7   : > { %366 = vset.pattern.permute.xlu0 (!%p162_p2), %v377_v2  ;;  %v345_v7 = vld [vmem:[%s432_s3] ss:$0 sm:$0xff] (!%p162_p2) }
   0x8   : > { %198 = vperm.xlu0 (!%p162_p2), %366, %v195_v1  }
   0xd   : > { %s435_s16 = smov (!%p185_p3, %s337_s16), 1 }
   0xe   : > { %s342_s19 = sshll.u32 %s435_s16, 3  ;;  %s343_s25 = sshll.u32 %s435_s16, 2 }
   0xf   : > { %s188_s22 = scalar_lea.vmem %s429_s0, %s342_s19  ;;  %s192_s30 = scalar_lea.vmem %s433_s4, %s343_s25 }
  0x10   : > { %v194_v4 = vld [vmem:[%s188_s22] sm:$0xff] }
  0x11   : > { %351 = vmatpush3.msra.mxu0 %v194_v4 }
  0x12   : > { %353 = vmatmul.mubr.msk.f32.vlgmr.msra.gmra.mrb[0].mxu0 %vm201_vm1, %v193_v3 }
  0x87   : > { %v199_v5 = vpop.permute.xlu0 %198 }
  0xe5   : > { %v271_v6 = vpop.f32.mrb[0].mxu0 }
  0xe6   : > { %v272_v8 = vadd.f32 %v271_v6, %v199_v5  ;;  %v354_v9 = vpop.f32.mrb[1].mxu0 }
  0xe8   : > { %v282_v10 = vmul.f32 %v345_v7, %v272_v8 }
  0xea   : > { %283 = vst [vmem:[%s192_s30] sm:$0xf] %v282_v10 }
  0xeb PF: > { %s14_s15 = sadd.s32 1, %s373_s15  }
  0xec   : > { %p11_p4 = scmp.ge.s32.totalorder %s14_s15, 4  }
  0xee   :  { %13 = sbr.rel (!%p11_p4) target bundleno = 1 (0x1), region = 66 }

// kernel: spectral_unet_forward.21
= control target key start
LH: loop header
LB: loop body
LE: loop exit
PB: predicated region body
PF: predicated region fallthrough
CT: control target
= control target key end

     0   :  { %s581_s21 = smov 0   ;;  %s613_s0 = inlined_call_operand.vmem [shape: f32[2,8,128], index: 0, kind: input, shape index: {}]   ;;  %s614_s1 = inlined_call_operand.vmem [shape: f32[2,8,128], index: 1, kind: input, shape index: {}]   ;;  %s615_s2 = inlined_call_operand.vmem [shape: f32[8,8], index: 2, kind: input, shape index: {}]   ;;  %s616_s3 = inlined_call_operand.vmem [shape: f32[8,8], index: 3, kind: input, shape index: {}]   ;;  %s617_s4 = inlined_call_operand.vmem [shape: f32[8,1], index: 4, kind: input, shape index: {}]   ;;  %s618_s5 = inlined_call_operand.vmem [shape: f32[1,128], index: 5, kind: input, shape index: {}]   ;;  %s619_s6 = inlined_call_operand.vmem [shape: f32[2,8,128], index: 6, kind: output, shape index: {}]  }
   0x1 LB: > { %s496_s22 = sadd.s32 4294967295, %s541_s21   ;;  %p500_p0 = scmp.ge.s32.totalorder %s541_s21, 1  ;;  %s541_s21 = sphi %s581_s21, %s16_s21  }
   0x2   : > { %p220_p1 = scmp.lt.s32.totalorder %s541_s21, 3 }
   0x4   : > { %p221_p2 = pnand %p500_p0, %p220_p1 }
   0x5   : > { %p252_p3 = scmp.lt.s32.totalorder (!%p221_p2), %s496_s22, 1  ;;  %v543_v0 = vmov (!%p221_p2), 0.0   ;;  %v415_v1 = vld [vmem:[%s617_s4] sm:$0xff] (!%p221_p2)  ;;  %vm544_vm0 = vmmov (!%p221_p2), 0   ;;  %v545_v2 = vmov (!%p221_p2), 0   ;;  %vm268_vm1 = vcmask (!%p221_p2), 64512  }
   0x6   : > { %224 = sbr.rel (%p221_p2) target bundleno = 238 (0xee), region = 44  ;;  %513 = vmatprep.subr.mxu0 (!%p221_p2), %v543_v0  ;;  %518 = vmatprep.subr.mxu1 (!%p221_p2), %v543_v0  ;;  %v266_v3 = vld [vmem:[%s616_s3] sm:$0xff] (!%p221_p2) }
   0x7   : > { %515 = vmatprep.mubr.msk.f32.mxu0 (!%p221_p2), %vm544_vm0, %v543_v0  ;;  %520 = vmatprep.mubr.msk.f32.mxu1 (!%p221_p2), %vm544_vm0, %v543_v0  ;;  %v264_v5 = vld [vmem:[%s615_s2] sm:$0xff] (!%p221_p2) }
   0x8   : > { %534 = vset.pattern.permute.xlu0 (!%p221_p2), %v545_v2  ;;  %v506_v13 = vld [vmem:[%s618_s5] ss:$0 sm:$0xff] (!%p221_p2) }
   0x9   : > { %418 = vperm.xlu0 (!%p221_p2), %534, %v415_v1  }
   0xd   : > { %s621_s22 = smov (!%p252_p3, %s496_s22), 1 }
   0xe   : > { %s501_s25 = sshll.u32 %s621_s22, 3 }
   0xf   : > { %s259_s28 = scalar_lea.vmem %s614_s1, %s501_s25  ;;  %s255_s9 = scalar_lea.vmem %s613_s0, %s501_s25 }
  0x10   : > { %v267_v4 = vld [vmem:[%s259_s28] sm:$0xff]  ;;  %s263_s16 = scalar_lea.vmem %s619_s6, %s501_s25 }
  0x11   : > { %514 = vmatpush3.msra.mxu0 %v267_v4  ;;  %v265_v6 = vld [vmem:[%s255_s9] sm:$0xff] }
  0x12   : > { %519 = vmatpush3.msra.mxu1 %v265_v6  ;;  %516 = vmatmul.mubr.msk.f32.vlgmr.msra.gmra.mrb[0].mxu0 %vm268_vm1, %v266_v3 }
  0x13   : > { %521 = vmatmul.mubr.msk.f32.vlgmr.msra.gmra.mrb[0].mxu1 %vm268_vm1, %v264_v5 }
  0x88   : > { %v419_v8 = vpop.permute.xlu0 %418 }
  0xe5   : > { %v338_v7 = vpop.f32.mrb[0].mxu0 }
  0xe6   : > { %v411_v9 = vpop.f32.mrb[0].mxu1  ;;  %v517_v10 = vpop.f32.mrb[1].mxu0 }
  0xe7   : > { %v412_v11 = vadd.f32 %v411_v9, %v338_v7  ;;  %v522_v12 = vpop.f32.mrb[1].mxu1 }
  0xe9   : > { %v421_v14 = vadd.f32 %v419_v8, %v412_v11 }
  0xeb   : > { %v429_v15 = vmul.f32 %v506_v13, %v421_v14 }
  0xed   : > { %430 = vst [vmem:[%s263_s16] sm:$0xff] %v429_v15 }
  0xee PF: > { %s16_s21 = sadd.s32 1, %s541_s21  }
  0xef   : > { %p13_p4 = scmp.ge.s32.totalorder %s16_s21, 4  }
  0xf1   :  { %15 = sbr.rel (!%p13_p4) target bundleno = 1 (0x1), region = 77 }

// kernel: spectral_unet_forward.24
= control target key start
LH: loop header
LB: loop body
LE: loop exit
PB: predicated region body
PF: predicated region fallthrough
CT: control target
= control target key end

     0   :  { %s785_s21 = smov 0   ;;  %s834_s0 = inlined_call_operand.vmem [shape: f32[2,4,384], index: 0, kind: input, shape index: {}]   ;;  %s835_s1 = inlined_call_operand.vmem [shape: f32[2,4,384], index: 1, kind: input, shape index: {}]   ;;  %s836_s2 = inlined_call_operand.vmem [shape: f32[4,4], index: 2, kind: input, shape index: {}]   ;;  %s837_s3 = inlined_call_operand.vmem [shape: f32[4,4], index: 3, kind: input, shape index: {}]   ;;  %s838_s4 = inlined_call_operand.vmem [shape: f32[4,1], index: 4, kind: input, shape index: {}]   ;;  %s839_s5 = inlined_call_operand.vmem [shape: f32[1,384], index: 5, kind: input, shape index: {}]   ;;  %s840_s6 = inlined_call_operand.vmem [shape: f32[2,4,384], index: 6, kind: output, shape index: {}]  }
   0x1 LB: > { %s688_s22 = sadd.s32 4294967295, %s745_s21   ;;  %p692_p0 = scmp.ge.s32.totalorder %s745_s21, 1  ;;  %s745_s21 = sphi %s785_s21, %s16_s21  }
   0x2   : > { %p222_p1 = scmp.lt.s32.totalorder %s745_s21, 3 }
   0x4   : > { %p223_p2 = pnand %p692_p0, %p222_p1 }
   0x5   : > { %p257_p3 = scmp.lt.s32.totalorder (!%p223_p2), %s688_s22, 1  ;;  %v747_v0 = vmov (!%p223_p2), 0.0   ;;  %v586_v1 = vld [vmem:[%s838_s4] sm:$0xf] (!%p223_p2)  ;;  %vm748_vm0 = vmmov (!%p223_p2), 0   ;;  %v749_v2 = vmov (!%p223_p2), 0   ;;  %v597_v11 = vlaneseq (!%p223_p2) }
   0x6   : > { %226 = sbr.rel (%p223_p2) target bundleno = 250 (0xfa), region = 44  ;;  %356 = vmatprep.mubr.f32.mxu0 (!%p223_p2), %v747_v0  ;;  %712 = vmatprep.subr.mxu1 (!%p223_p2), %v747_v0  ;;  %v275_v3 = vld [vmem:[%s837_s3] sm:$0xf] (!%p223_p2)  ;;  %vm281_vm1 = vcmask (!%p223_p2), 31744   ;;  %vm285_vm2 = vcmask (!%p223_p2), 1043456  }
   0x7   : > { %714 = vmatprep.mubr.msk.f32.mxu1 (!%p223_p2), %vm748_vm0, %v747_v0  ;;  %736 = vset.pattern.permute.xlu0 (!%p223_p2), %v749_v2  ;;  %v272_v10 = vld [vmem:[%s836_s2] sm:$0xf] (!%p223_p2)  ;;  %v598_v12 = vshrl.u32 (!%p223_p2), %v597_v11, 7 }
   0x8   : > { %589 = vperm.xlu0 (!%p223_p2), %736, %v586_v1   ;;  %v595_v16 = vld [vmem:[%s839_s5] sm:$0x7] (!%p223_p2) }
   0x9   : > { %v607_v15 = vsub.s32 (!%p223_p2), 2, %v598_v12  ;;  %v599_v22 = vsub.s32 (!%p223_p2), 0, %v598_v12  ;;  %v603_v24 = vsub.s32 (!%p223_p2), 1, %v598_v12 }
   0xb   : > { %v608_v20 = vrot.slane (!%p223_p2), %v595_v16, %v607_v15  ;;  %v600_v26 = vrot.slane (!%p223_p2), %v595_v16, %v599_v22  ;;  %v604_v28 = vrot.slane (!%p223_p2), %v595_v16, %v603_v24 }
   0xd   : > { %s842_s22 = smov (!%p257_p3, %s688_s22), 1 }
   0xe   : > { %s797_s25 = smul.u32 12, %s842_s22 }
  0x10   : > { %s266_s28 = scalar_lea.vmem %s835_s1, %s797_s25  ;;  %s261_s9 = scalar_lea.vmem %s834_s0, %s797_s25 }
  0x11   : > { %v276_v4 = vld [vmem:[%s266_s28] sm:$0xff]  ;;  %v277_v6 = vld [vmem:[%s266_s28 + $0x8] sm:$0xf]  ;;  %s271_s16 = scalar_lea.vmem %s840_s6, %s797_s25 }
  0x12   : > { %v273_v5 = vld [vmem:[%s261_s9] sm:$0xff]  ;;  %v280_v7 = vcombine.high %v276_v4, %v276_v4  ;;  %713 = vmatpush3.msk.msra.mxu1 %vm285_vm2, %v277_v6  ;;  %v274_v9 = vld [vmem:[%s261_s9 + $0x8] sm:$0xf] }
  0x13   : > { %v435_v8 = vcombine.high %v273_v5, %v273_v5  ;;  %715 = vmatmul.mubr.msk.f32.vlgmr.msra.gmra.mrb[0].mxu1 %vm281_vm1, %v275_v3  ;;  %717 = vmatprep.subr.mxu1 %v747_v0 }
  0x14   : > { %696 = vmatprep.subr.msk.mxu0 %vm285_vm2, %v280_v7  ;;  %718 = vmatpush3.msk.msra.mxu1 %vm285_vm2, %v274_v9 }
  0x15   : > { %697 = vmatpush1.msk.msra.mxu0 %vm285_vm2, %v276_v4  ;;  %719 = vmatprep.mubr.msk.f32.mxu1 %vm748_vm0, %v747_v0 }
  0x16   : > { %698 = vmatmul.mubr.msk.f32.vlgmr.msra.gmra.mrb[0].mxu0 %vm281_vm1, %v275_v3  ;;  %701 = vmatprep.subr.msk.mxu0 %vm285_vm2, %v435_v8 }
  0x17   : > { %702 = vmatpush1.msk.msra.mxu0 %vm285_vm2, %v273_v5  ;;  %720 = vmatmul.mubr.msk.f32.vlgmr.msra.gmra.mrb[2].mxu1 %vm281_vm1, %v272_v10 }
  0x18   : > { %509 = vmatprep.mubr.f32.mxu0 %v747_v0 }
  0x1e   : > { %703 = vmatmul.mubr.msk.f32.vlgmr.msra.gmra.mrb[0].mxu0 %vm281_vm1, %v272_v10 }
  0x87   : > { %v590_v18 = vpop.permute.xlu0 %589 }
  0xe6   : > { %v429_v13 = vpop.f32.mrb[0].mxu1 }
  0xe7   : > { %v716_v14 = vpop.f32.mrb[1].mxu1 }
  0xea   : > { %v582_v17 = vpop.f32.mrb[2].mxu1 }
  0xeb   : > { %v583_v19 = vadd.f32 %v582_v17, %v429_v13  ;;  %v721_v21 = vpop.f32.mrb[3].mxu1 }
  0xed   : > { %v594_v23 = vadd.f32 %v590_v18, %v583_v19 }
  0xef   : > { %v614_v25 = vmul.f32 %v608_v20, %v594_v23 }
  0xf1   : > { %620 = vst [vmem:[%s271_s16 + $0x8] sm:$0xf] %v614_v25  ;;  %v511_v27 = vpop.f32.mrb[0].mxu0 }
  0xf2   : > { %v592_v29 = vadd.f32 %v590_v18, %v511_v27  ;;  %v513_v30 = vpop.f32.mrb[1].mxu0 }
  0xf3   : > { %v593_v31 = vadd.f32 %v590_v18, %v513_v30 }
  0xf4   : > { %v612_v32 = vmul.f32 %v600_v26, %v592_v29 }
  0xf5   : > { %v613_v33 = vmul.f32 %v604_v28, %v593_v31 }
  0xf7   : > { %v617_v34 = vcombine.low %v612_v32, %v613_v33 }
  0xf9   : > { %619 = vst [vmem:[%s271_s16] sm:$0xff] %v617_v34 }
  0xfa PF: > { %s16_s21 = sadd.s32 1, %s745_s21  }
  0xfb   : > { %p13_p4 = scmp.ge.s32.totalorder %s16_s21, 4  }
  0xfd   :  { %15 = sbr.rel (!%p13_p4) target bundleno = 1 (0x1), region = 77 }

// kernel: spectral_unet_forward.25
= control target key start
LH: loop header
LB: loop body
LE: loop exit
PB: predicated region body
PF: predicated region fallthrough
CT: control target
= control target key end

     0   :  { %s802_s15 = smov 0   ;;  %s872_s0 = inlined_call_operand.vmem [shape: f32[2,4,384], index: 0, kind: input, shape index: {}]   ;;  %s873_s1 = inlined_call_operand.vmem [shape: f32[2,36], index: 1, kind: input, shape index: {}]   ;;  %s874_s2 = inlined_call_operand.vmem [shape: f32[2,1], index: 2, kind: input, shape index: {}]   ;;  %s875_s3 = inlined_call_operand.vmem [shape: f32[1,384], index: 3, kind: input, shape index: {}]   ;;  %s876_s4 = inlined_call_operand.vmem [shape: f32[2,2,384], index: 4, kind: output, shape index: {}]  }
   0x1 LB: > { %s677_s16 = sadd.s32 4294967295, %s762_s15   ;;  %p681_p0 = scmp.ge.s32.totalorder %s762_s15, 1  ;;  %s762_s15 = sphi %s802_s15, %s14_s15  }
   0x2   : > { %p162_p1 = scmp.lt.s32.totalorder %s762_s15, 3 }
   0x4   : > { %p163_p2 = pnand %p681_p0, %p162_p1 }
   0x5   : > { %p188_p3 = scmp.lt.s32.totalorder (!%p163_p2), %s677_s16, 1  ;;  %v764_v0 = vmov (!%p163_p2), 0.0   ;;  %s765_s21 = smov (!%p163_p2), 18   ;;  %v769_v11 = vmov (!%p163_p2), 0.0|0.0   ;;  %vm774_vm0 = vmmov (!%p163_p2), 0   ;;  %v775_v16 = vmov (!%p163_p2), 0  }
   0x6   : > { %166 = sbr.rel (%p163_p2) target bundleno = 435 (0x1b3), region = 36  ;;  %198 = vst [vmem:[#allocation2] sm:$0xf] (!%p163_p2), %v764_v0  ;;  %199 = vst [vmem:[#allocation2 + $0x10] sm:$0xf] (!%p163_p2), %v764_v0  ;;  %504 = vmatprep.mubr.f32.mxu0 (!%p163_p2), %v764_v0  ;;  %s766_s22 = smov (!%p163_p2), 19   ;;  %718 = vmatprep.subr.bf16.mxu1 (!%p163_p2), %v769_v11 }
   0x7   : > { %s767_s23 = smov (!%p163_p2), 17   ;;  %s768_s24 = smov (!%p163_p2), 1   ;;  %707 = vmatprep.mubr.msk.f32.mxu1 (!%p163_p2), %vm774_vm0, %v764_v0  ;;  %747 = vset.pattern.permute.xlu0 (!%p163_p2), %v775_v16  ;;  %v420_v17 = vld [vmem:[%s874_s2] sm:$0x3] (!%p163_p2)  ;;  %vm242_vm1 = vcmask (!%p163_p2), 146432   ;;  %vm290_vm2 = vcmask (!%p163_p2), 7168  }
   0x8   : > { %s770_s25 = smov (!%p163_p2), 127   ;;  %s771_s26 = smov (!%p163_p2), 111   ;;  %vm218_vm3 = vcmask (!%p163_p2), 154624   ;;  %vm266_vm4 = vcmask (!%p163_p2), 138240   ;;  %vm322_vm5 = vcmask (!%p163_p2), 1039360   ;;  %vm346_vm6 = vcmask (!%p163_p2), 908288  }
   0x9   : > { %s772_s27 = smov (!%p163_p2), 110   ;;  %s773_s28 = smov (!%p163_p2), 109   ;;  %vm370_vm7 = vcmask (!%p163_p2), 900096   ;;  %vm394_vm8 = vcmask (!%p163_p2), 891904   ;;  %vm430_vm9 = vcmask (!%p163_p2), 1043456   ;;  %vm426_vm10 = vcmask (!%p163_p2), 293888  }
   0xd   : > { %s878_s16 = smov (!%p188_p3, %s677_s16), 1 }
   0xe   : > { %s724_s17 = smul.u32 12, %s878_s16 }
   0xf   : > { %s725_s9 = smul.u32 6, %s878_s16 }
  0x10   : > { %s192_s20 = scalar_lea.vmem %s872_s0, %s724_s17 }
  0x11   : > { %v819_v1 = vld [vmem:[%s192_s20] sm:$0xff]  ;;  %v201_v2 = vld [vmem:[%s192_s20 + $0x8] sm:$0xf]  ;;  %s197_s12 = scalar_lea.vmem %s876_s4, %s725_s9 }
  0x12   : > { %202 = vst [vmem:[#allocation2 + $0x4] sm:$0xff] %v819_v1  ;;  %203 = vst [vmem:[#allocation2 + $0xc] sm:$0xf] %v201_v2  ;;  %v336_v3 = vcombine.high %v819_v1, %v819_v1  ;;  %v312_v14 = vcombine.low %v819_v1, %v819_v1 }
  0x13   : > { %305 = vst [vmem:[#allocation3 + $0x30] sm:$0xf] %v819_v1 }
  0x14   : > { %306 = vst [vmem:[#allocation3 + $0x38] sm:$0xf] %v336_v3 }
  0x19   : > { %v228_v4 = vld [vmem:[#allocation2] sm:$0xff]  ;;  %v205_v5 = vld [vmem:[#allocation2 + $0x8] sm:$0xff] }
  0x1a   : > { %236 = vrot.lane.b32.xlu1 %v228_v4, %s765_s21  ;;  %214 = vrot.lane.b32.xlu0 %v205_v5, %s766_s22  ;;  %v233_v6 = vcombine.low %v205_v5, %v205_v5  ;;  %v208_v7 = vcombine.high %v228_v4, %v228_v4  ;;  %v232_v8 = vcombine.low %v228_v4, %v228_v4  ;;  %v309_v10 = vld [vmem:[#allocation2 + $0xc] sm:$0xff] }
  0x1b   : > { %v209_v9 = vcombine.high %v205_v5, %v205_v5  ;;  %v313_v12 = vcombine.low %v309_v10, %v309_v10  ;;  %v301_v13 = vld [vmem:[#allocation2 + $0xc] sm:$0xf]  ;;  %v337_v15 = vcombine.high %v309_v10, %v309_v10 }
  0x1c   : > { %307 = vst [vmem:[#allocation3 + $0x40] sm:$0xf] %v301_v13 }
  0x1e   : > { %262 = vrot.lane.b32.xlu1 %v205_v5, %s767_s23  ;;  %284 = vrot.lane.b32.xlu0 %v228_v4, %s768_s24 }
  0x22   : > { %238 = vrot.lane.b32.xlu1 %v233_v6, %s765_s21  ;;  %210 = vrot.lane.b32.xlu0 %v228_v4, %s766_s22 }
  0x26   : > { %286 = vrot.lane.b32.xlu1 %v233_v6, %s768_s24  ;;  %212 = vrot.lane.b32.xlu0 %v208_v7, %s766_s22 }
  0x2a   : > { %234 = vrot.lane.b32.xlu1 %v232_v8, %s765_s21  ;;  %260 = vrot.lane.b32.xlu0 %v208_v7, %s767_s23 }
  0x2e   : > { %282 = vrot.lane.b32.xlu1 %v232_v8, %s768_s24  ;;  %258 = vrot.lane.b32.xlu0 %v228_v4, %s767_s23 }
  0x32   : > { %240 = vrot.lane.b32.xlu1 %v205_v5, %s765_s21  ;;  %216 = vrot.lane.b32.xlu0 %v209_v9, %s766_s22 }
  0x36   : > { %288 = vrot.lane.b32.xlu1 %v205_v5, %s768_s24  ;;  %264 = vrot.lane.b32.xlu0 %v209_v9, %s767_s23 }
  0x3a   : > { %318 = vrot.lane.b32.xlu1 %v313_v12, %s770_s25  ;;  %316 = vrot.lane.b32.xlu0 %v819_v1, %s770_s25 }
  0x3e   : > { %342 = vrot.lane.b32.xlu1 %v309_v10, %s771_s26  ;;  %340 = vrot.lane.b32.xlu0 %v336_v3, %s771_s26 }
  0x42   : > { %366 = vrot.lane.b32.xlu1 %v313_v12, %s772_s27  ;;  %364 = vrot.lane.b32.xlu0 %v819_v1, %s772_s27 }
  0x46   : > { %338 = vrot.lane.b32.xlu1 %v819_v1, %s771_s26  ;;  %314 = vrot.lane.b32.xlu0 %v312_v14, %s770_s25 }
  0x4a   : > { %320 = vrot.lane.b32.xlu1 %v309_v10, %s770_s25  ;;  %362 = vrot.lane.b32.xlu0 %v312_v14, %s772_s27 }
  0x4e   : > { %368 = vrot.lane.b32.xlu1 %v309_v10, %s772_s27  ;;  %344 = vrot.lane.b32.xlu0 %v337_v15, %s771_s26 }
  0x52   : > { %390 = vrot.lane.b32.xlu1 %v309_v10, %s773_s28  ;;  %388 = vrot.lane.b32.xlu0 %v336_v3, %s773_s28 }
  0x56   : > { %392 = vrot.lane.b32.xlu1 %v337_v15, %s773_s28  ;;  %386 = vrot.lane.b32.xlu0 %v819_v1, %s773_s28 }
  0x5a   : > { %423 = vperm.xlu0 %747, %v420_v17  }
  0x8c   : > { %v237_v18 = vpop.permute.xlu1 %236  ;;  %v215_v19 = vpop.permute.xlu0 %214 }
  0x90   : > { %v263_v20 = vpop.permute.xlu1 %262  ;;  %v285_v21 = vpop.permute.xlu0 %284 }
  0x94   : > { %v239_v22 = vpop.permute.xlu1 %238  ;;  %v211_v23 = vpop.permute.xlu0 %210 }
  0x95   : > { %v244_v24 = vsel %vm242_vm1, %v237_v18, %v239_v22 }
  0x96   : > { %250 = vst [vmem:[#allocation3 + $0x8] sm:$0xf0] %v244_v24 }
  0x98   : > { %v287_v25 = vpop.permute.xlu1 %286  ;;  %v213_v26 = vpop.permute.xlu0 %212 }
  0x99   : > { %v292_v27 = vsel %vm290_vm2, %v285_v21, %v287_v25  ;;  %v219_v28 = vsel %vm218_vm3, %v211_v23, %v213_v26  ;;  %v220_v29 = vsel %vm218_vm3, %v213_v26, %v215_v19 }
  0x9a   : > { %298 = vst [vmem:[#allocation3 + $0x20] sm:$0xf0] %v292_v27  ;;  %225 = vst [vmem:[#allocation3] sm:$0xf] %v219_v28 }
  0x9b   : > { %226 = vst [vmem:[#allocation3 + $0x8] sm:$0xf] %v220_v29 }
  0x9c   : > { %v235_v30 = vpop.permute.xlu1 %234  ;;  %v261_v31 = vpop.permute.xlu0 %260 }
  0x9d   : > { %v243_v32 = vsel %vm242_vm1, %v235_v30, %v237_v18  ;;  %v268_v33 = vsel %vm266_vm4, %v261_v31, %v263_v20  ;;  %v404_v30 = vld [vmem:[%s873_s1] sm:$0x3] }
  0x9e   : > { %249 = vst [vmem:[#allocation3] sm:$0xf0] %v243_v32  ;;  %274 = vst [vmem:[#allocation3 + $0x20] sm:$0xf] %v268_v33  ;;  %v583_v33 = vlaneseq }
  0xa0   : > { %v283_v34 = vpop.permute.xlu1 %282  ;;  %v259_v35 = vpop.permute.xlu0 %258 }
  0xa1   : > { %v291_v36 = vsel %vm290_vm2, %v283_v34, %v285_v21  ;;  %v267_v37 = vsel %vm266_vm4, %v259_v35, %v261_v31  ;;  %v584_v34 = vshrl.u32 %v583_v33, 7 }
  0xa2   : > { %297 = vst [vmem:[#allocation3 + $0x18] sm:$0xf0] %v291_v36  ;;  %273 = vst [vmem:[#allocation3 + $0x18] sm:$0xf] %v267_v37  ;;  %v406_v42 = vld [vmem:[#allocation3 + $0x8] sm:$0xff] }
  0xa3   : > { %v585_v35 = vsub.s32 0, %v584_v34  ;;  %v581_v36 = vld [vmem:[%s875_s3] sm:$0x7]  ;;  %v776_v37 = vmov 1983009808  }
  0xa4   : > { %v241_v38 = vpop.permute.xlu1 %240  ;;  %v217_v39 = vpop.permute.xlu0 %216 }
  0xa5   : > { %v245_v40 = vsel %vm242_vm1, %v239_v22, %v241_v38  ;;  %v221_v41 = vsel %vm218_vm3, %v215_v19, %v217_v39  ;;  %v409_v43 = vld [vmem:[#allocation3 + $0x20] sm:$0xff]  ;;  %v606_v38 = vunpack.c.l.s4 %v776_v37  ;;  %v593_v39 = vsub.s32 2, %v584_v34 }
  0xa6   : > { %251 = vst [vmem:[#allocation3 + $0x10] sm:$0xf0] %v245_v40  ;;  %227 = vst [vmem:[#allocation3 + $0x10] sm:$0xf] %v221_v41  ;;  %v710_v44 = vpack.c.bf16 %v409_v43, %v406_v42  ;;  %v405_v49 = vld [vmem:[#allocation3] sm:$0xff]  ;;  %v586_v41 = vrot.slane %v581_v36, %v585_v35 }
  0xa8   : > { %v289_v45 = vpop.permute.xlu1 %288  ;;  %711 = vmatprep.subr.bf16.mxu0 %v710_v44  ;;  %v265_v46 = vpop.permute.xlu0 %264  ;;  %v607_v44 = vunpack.c.0.s8 %v606_v38 }
  0xa9   : > { %v293_v47 = vsel %vm290_vm2, %v287_v25, %v289_v45  ;;  %v269_v48 = vsel %vm266_vm4, %v263_v20, %v265_v46  ;;  %v408_v50 = vld [vmem:[#allocation3 + $0x18] sm:$0xff]  ;;  %v594_v46 = vrot.slane %v581_v36, %v593_v39 }
  0xaa   : > { %299 = vst [vmem:[#allocation3 + $0x28] sm:$0xf0] %v293_v47  ;;  %275 = vst [vmem:[#allocation3 + $0x28] sm:$0xf] %v269_v48  ;;  %v712_v51 = vpack.c.bf16 %v408_v50, %v405_v49 }
  0xac   : > { %v319_v52 = vpop.permute.xlu1 %318  ;;  %713 = vmatpush1.bf16.msra.mxu0 %v712_v51  ;;  %v317_v53 = vpop.permute.xlu0 %316 }
  0xad   : > { %v324_v54 = vsel %vm322_vm5, %v317_v53, %v319_v52  ;;  %v407_v58 = vld [vmem:[#allocation3 + $0x10] sm:$0xff] }
  0xae   : > { %330 = vst [vmem:[#allocation3 + $0x38] sm:$0xf0] %v324_v54  ;;  %v610_v54 = vsub.s32 %v607_v44, %v584_v34 }
  0xb0   : > { %v343_v55 = vpop.permute.xlu1 %342  ;;  %v341_v56 = vpop.permute.xlu0 %340 }
  0xb1   : > { %v348_v57 = vsel %vm346_vm6, %v341_v56, %v343_v55  ;;  %v410_v59 = vld [vmem:[#allocation3 + $0x28] sm:$0xff] }
  0xb2   : > { %354 = vst [vmem:[#allocation3 + $0x50] sm:$0xf] %v348_v57  ;;  %v719_v60 = vpack.c.bf16 %v410_v59, %v407_v58 }
  0xb4   : > { %v367_v61 = vpop.permute.xlu1 %366  ;;  %720 = vmatpush3.bf16.msra.mxu1 %v719_v60  ;;  %v365_v62 = vpop.permute.xlu0 %364 }
  0xb5   : > { %v372_v63 = vsel %vm370_vm7, %v365_v62, %v367_v61  ;;  %721 = vmatprep.subr.bf16.mxu1 %v769_v11  ;;  %v412_v9 = vld [vmem:[#allocation3 + $0x38] sm:$0xff] }
  0xb6   : > { %378 = vst [vmem:[#allocation3 + $0x50] sm:$0xf0] %v372_v63 }
  0xb8   : > { %v339_v1 = vpop.permute.xlu1 %338  ;;  %v315_v2 = vpop.permute.xlu0 %314 }
  0xb9   : > { %v347_v3 = vsel %vm346_vm6, %v339_v1, %v341_v56  ;;  %v323_v4 = vsel %vm322_vm5, %v315_v2, %v317_v53 }
  0xba   : > { %353 = vst [vmem:[#allocation3 + $0x48] sm:$0xf] %v347_v3  ;;  %329 = vst [vmem:[#allocation3 + $0x30] sm:$0xf0] %v323_v4 }
  0xbc   : > { %v321_v5 = vpop.permute.xlu1 %320  ;;  %v363_v6 = vpop.permute.xlu0 %362 }
  0xbd   : > { %v325_v7 = vsel %vm322_vm5, %v319_v52, %v321_v5  ;;  %v371_v8 = vsel %vm370_vm7, %v363_v6, %v365_v62  ;;  %v415_v10 = vld [vmem:[#allocation3 + $0x50] sm:$0xff] }
  0xbe   : > { %331 = vst [vmem:[#allocation3 + $0x40] sm:$0xf0] %v325_v7  ;;  %377 = vst [vmem:[#allocation3 + $0x48] sm:$0xf0] %v371_v8  ;;  %v714_v11 = vpack.c.bf16 %v415_v10, %v412_v9 }
  0xc0   : > { %v369_v12 = vpop.permute.xlu1 %368  ;;  %715 = vmatprep.subr.bf16.mxu0 %v714_v11  ;;  %v345_v13 = vpop.permute.xlu0 %344 }
  0xc1   : > { %v373_v14 = vsel %vm370_vm7, %v367_v61, %v369_v12  ;;  %v349_v15 = vsel %vm346_vm6, %v343_v55, %v345_v13  ;;  %v411_v19 = vld [vmem:[#allocation3 + $0x30] sm:$0xff] }
  0xc2   : > { %379 = vst [vmem:[#allocation3 + $0x58] sm:$0xf0] %v373_v14  ;;  %355 = vst [vmem:[#allocation3 + $0x58] sm:$0xf] %v349_v15 }
  0xc4   : > { %v391_v16 = vpop.permute.xlu1 %390  ;;  %v389_v17 = vpop.permute.xlu0 %388 }
  0xc5   : > { %v396_v18 = vsel %vm394_vm8, %v389_v17, %v391_v16  ;;  %v414_v20 = vld [vmem:[#allocation3 + $0x48] sm:$0xff]  ;;  %v413_v26 = vld [vmem:[#allocation3 + $0x40] sm:$0xff] }
  0xc6   : > { %402 = vst [vmem:[#allocation3 + $0x68] sm:$0xf] %v396_v18  ;;  %v716_v21 = vpack.c.bf16 %v414_v20, %v411_v19 }
  0xc8   : > { %v393_v22 = vpop.permute.xlu1 %392  ;;  %717 = vmatpush1.bf16.msra.mxu0 %v716_v21  ;;  %v387_v23 = vpop.permute.xlu0 %386 }
  0xc9   : > { %v397_v24 = vsel %vm394_vm8, %v391_v16, %v393_v22  ;;  %v395_v25 = vsel %vm394_vm8, %v387_v23, %v389_v17  ;;  %v416_v27 = vld [vmem:[#allocation3 + $0x58] sm:$0xff] }
  0xca   : > { %403 = vst [vmem:[#allocation3 + $0x70] sm:$0xf] %v397_v24  ;;  %401 = vst [vmem:[#allocation3 + $0x60] sm:$0xf] %v395_v25  ;;  %v722_v28 = vpack.c.bf16 %v416_v27, %v413_v26 }
  0xcc   : > { %723 = vmatpush3.bf16.msra.mxu1 %v722_v28 }
  0xcd   : > { %v418_v29 = vld [vmem:[#allocation3 + $0x68] sm:$0xf]  ;;  %705 = vmatprep.subr.mxu1 %v764_v0  ;;  %v589_v0 = vsub.s32 1, %v584_v34 }
  0xce   : > { %684 = vmatprep.subr.msk.mxu0 %vm430_vm9, %v418_v29 }
  0xcf   : > { %v590_v43 = vrot.slane %v581_v36, %v589_v0 }
  0xd1   : > { %v417_v31 = vld [vmem:[#allocation3 + $0x60] sm:$0xf]  ;;  %v419_v32 = vld [vmem:[#allocation3 + $0x70] sm:$0xf] }
  0xd2   : > { %685 = vmatpush1.msk.msra.mxu0 %vm430_vm9, %v417_v31  ;;  %706 = vmatpush3.msk.msra.mxu1 %vm430_vm9, %v419_v32 }
  0xd3   : > { %686 = vmatmul.mubr.msk.f32.vlgmr.msra.gmra.mrb[0].mxu0 %vm426_vm10, %v404_v30  ;;  %708 = vmatmul.mubr.msk.f32.vlgmr.msra.gmra.mrb[0].mxu1 %vm426_vm10, %v404_v30 }
  0xd9   : > { %v424_v40 = vpop.permute.xlu0 %423 }
 0x1a6   : > { %v506_v42 = vpop.f32.mrb[0].mxu0  ;;  %v577_v45 = vpop.f32.mrb[0].mxu1 }
 0x1a7   : > { %v507_v47 = vadd.f32 %v506_v42, %v424_v40  ;;  %v508_v48 = vpop.f32.mrb[1].mxu0  ;;  %v578_v49 = vadd.f32 %v577_v45, %v424_v40  ;;  %v709_v50 = vpop.f32.mrb[1].mxu1 }
 0x1a8   : > { %v509_v51 = vadd.f32 %v508_v48, %v424_v40 }
 0x1a9   : > { %v598_v52 = vmul.f32 %v586_v41, %v507_v47  ;;  %v600_v55 = vmul.f32 %v594_v46, %v578_v49 }
 0x1aa   : > { %v599_v53 = vmul.f32 %v590_v43, %v509_v51 }
 0x1ab   : > { %v618_v58 = vrot.slane %v600_v55, %v610_v54 }
 0x1ac   : > { %v604_v56 = vcombine.low %v598_v52, %v599_v53 }
 0x1ae   : > { %v611_v57 = vrot.slane %v604_v56, %v610_v54 }
 0x1b0   : > { %v619_v59 = vcombine.low %v611_v57, %v618_v58 }
 0x1b2   : > { %621 = vst [vmem:[%s197_s12] sm:$0x3f] %v619_v59 }
 0x1b3 PF: > { %s14_s15 = sadd.s32 1, %s762_s15  }
 0x1b4   : > { %p11_p4 = scmp.ge.s32.totalorder %s14_s15, 4  }
 0x1b6   :  { %13 = sbr.rel (!%p11_p4) target bundleno = 1 (0x1), region = 66 }

</bundles_post_ra>
